<compile_context>
chip_gen: v5e
topology: v5e:2x2
jax: 0.10.0
libtpu: 0.0.40
codegen_flags: <defaults>
</compile_context>

<pallas_src>
import numpy as np
import jax
import jax.numpy as jnp
from jax.experimental import pallas as pl
from jax.experimental.pallas import tpu as pltpu

LANE = 128


def _round_up(x, m):
    return ((x + m - 1) // m) * m


# ----------------------------------------------------------------------------
# Static index helpers (trace-time numpy; deterministic fractional pooling)
# ----------------------------------------------------------------------------
def _frac_pool_starts(in_size, out_size, u=0.5, pool=2):
    """PyTorch FractionalMaxPool2d pooling-region starts for a fixed sample u."""
    if out_size < 1:
        raise ValueError(f"fractional pool output size {out_size} < 1")
    if out_size == 1:
        return np.array([max(0, in_size - pool)], np.int64)
    alpha = (in_size - pool) / (out_size - 1)
    starts = np.empty((out_size,), np.int64)
    for i in range(out_size):
        if i == out_size - 1:
            starts[i] = in_size - pool
        else:
            starts[i] = int((i + u) * alpha) - int(u * alpha)
    return starts


def _build_card_constants(R, cardinality, s0_pad):
    """Static one-hot selection matrices per pyramid level.

    P : (4*Skp, S0)     stacked 2x2 pool-corner gathers (corner c in rows
                        [c*Skp, c*Skp+Sk); padded rows are zero)
    M : (s0_pad, 9*Skp) hstacked (zero-padded 3x3 shift o nearest upsample);
                        tap t occupies columns [t*Skp, (t+1)*Skp)
    """
    S0 = R * R
    scale = 2.0 ** (-1.0 / cardinality)
    cards = []
    for card in range(cardinality):
        ratio = scale ** (card + 1)
        oh = int(R * ratio)
        ow = int(R * ratio)
        if oh < 1 or ow < 1:
            raise ValueError(
                f"cardinality={cardinality} gives degenerate pooled size "
                f"{oh}x{ow} at level {card} (inputRes={R})")
        si = _frac_pool_starts(R, oh)
        sj = _frac_pool_starts(R, ow)
        Sk = oh * ow
        Skp = _round_up(Sk, 16)   # clean sublane tiles (also for bf16 packing)

        # 2x2 fractional-max-pool window corners, stacked along rows.
        P = np.zeros((4 * Skp, S0), np.float32)
        prow = (np.arange(oh)[:, None] * ow + np.arange(ow)[None, :]).ravel()
        for di in range(2):
            for dj in range(2):
                c = di * 2 + dj
                pcol = ((si[:, None] + di) * R + (sj[None, :] + dj)).ravel()
                P[c * Skp + prow, pcol] = 1.0

        # 3x3 conv taps (zero padding) composed with nearest upsample, hstacked.
        ih = (np.arange(R) * oh) // R          # nearest: floor(y * oh / R)
        iw = (np.arange(R) * ow) // R
        out_rows = np.arange(R)[:, None] * R + np.arange(R)[None, :]
        M = np.zeros((s0_pad, 9 * Skp), np.float32)
        t = 0
        for dy in range(3):
            for dx in range(3):
                a = ih + dy - 1
                b = iw + dx - 1
                valid = ((a[:, None] >= 0) & (a[:, None] < oh) &
                         (b[None, :] >= 0) & (b[None, :] < ow))
                cols = (np.clip(a, 0, oh - 1)[:, None] * ow +
                        np.clip(b, 0, ow - 1)[None, :])
                M[out_rows[valid], t * Skp + cols[valid]] = 1.0
                t += 1
        cards.append(dict(P=P, M=M, Sk=Sk, Skp=Skp, oh=oh, ow=ow))
    return cards


# ----------------------------------------------------------------------------
# Fused Pallas kernel: BN + ReLU + all pyramid levels, VMEM-resident
# ----------------------------------------------------------------------------
def _full_spec(shape):
    nd = len(shape)
    return pl.BlockSpec(shape, lambda i, nd=nd: (0,) * nd)


def _make_kernel(cardinality):
    def kernel(*refs):
        x_ref, s_ref, bnb_ref = refs[0], refs[1], refs[2]
        o_ref = refs[-1]

        # Fused BatchNorm (inference affine) + ReLU: f32 on the VPU.
        h = jnp.maximum(x_ref[...] * s_ref[...] + bnb_ref[...], 0.0)
        hb = h.astype(jnp.bfloat16)                     # MXU operand

        out = jnp.zeros(o_ref.shape, jnp.float32)
        for k in range(cardinality):
            p_ref, m_ref, w_ref, cb_ref = refs[3 + 4 * k: 7 + 4 * k]
            skp = p_ref.shape[0] // 4

            # Fractional 2x2 max pool: ONE stacked one-hot gather matmul,
            # then 3 VPU maxes over the four corner row-slices (f32).
            corners = jnp.dot(p_ref[...], hb,
                              preferred_element_type=jnp.float32)
            pooled = corners[:skp]
            for c in range(1, 4):
                pooled = jnp.maximum(pooled, corners[c * skp:(c + 1) * skp])
            pooled_b = pooled.astype(jnp.bfloat16)

            # 3x3 conv reassociated: 9 tap matmuls on the small pooled grid...
            q = jnp.concatenate(
                [jnp.dot(pooled_b, w_ref[t],
                         preferred_element_type=jnp.float32)
                 for t in range(9)], axis=0).astype(jnp.bfloat16)

            # ...then ONE deep-K (TM, 9*Skp) x (9*Skp, L) matmul applying the
            # zero-padded shifts fused with nearest upsample, plus conv bias.
            out = out + cb_ref[...] + jnp.dot(
                m_ref[...], q, preferred_element_type=jnp.float32)

        o_ref[...] = out
    return kernel


def _tensorcores_per_chip():
    # grid=(1,) is correct everywhere; only v7x (2 TensorCores / chip) benefits
    # from a 2-way "parallel" row grid, so detect it conservatively.
    try:
        kind = jax.devices()[0].device_kind.lower()
    except Exception:
        return 1
    return 2 if "v7" in kind else 1


def bn_relu_pyra(x_nhwc, bn_scale, bn_bias, conv_ws, conv_bs,
                 cardinality, input_res):
    """Forward pass of BnReluPyra.  x_nhwc: (N, R, R, D) float32."""
    N, H, W, D = x_nhwc.shape
    assert H == input_res and W == input_res, (H, W, input_res)
    R, ND, S0 = input_res, N * D, input_res * input_res
    L = _round_up(max(ND, LANE), LANE)      # lane-dense (n, d) axis (>= 128)

    n_steps = _tensorcores_per_chip()
    TM = _round_up(-(-S0 // n_steps), 8)    # guaranteed 8-aligned row tile
    S0_pad = TM * n_steps

    cards = _build_card_constants(R, cardinality, S0_pad)

    f32, bf16 = jnp.float32, jnp.bfloat16

    def lanes(a):       # (rows, ND) -> (rows, L) zero-padded lanes
        return jnp.pad(a.astype(f32), ((0, 0), (0, L - a.shape[1])))

    # Layout plumbing (wrapper side): spatial -> rows, (batch, channel) -> lanes.
    x2d = lanes(jnp.transpose(x_nhwc, (1, 2, 0, 3)).reshape(S0, ND))
    s2d = lanes(jnp.tile(bn_scale.astype(f32), (N,)).reshape(1, ND))
    b2d = lanes(jnp.tile(bn_bias.astype(f32), (N,)).reshape(1, ND))

    eye_n = np.eye(N, dtype=np.float32)
    inputs = [x2d, s2d, b2d]
    in_specs = [_full_spec((S0, L)), _full_spec((1, L)), _full_spec((1, L))]

    flops_per_step = 0
    for k in range(cardinality):
        Skp = cards[k]["Skp"]
        # Per-tap (D, D) weight, block-diagonal over the batch lanes, then
        # zero-padded to the dense 128-lane layout (bf16, exact enough).
        w9 = np.asarray(conv_ws[k], np.float32).reshape(9, D, D)
        wblk = np.zeros((9, L, L), np.float32)
        for t in range(9):
            wblk[t, :ND, :ND] = np.kron(eye_n, w9[t])
        cb = lanes(jnp.tile(conv_bs[k].astype(f32), (N,)).reshape(1, ND))

        inputs += [jnp.asarray(cards[k]["P"], bf16),
                   jnp.asarray(cards[k]["M"], bf16),
                   jnp.asarray(wblk, bf16),
                   cb]
        in_specs += [
            _full_spec((4 * Skp, S0)),                       # pool selectors
            pl.BlockSpec((TM, 9 * Skp), lambda i: (i, 0)),   # shift+upsample rows
            _full_spec((9, L, L)),                           # conv taps
            _full_spec((1, L)),                              # conv bias
        ]
        flops_per_step += (2 * 4 * Skp * S0 * L         # pool gather matmul
                           + 2 * 9 * Skp * L * L        # conv tap matmuls
                           + 2 * TM * 9 * Skp * L)      # shift+upsample matmul

    bytes_accessed = int(sum(int(np.prod(a.shape)) * a.dtype.itemsize
                             for a in inputs) + S0_pad * L * 4)
    cost = pl.CostEstimate(flops=int(n_steps * flops_per_step),
                           transcendentals=0, bytes_accessed=bytes_accessed)

    out2d = pl.pallas_call(
        _make_kernel(cardinality),
        out_shape=jax.ShapeDtypeStruct((S0_pad, L), f32),
        grid=(n_steps,),
        in_specs=in_specs,
        out_specs=pl.BlockSpec((TM, L), lambda i: (i, 0)),
        compiler_params=pltpu.CompilerParams(
            dimension_semantics=(("parallel",) if n_steps > 1
                                 else ("arbitrary",)),
            vmem_limit_bytes=32 * 1024 * 1024),
        cost_estimate=cost,
    )(*inputs)

    out2d = out2d[:S0, :ND]
    return jnp.transpose(out2d.reshape(R, R, N, D), (2, 0, 1, 3))


# ----------------------------------------------------------------------------
# Deterministic parameter init + independent numpy (float64) reference
# ----------------------------------------------------------------------------
def init_params(key, D, cardinality, eps=1e-5):
    keys = jax.random.split(key, 4 + 2 * cardinality)
    gamma = jax.random.uniform(keys[0], (D,), minval=0.5, maxval=1.5)
    beta = 0.1 * jax.random.normal(keys[1], (D,))
    mean = 0.1 * jax.random.normal(keys[2], (D,))
    var = jax.random.uniform(keys[3], (D,), minval=0.5, maxval=1.5)
    scale = (gamma / jnp.sqrt(var + eps)).astype(jnp.float32)
    bias = (beta - mean * scale).astype(jnp.float32)
    conv_w, conv_b = [], []
    for k in range(cardinality):
        kw, kb = keys[4 + 2 * k], keys[5 + 2 * k]
        fan_in = D * 9
        w = (jax.random.normal(kw, (3, 3, D, D)) / np.sqrt(fan_in)).astype(jnp.float32)
        b = (0.05 * jax.random.normal(kb, (D,))).astype(jnp.float32)
        conv_w.append(w)
        conv_b.append(b)
    return dict(bn_scale=scale, bn_bias=bias, conv_w=conv_w, conv_b=conv_b)


def reference_forward(x_nhwc, bn_scale, bn_bias, conv_ws, conv_bs,
                      cardinality, input_res):
    """Pure numpy/float64 reference of the same deterministic forward."""
    x = np.asarray(x_nhwc, np.float64)
    s = np.asarray(bn_scale, np.float64)
    b = np.asarray(bn_bias, np.float64)
    N, H, W, D = x.shape
    R = input_res
    h = np.maximum(x * s + b, 0.0)
    out = np.zeros_like(h)
    scale = 2.0 ** (-1.0 / cardinality)
    for card in range(cardinality):
        ratio = scale ** (card + 1)
        oh, ow = int(R * ratio), int(R * ratio)
        si = _frac_pool_starts(R, oh)
        sj = _frac_pool_starts(R, ow)
        pooled = np.full((N, oh, ow, D), -np.inf)
        for di in range(2):
            for dj in range(2):
                pooled = np.maximum(pooled, h[:, si + di][:, :, sj + dj])
        w = np.asarray(conv_ws[card], np.float64)
        cb = np.asarray(conv_bs[card], np.float64)
        pp = np.pad(pooled, ((0, 0), (1, 1), (1, 1), (0, 0)))
        conv = np.broadcast_to(cb, (N, oh, ow, D)).copy()
        for dy in range(3):
            for dx in range(3):
                conv += np.einsum('nijc,cd->nijd',
                                  pp[:, dy:dy + oh, dx:dx + ow], w[dy, dx])
        ih = (np.arange(R) * oh) // R
        iw = (np.arange(R) * ow) // R
        out += conv[:, ih][:, :, iw]
    return out


# ----------------------------------------------------------------------------
if __name__ == "__main__":
    N, D = 2, 4
    INPUT_RES, CARDINALITY = 16, 2

    key = jax.random.PRNGKey(0)
    kx, kp = jax.random.split(key)
    # Layout: NHWC.  PyTorch-equivalent input would be NCHW [2, 4, 16, 16].
    x = jax.random.normal(kx, (N, INPUT_RES, INPUT_RES, D), dtype=jnp.float32)
    params = init_params(kp, D, CARDINALITY)

    out = bn_relu_pyra(x, params["bn_scale"], params["bn_bias"],
                       params["conv_w"], params["conv_b"],
                       CARDINALITY, INPUT_RES)
    out = jax.block_until_ready(out)

    assert out.shape == (N, INPUT_RES, INPUT_RES, D), out.shape
    assert bool(jnp.all(jnp.isfinite(out)))

    ref = reference_forward(x, params["bn_scale"], params["bn_bias"],
                            params["conv_w"], params["conv_b"],
                            CARDINALITY, INPUT_RES)
    out64 = np.asarray(out, np.float64)
    absmax = float(np.max(np.abs(ref)))
    err = float(np.max(np.abs(out64 - ref)))
    rel = float(np.linalg.norm(out64 - ref) / max(np.linalg.norm(ref), 1e-12))
    # bf16 MXU operands with f32 accumulation: the loose max-abs bound guards
    # against O(1) structural errors, the Frobenius bound against drift.
    assert np.isfinite(err) and err < 1e-1 * max(1.0, absmax), (err, absmax)
    assert rel < 3e-2, rel

    print("KERNEL_OK")
</pallas_src>

<mosaic_0001>
module attributes {stable_mosaic.version = 11 : i64} {
  func.func @kernel(%arg0: i32, %arg1: memref<256x128xf32, #tpu.memory_space<vmem>>, %arg2: memref<1x128xf32, #tpu.memory_space<vmem>>, %arg3: memref<1x128xf32, #tpu.memory_space<vmem>>, %arg4: memref<512x256xbf16, #tpu.memory_space<vmem>>, %arg5: memref<256x1152xbf16, #tpu.memory_space<vmem>>, %arg6: memref<9x128x128xbf16, #tpu.memory_space<vmem>>, %arg7: memref<1x128xf32, #tpu.memory_space<vmem>>, %arg8: memref<256x256xbf16, #tpu.memory_space<vmem>>, %arg9: memref<256x576xbf16, #tpu.memory_space<vmem>>, %arg10: memref<9x128x128xbf16, #tpu.memory_space<vmem>>, %arg11: memref<1x128xf32, #tpu.memory_space<vmem>>, %arg12: memref<256x128xf32, #tpu.memory_space<vmem>>) attributes {dimension_semantics = [#tpu.dimension_semantics<arbitrary>], iteration_bounds = array<i64: 1>, scalar_prefetch = 0 : i64, scratch_operands = 0 : i64, tpu.core_type = #tpu.core_type<tc>, window_params = [{pipeline_mode = #tpu.pipeline_mode<synchronous>, transform_indices = @transform_0, window_bounds = array<i64: 256, 128>}, {pipeline_mode = #tpu.pipeline_mode<synchronous>, transform_indices = @transform_1, window_bounds = array<i64: 1, 128>}, {pipeline_mode = #tpu.pipeline_mode<synchronous>, transform_indices = @transform_2, window_bounds = array<i64: 1, 128>}, {pipeline_mode = #tpu.pipeline_mode<synchronous>, transform_indices = @transform_3, window_bounds = array<i64: 512, 256>}, {transform_indices = @transform_4, window_bounds = array<i64: 256, 1152>}, {pipeline_mode = #tpu.pipeline_mode<synchronous>, transform_indices = @transform_5, window_bounds = array<i64: 9, 128, 128>}, {pipeline_mode = #tpu.pipeline_mode<synchronous>, transform_indices = @transform_6, window_bounds = array<i64: 1, 128>}, {pipeline_mode = #tpu.pipeline_mode<synchronous>, transform_indices = @transform_7, window_bounds = array<i64: 256, 256>}, {transform_indices = @transform_8, window_bounds = array<i64: 256, 576>}, {pipeline_mode = #tpu.pipeline_mode<synchronous>, transform_indices = @transform_9, window_bounds = array<i64: 9, 128, 128>}, {pipeline_mode = #tpu.pipeline_mode<synchronous>, transform_indices = @transform_10, window_bounds = array<i64: 1, 128>}, {transform_indices = @transform_11, window_bounds = array<i64: 256, 128>}]} {
    %c0 = arith.constant 0 : index
    %c0_0 = arith.constant 0 : index
    %0 = vector.load %arg1[%c0, %c0_0] : memref<256x128xf32, #tpu.memory_space<vmem>>, vector<256x128xf32>
    %c0_1 = arith.constant 0 : index
    %c0_2 = arith.constant 0 : index
    %1 = vector.load %arg2[%c0_1, %c0_2] : memref<1x128xf32, #tpu.memory_space<vmem>>, vector<1x128xf32>
    %2 = vector.broadcast %1 : vector<1x128xf32> to vector<256x128xf32>
    %3 = arith.mulf %0, %2 : vector<256x128xf32>
    %c0_3 = arith.constant 0 : index
    %c0_4 = arith.constant 0 : index
    %4 = vector.load %arg3[%c0_3, %c0_4] : memref<1x128xf32, #tpu.memory_space<vmem>>, vector<1x128xf32>
    %5 = vector.broadcast %4 : vector<1x128xf32> to vector<256x128xf32>
    %6 = arith.addf %3, %5 : vector<256x128xf32>
    %cst = arith.constant 0.000000e+00 : f32
    %7 = vector.broadcast %cst : f32 to vector<256x128xf32>
    %8 = arith.maximumf %6, %7 : vector<256x128xf32>
    %9 = arith.truncf %8 : vector<256x128xf32> to vector<256x128xbf16>
    %cst_5 = arith.constant 0.000000e+00 : f32
    %10 = vector.broadcast %cst_5 : f32 to vector<256x128xf32>
    %c0_6 = arith.constant 0 : index
    %c0_7 = arith.constant 0 : index
    %11 = vector.load %arg4[%c0_6, %c0_7] : memref<512x256xbf16, #tpu.memory_space<vmem>>, vector<512x256xbf16>
    %cst_8 = arith.constant dense<0.000000e+00> : vector<512x128xf32>
    %12 = tpu.matmul %11, %9, %cst_8 {dimension_numbers = #tpu.dot_dimension_numbers<[1], [0], [0], [1], [0, 0, 1, 1], [], []>} : vector<512x256xbf16>, vector<256x128xbf16>, vector<512x128xf32> -> vector<512x128xf32>
    %13 = vector.extract_strided_slice %12 {offsets = [0, 0], sizes = [128, 128], strides = [1, 1]} : vector<512x128xf32> to vector<128x128xf32>
    %14 = vector.extract_strided_slice %12 {offsets = [128, 0], sizes = [128, 128], strides = [1, 1]} : vector<512x128xf32> to vector<128x128xf32>
    %15 = arith.maximumf %13, %14 : vector<128x128xf32>
    %16 = vector.extract_strided_slice %12 {offsets = [256, 0], sizes = [128, 128], strides = [1, 1]} : vector<512x128xf32> to vector<128x128xf32>
    %17 = arith.maximumf %15, %16 : vector<128x128xf32>
    %18 = vector.extract_strided_slice %12 {offsets = [384, 0], sizes = [128, 128], strides = [1, 1]} : vector<512x128xf32> to vector<128x128xf32>
    %19 = arith.maximumf %17, %18 : vector<128x128xf32>
    %20 = arith.truncf %19 : vector<128x128xf32> to vector<128x128xbf16>
    %c0_9 = arith.constant 0 : index
    %c0_10 = arith.constant 0 : index
    %c0_11 = arith.constant 0 : index
    %21 = vector.load %arg6[%c0_9, %c0_10, %c0_11] : memref<9x128x128xbf16, #tpu.memory_space<vmem>>, vector<1x128x128xbf16>
    %22 = vector.shape_cast %21 : vector<1x128x128xbf16> to vector<128x128xbf16>
    %cst_12 = arith.constant dense<0.000000e+00> : vector<128x128xf32>
    %23 = tpu.matmul %20, %22, %cst_12 {dimension_numbers = #tpu.dot_dimension_numbers<[1], [0], [0], [1], [0, 0, 1, 1], [], []>} : vector<128x128xbf16>, vector<128x128xbf16>, vector<128x128xf32> -> vector<128x128xf32>
    %c1 = arith.constant 1 : index
    %c0_13 = arith.constant 0 : index
    %c0_14 = arith.constant 0 : index
    %24 = vector.load %arg6[%c1, %c0_13, %c0_14] : memref<9x128x128xbf16, #tpu.memory_space<vmem>>, vector<1x128x128xbf16>
    %25 = vector.shape_cast %24 : vector<1x128x128xbf16> to vector<128x128xbf16>
    %cst_15 = arith.constant dense<0.000000e+00> : vector<128x128xf32>
    %26 = tpu.matmul %20, %25, %cst_15 {dimension_numbers = #tpu.dot_dimension_numbers<[1], [0], [0], [1], [0, 0, 1, 1], [], []>} : vector<128x128xbf16>, vector<128x128xbf16>, vector<128x128xf32> -> vector<128x128xf32>
    %c2 = arith.constant 2 : index
    %c0_16 = arith.constant 0 : index
    %c0_17 = arith.constant 0 : index
    %27 = vector.load %arg6[%c2, %c0_16, %c0_17] : memref<9x128x128xbf16, #tpu.memory_space<vmem>>, vector<1x128x128xbf16>
    %28 = vector.shape_cast %27 : vector<1x128x128xbf16> to vector<128x128xbf16>
    %cst_18 = arith.constant dense<0.000000e+00> : vector<128x128xf32>
    %29 = tpu.matmul %20, %28, %cst_18 {dimension_numbers = #tpu.dot_dimension_numbers<[1], [0], [0], [1], [0, 0, 1, 1], [], []>} : vector<128x128xbf16>, vector<128x128xbf16>, vector<128x128xf32> -> vector<128x128xf32>
    %c3 = arith.constant 3 : index
    %c0_19 = arith.constant 0 : index
    %c0_20 = arith.constant 0 : index
    %30 = vector.load %arg6[%c3, %c0_19, %c0_20] : memref<9x128x128xbf16, #tpu.memory_space<vmem>>, vector<1x128x128xbf16>
    %31 = vector.shape_cast %30 : vector<1x128x128xbf16> to vector<128x128xbf16>
    %cst_21 = arith.constant dense<0.000000e+00> : vector<128x128xf32>
    %32 = tpu.matmul %20, %31, %cst_21 {dimension_numbers = #tpu.dot_dimension_numbers<[1], [0], [0], [1], [0, 0, 1, 1], [], []>} : vector<128x128xbf16>, vector<128x128xbf16>, vector<128x128xf32> -> vector<128x128xf32>
    %c4 = arith.constant 4 : index
    %c0_22 = arith.constant 0 : index
    %c0_23 = arith.constant 0 : index
    %33 = vector.load %arg6[%c4, %c0_22, %c0_23] : memref<9x128x128xbf16, #tpu.memory_space<vmem>>, vector<1x128x128xbf16>
    %34 = vector.shape_cast %33 : vector<1x128x128xbf16> to vector<128x128xbf16>
    %cst_24 = arith.constant dense<0.000000e+00> : vector<128x128xf32>
    %35 = tpu.matmul %20, %34, %cst_24 {dimension_numbers = #tpu.dot_dimension_numbers<[1], [0], [0], [1], [0, 0, 1, 1], [], []>} : vector<128x128xbf16>, vector<128x128xbf16>, vector<128x128xf32> -> vector<128x128xf32>
    %c5 = arith.constant 5 : index
    %c0_25 = arith.constant 0 : index
    %c0_26 = arith.constant 0 : index
    %36 = vector.load %arg6[%c5, %c0_25, %c0_26] : memref<9x128x128xbf16, #tpu.memory_space<vmem>>, vector<1x128x128xbf16>
    %37 = vector.shape_cast %36 : vector<1x128x128xbf16> to vector<128x128xbf16>
    %cst_27 = arith.constant dense<0.000000e+00> : vector<128x128xf32>
    %38 = tpu.matmul %20, %37, %cst_27 {dimension_numbers = #tpu.dot_dimension_numbers<[1], [0], [0], [1], [0, 0, 1, 1], [], []>} : vector<128x128xbf16>, vector<128x128xbf16>, vector<128x128xf32> -> vector<128x128xf32>
    %c6 = arith.constant 6 : index
    %c0_28 = arith.constant 0 : index
    %c0_29 = arith.constant 0 : index
    %39 = vector.load %arg6[%c6, %c0_28, %c0_29] : memref<9x128x128xbf16, #tpu.memory_space<vmem>>, vector<1x128x128xbf16>
    %40 = vector.shape_cast %39 : vector<1x128x128xbf16> to vector<128x128xbf16>
    %cst_30 = arith.constant dense<0.000000e+00> : vector<128x128xf32>
    %41 = tpu.matmul %20, %40, %cst_30 {dimension_numbers = #tpu.dot_dimension_numbers<[1], [0], [0], [1], [0, 0, 1, 1], [], []>} : vector<128x128xbf16>, vector<128x128xbf16>, vector<128x128xf32> -> vector<128x128xf32>
    %c7 = arith.constant 7 : index
    %c0_31 = arith.constant 0 : index
    %c0_32 = arith.constant 0 : index
    %42 = vector.load %arg6[%c7, %c0_31, %c0_32] : memref<9x128x128xbf16, #tpu.memory_space<vmem>>, vector<1x128x128xbf16>
    %43 = vector.shape_cast %42 : vector<1x128x128xbf16> to vector<128x128xbf16>
    %cst_33 = arith.constant dense<0.000000e+00> : vector<128x128xf32>
    %44 = tpu.matmul %20, %43, %cst_33 {dimension_numbers = #tpu.dot_dimension_numbers<[1], [0], [0], [1], [0, 0, 1, 1], [], []>} : vector<128x128xbf16>, vector<128x128xbf16>, vector<128x128xf32> -> vector<128x128xf32>
    %c8 = arith.constant 8 : index
    %c0_34 = arith.constant 0 : index
    %c0_35 = arith.constant 0 : index
    %45 = vector.load %arg6[%c8, %c0_34, %c0_35] : memref<9x128x128xbf16, #tpu.memory_space<vmem>>, vector<1x128x128xbf16>
    %46 = vector.shape_cast %45 : vector<1x128x128xbf16> to vector<128x128xbf16>
    %cst_36 = arith.constant dense<0.000000e+00> : vector<128x128xf32>
    %47 = tpu.matmul %20, %46, %cst_36 {dimension_numbers = #tpu.dot_dimension_numbers<[1], [0], [0], [1], [0, 0, 1, 1], [], []>} : vector<128x128xbf16>, vector<128x128xbf16>, vector<128x128xf32> -> vector<128x128xf32>
    %48 = tpu.concatenate %23, %26, %29, %32, %35, %38, %41, %44, %47 in 0 : vector<128x128xf32>, vector<128x128xf32>, vector<128x128xf32>, vector<128x128xf32>, vector<128x128xf32>, vector<128x128xf32>, vector<128x128xf32>, vector<128x128xf32>, vector<128x128xf32> -> vector<1152x128xf32>
    %49 = arith.truncf %48 : vector<1152x128xf32> to vector<1152x128xbf16>
    %c0_37 = arith.constant 0 : index
    %c0_38 = arith.constant 0 : index
    %50 = vector.load %arg7[%c0_37, %c0_38] : memref<1x128xf32, #tpu.memory_space<vmem>>, vector<1x128xf32>
    %51 = vector.broadcast %50 : vector<1x128xf32> to vector<256x128xf32>
    %52 = arith.addf %10, %51 : vector<256x128xf32>
    %c0_39 = arith.constant 0 : index
    %c0_40 = arith.constant 0 : index
    %53 = vector.load %arg5[%c0_39, %c0_40] : memref<256x1152xbf16, #tpu.memory_space<vmem>>, vector<256x1152xbf16>
    %cst_41 = arith.constant dense<0.000000e+00> : vector<256x128xf32>
    %54 = tpu.matmul %53, %49, %cst_41 {dimension_numbers = #tpu.dot_dimension_numbers<[1], [0], [0], [1], [0, 0, 1, 1], [], []>} : vector<256x1152xbf16>, vector<1152x128xbf16>, vector<256x128xf32> -> vector<256x128xf32>
    %55 = arith.addf %52, %54 : vector<256x128xf32>
    %c0_42 = arith.constant 0 : index
    %c0_43 = arith.constant 0 : index
    %56 = vector.load %arg8[%c0_42, %c0_43] : memref<256x256xbf16, #tpu.memory_space<vmem>>, vector<256x256xbf16>
    %cst_44 = arith.constant dense<0.000000e+00> : vector<256x128xf32>
    %57 = tpu.matmul %56, %9, %cst_44 {dimension_numbers = #tpu.dot_dimension_numbers<[1], [0], [0], [1], [0, 0, 1, 1], [], []>} : vector<256x256xbf16>, vector<256x128xbf16>, vector<256x128xf32> -> vector<256x128xf32>
    %58 = vector.extract_strided_slice %57 {offsets = [0, 0], sizes = [64, 128], strides = [1, 1]} : vector<256x128xf32> to vector<64x128xf32>
    %59 = vector.extract_strided_slice %57 {offsets = [64, 0], sizes = [64, 128], strides = [1, 1]} : vector<256x128xf32> to vector<64x128xf32>
    %60 = arith.maximumf %58, %59 : vector<64x128xf32>
    %61 = vector.extract_strided_slice %57 {offsets = [128, 0], sizes = [64, 128], strides = [1, 1]} : vector<256x128xf32> to vector<64x128xf32>
    %62 = arith.maximumf %60, %61 : vector<64x128xf32>
    %63 = vector.extract_strided_slice %57 {offsets = [192, 0], sizes = [64, 128], strides = [1, 1]} : vector<256x128xf32> to vector<64x128xf32>
    %64 = arith.maximumf %62, %63 : vector<64x128xf32>
    %65 = arith.truncf %64 : vector<64x128xf32> to vector<64x128xbf16>
    %c0_45 = arith.constant 0 : index
    %c0_46 = arith.constant 0 : index
    %c0_47 = arith.constant 0 : index
    %66 = vector.load %arg10[%c0_45, %c0_46, %c0_47] : memref<9x128x128xbf16, #tpu.memory_space<vmem>>, vector<1x128x128xbf16>
    %67 = vector.shape_cast %66 : vector<1x128x128xbf16> to vector<128x128xbf16>
    %cst_48 = arith.constant dense<0.000000e+00> : vector<64x128xf32>
    %68 = tpu.matmul %65, %67, %cst_48 {dimension_numbers = #tpu.dot_dimension_numbers<[1], [0], [0], [1], [0, 0, 1, 1], [], []>} : vector<64x128xbf16>, vector<128x128xbf16>, vector<64x128xf32> -> vector<64x128xf32>
    %c1_49 = arith.constant 1 : index
    %c0_50 = arith.constant 0 : index
    %c0_51 = arith.constant 0 : index
    %69 = vector.load %arg10[%c1_49, %c0_50, %c0_51] : memref<9x128x128xbf16, #tpu.memory_space<vmem>>, vector<1x128x128xbf16>
    %70 = vector.shape_cast %69 : vector<1x128x128xbf16> to vector<128x128xbf16>
    %cst_52 = arith.constant dense<0.000000e+00> : vector<64x128xf32>
    %71 = tpu.matmul %65, %70, %cst_52 {dimension_numbers = #tpu.dot_dimension_numbers<[1], [0], [0], [1], [0, 0, 1, 1], [], []>} : vector<64x128xbf16>, vector<128x128xbf16>, vector<64x128xf32> -> vector<64x128xf32>
    %c2_53 = arith.constant 2 : index
    %c0_54 = arith.constant 0 : index
    %c0_55 = arith.constant 0 : index
    %72 = vector.load %arg10[%c2_53, %c0_54, %c0_55] : memref<9x128x128xbf16, #tpu.memory_space<vmem>>, vector<1x128x128xbf16>
    %73 = vector.shape_cast %72 : vector<1x128x128xbf16> to vector<128x128xbf16>
    %cst_56 = arith.constant dense<0.000000e+00> : vector<64x128xf32>
    %74 = tpu.matmul %65, %73, %cst_56 {dimension_numbers = #tpu.dot_dimension_numbers<[1], [0], [0], [1], [0, 0, 1, 1], [], []>} : vector<64x128xbf16>, vector<128x128xbf16>, vector<64x128xf32> -> vector<64x128xf32>
    %c3_57 = arith.constant 3 : index
    %c0_58 = arith.constant 0 : index
    %c0_59 = arith.constant 0 : index
    %75 = vector.load %arg10[%c3_57, %c0_58, %c0_59] : memref<9x128x128xbf16, #tpu.memory_space<vmem>>, vector<1x128x128xbf16>
    %76 = vector.shape_cast %75 : vector<1x128x128xbf16> to vector<128x128xbf16>
    %cst_60 = arith.constant dense<0.000000e+00> : vector<64x128xf32>
    %77 = tpu.matmul %65, %76, %cst_60 {dimension_numbers = #tpu.dot_dimension_numbers<[1], [0], [0], [1], [0, 0, 1, 1], [], []>} : vector<64x128xbf16>, vector<128x128xbf16>, vector<64x128xf32> -> vector<64x128xf32>
    %c4_61 = arith.constant 4 : index
    %c0_62 = arith.constant 0 : index
    %c0_63 = arith.constant 0 : index
    %78 = vector.load %arg10[%c4_61, %c0_62, %c0_63] : memref<9x128x128xbf16, #tpu.memory_space<vmem>>, vector<1x128x128xbf16>
    %79 = vector.shape_cast %78 : vector<1x128x128xbf16> to vector<128x128xbf16>
    %cst_64 = arith.constant dense<0.000000e+00> : vector<64x128xf32>
    %80 = tpu.matmul %65, %79, %cst_64 {dimension_numbers = #tpu.dot_dimension_numbers<[1], [0], [0], [1], [0, 0, 1, 1], [], []>} : vector<64x128xbf16>, vector<128x128xbf16>, vector<64x128xf32> -> vector<64x128xf32>
    %c5_65 = arith.constant 5 : index
    %c0_66 = arith.constant 0 : index
    %c0_67 = arith.constant 0 : index
    %81 = vector.load %arg10[%c5_65, %c0_66, %c0_67] : memref<9x128x128xbf16, #tpu.memory_space<vmem>>, vector<1x128x128xbf16>
    %82 = vector.shape_cast %81 : vector<1x128x128xbf16> to vector<128x128xbf16>
    %cst_68 = arith.constant dense<0.000000e+00> : vector<64x128xf32>
    %83 = tpu.matmul %65, %82, %cst_68 {dimension_numbers = #tpu.dot_dimension_numbers<[1], [0], [0], [1], [0, 0, 1, 1], [], []>} : vector<64x128xbf16>, vector<128x128xbf16>, vector<64x128xf32> -> vector<64x128xf32>
    %c6_69 = arith.constant 6 : index
    %c0_70 = arith.constant 0 : index
    %c0_71 = arith.constant 0 : index
    %84 = vector.load %arg10[%c6_69, %c0_70, %c0_71] : memref<9x128x128xbf16, #tpu.memory_space<vmem>>, vector<1x128x128xbf16>
    %85 = vector.shape_cast %84 : vector<1x128x128xbf16> to vector<128x128xbf16>
    %cst_72 = arith.constant dense<0.000000e+00> : vector<64x128xf32>
    %86 = tpu.matmul %65, %85, %cst_72 {dimension_numbers = #tpu.dot_dimension_numbers<[1], [0], [0], [1], [0, 0, 1, 1], [], []>} : vector<64x128xbf16>, vector<128x128xbf16>, vector<64x128xf32> -> vector<64x128xf32>
    %c7_73 = arith.constant 7 : index
    %c0_74 = arith.constant 0 : index
    %c0_75 = arith.constant 0 : index
    %87 = vector.load %arg10[%c7_73, %c0_74, %c0_75] : memref<9x128x128xbf16, #tpu.memory_space<vmem>>, vector<1x128x128xbf16>
    %88 = vector.shape_cast %87 : vector<1x128x128xbf16> to vector<128x128xbf16>
    %cst_76 = arith.constant dense<0.000000e+00> : vector<64x128xf32>
    %89 = tpu.matmul %65, %88, %cst_76 {dimension_numbers = #tpu.dot_dimension_numbers<[1], [0], [0], [1], [0, 0, 1, 1], [], []>} : vector<64x128xbf16>, vector<128x128xbf16>, vector<64x128xf32> -> vector<64x128xf32>
    %c8_77 = arith.constant 8 : index
    %c0_78 = arith.constant 0 : index
    %c0_79 = arith.constant 0 : index
    %90 = vector.load %arg10[%c8_77, %c0_78, %c0_79] : memref<9x128x128xbf16, #tpu.memory_space<vmem>>, vector<1x128x128xbf16>
    %91 = vector.shape_cast %90 : vector<1x128x128xbf16> to vector<128x128xbf16>
    %cst_80 = arith.constant dense<0.000000e+00> : vector<64x128xf32>
    %92 = tpu.matmul %65, %91, %cst_80 {dimension_numbers = #tpu.dot_dimension_numbers<[1], [0], [0], [1], [0, 0, 1, 1], [], []>} : vector<64x128xbf16>, vector<128x128xbf16>, vector<64x128xf32> -> vector<64x128xf32>
    %93 = tpu.concatenate %68, %71, %74, %77, %80, %83, %86, %89, %92 in 0 : vector<64x128xf32>, vector<64x128xf32>, vector<64x128xf32>, vector<64x128xf32>, vector<64x128xf32>, vector<64x128xf32>, vector<64x128xf32>, vector<64x128xf32>, vector<64x128xf32> -> vector<576x128xf32>
    %94 = arith.truncf %93 : vector<576x128xf32> to vector<576x128xbf16>
    %c0_81 = arith.constant 0 : index
    %c0_82 = arith.constant 0 : index
    %95 = vector.load %arg11[%c0_81, %c0_82] : memref<1x128xf32, #tpu.memory_space<vmem>>, vector<1x128xf32>
    %96 = vector.broadcast %95 : vector<1x128xf32> to vector<256x128xf32>
    %97 = arith.addf %55, %96 : vector<256x128xf32>
    %c0_83 = arith.constant 0 : index
    %c0_84 = arith.constant 0 : index
    %98 = vector.load %arg9[%c0_83, %c0_84] : memref<256x576xbf16, #tpu.memory_space<vmem>>, vector<256x576xbf16>
    %cst_85 = arith.constant dense<0.000000e+00> : vector<256x128xf32>
    %99 = tpu.matmul %98, %94, %cst_85 {dimension_numbers = #tpu.dot_dimension_numbers<[1], [0], [0], [1], [0, 0, 1, 1], [], []>} : vector<256x576xbf16>, vector<576x128xbf16>, vector<256x128xf32> -> vector<256x128xf32>
    %100 = arith.addf %97, %99 : vector<256x128xf32>
    %c0_86 = arith.constant 0 : index
    %c0_87 = arith.constant 0 : index
    %101 = vector.load %arg12[%c0_86, %c0_87] : memref<256x128xf32, #tpu.memory_space<vmem>>, vector<256x128xf32>
    tpu.vector_store %arg12[%c0_86, %c0_87], %100 {strides = array<i32>} : memref<256x128xf32, #tpu.memory_space<vmem>>, vector<256x128xf32>,
    return
  }
  func.func @transform_0(%arg0: i32) -> (i32, i32) {
    %c0_i32 = arith.constant 0 : i32
    %c0_i32_0 = arith.constant 0 : i32
    %c0_i32_1 = arith.constant 0 : i32
    return %c0_i32, %c0_i32_0 : i32, i32
  }
  func.func @transform_1(%arg0: i32) -> (i32, i32) {
    %c0_i32 = arith.constant 0 : i32
    %c0_i32_0 = arith.constant 0 : i32
    %c0_i32_1 = arith.constant 0 : i32
    return %c0_i32, %c0_i32_0 : i32, i32
  }
  func.func @transform_2(%arg0: i32) -> (i32, i32) {
    %c0_i32 = arith.constant 0 : i32
    %c0_i32_0 = arith.constant 0 : i32
    %c0_i32_1 = arith.constant 0 : i32
    return %c0_i32, %c0_i32_0 : i32, i32
  }
  func.func @transform_3(%arg0: i32) -> (i32, i32) {
    %c0_i32 = arith.constant 0 : i32
    %c0_i32_0 = arith.constant 0 : i32
    %c0_i32_1 = arith.constant 0 : i32
    return %c0_i32, %c0_i32_0 : i32, i32
  }
  func.func @transform_4(%arg0: i32) -> (i32, i32) {
    %c0_i32 = arith.constant 0 : i32
    %c0_i32_0 = arith.constant 0 : i32
    return %arg0, %c0_i32 : i32, i32
  }
  func.func @transform_5(%arg0: i32) -> (i32, i32, i32) {
    %c0_i32 = arith.constant 0 : i32
    %c0_i32_0 = arith.constant 0 : i32
    %c0_i32_1 = arith.constant 0 : i32
    %c0_i32_2 = arith.constant 0 : i32
    return %c0_i32, %c0_i32_0, %c0_i32_1 : i32, i32, i32
  }
  func.func @transform_6(%arg0: i32) -> (i32, i32) {
    %c0_i32 = arith.constant 0 : i32
    %c0_i32_0 = arith.constant 0 : i32
    %c0_i32_1 = arith.constant 0 : i32
    return %c0_i32, %c0_i32_0 : i32, i32
  }
  func.func @transform_7(%arg0: i32) -> (i32, i32) {
    %c0_i32 = arith.constant 0 : i32
    %c0_i32_0 = arith.constant 0 : i32
    %c0_i32_1 = arith.constant 0 : i32
    return %c0_i32, %c0_i32_0 : i32, i32
  }
  func.func @transform_8(%arg0: i32) -> (i32, i32) {
    %c0_i32 = arith.constant 0 : i32
    %c0_i32_0 = arith.constant 0 : i32
    return %arg0, %c0_i32 : i32, i32
  }
  func.func @transform_9(%arg0: i32) -> (i32, i32, i32) {
    %c0_i32 = arith.constant 0 : i32
    %c0_i32_0 = arith.constant 0 : i32
    %c0_i32_1 = arith.constant 0 : i32
    %c0_i32_2 = arith.constant 0 : i32
    return %c0_i32, %c0_i32_0, %c0_i32_1 : i32, i32, i32
  }
  func.func @transform_10(%arg0: i32) -> (i32, i32) {
    %c0_i32 = arith.constant 0 : i32
    %c0_i32_0 = arith.constant 0 : i32
    %c0_i32_1 = arith.constant 0 : i32
    return %c0_i32, %c0_i32_0 : i32, i32
  }
  func.func @transform_11(%arg0: i32) -> (i32, i32) {
    %c0_i32 = arith.constant 0 : i32
    %c0_i32_0 = arith.constant 0 : i32
    return %arg0, %c0_i32 : i32, i32
  }
}

</mosaic_0001>

<bundles_post_ra>
// kernel: tpu_custom_call.1
= control target key start
LH: loop header
LB: loop body
LE: loop exit
PB: predicated region body
PF: predicated region fallthrough
CT: control target
= control target key end

     0   :  { %16 = vsyncpa [#allocation3], 0  ;;  %s12110_s0 = inlined_call_operand.hbm [shape: f32[256,128], index: 0, kind: input, shape index: {}]   ;;  %s12111_s1 = inlined_call_operand.vmem [shape: f32[1,128], index: 1, kind: input, shape index: {}]   ;;  %s12112_s2 = inlined_call_operand.vmem [shape: f32[1,128], index: 2, kind: input, shape index: {}]   ;;  %s12113_s3 = inlined_call_operand.hbm [shape: bf16[512,256], index: 3, kind: input, shape index: {}]   ;;  %s12114_s4 = inlined_call_operand.vmem [shape: bf16[256,1152], index: 4, kind: input, shape index: {}]   ;;  %s12115_s5 = inlined_call_operand.hbm [shape: bf16[9,128,128], index: 5, kind: input, shape index: {}]   ;;  %s12116_s6 = inlined_call_operand.vmem [shape: f32[1,128], index: 6, kind: input, shape index: {}]   ;;  %s12117_s7 = inlined_call_operand.hbm [shape: bf16[256,256], index: 7, kind: input, shape index: {}]   ;;  %s12118_s8 = inlined_call_operand.vmem [shape: bf16[256,576], index: 8, kind: input, shape index: {}]   ;;  %s12119_s9 = inlined_call_operand.hbm [shape: bf16[9,128,128], index: 9, kind: input, shape index: {}]   ;;  %s12120_s10 = inlined_call_operand.vmem [shape: f32[1,128], index: 10, kind: input, shape index: {}]   ;;  %s12121_s11 = inlined_call_operand.hbm [shape: f32[256,128], index: 11, kind: output, shape index: {}]  }
   0x1   :  { %17 = vsyncpa [#allocation6], 0 }
   0x2   :  { %18 = vsyncpa [#allocation9], 0 }
   0x3   :  { %19 = vsyncpa [#allocation4], 0  ;;  %s41_s19 = sshll.u32 %s12113_s3, 4  ;;  %s8795_s20 = smov [#allocation5]   ;;  %s42_s19 = int_to_ptr.hbm [resolvable:$true] %s41_s19 }
   0x4   :  { %s43_s21 = sshll.u32 %s8795_s20, 4  ;;  %s71_s24 = sshll.u32 %s12117_s7, 4  ;;  %s44_s21 = int_to_ptr.vmem [resolvable:$true] %s43_s21  ;;  %s72_s24 = int_to_ptr.hbm [resolvable:$true] %s71_s24 }
   0x5   :  { %s8796_s25 = smov 128   ;;  %s8797_s26 = smov 8  }
   0x6   :  { %49 = dma.hbm_to_vmem [thread:$0]  %s42_s19, 8192, %s44_s21, [#allocation6], %s8796_s25, %s8796_s25, %s8797_s26  }
   0x7   :  { %s8798_s27 = smov [#allocation8]   ;;  %s24_s3 = sshll.u32 %s12110_s0, 4  ;;  %s25_s3 = int_to_ptr.hbm [resolvable:$true] %s24_s3 }
   0x8   :  { %s73_s28 = sshll.u32 %s8798_s27, 4  ;;  %s56_s13 = sshll.u32 %s12115_s5, 4  ;;  %s74_s28 = int_to_ptr.vmem [resolvable:$true] %s73_s28  ;;  %s57_s13 = int_to_ptr.hbm [resolvable:$true] %s56_s13 }
   0x9   :  { %79 = dma.hbm_to_vmem [thread:$0]  %s72_s24, 4096, %s74_s28, [#allocation9], %s8796_s25, %s8796_s25, %s8797_s26  }
   0xa   :  { %s8799_s14 = smov [#allocation2]   ;;  %s8800_s16 = smov [#allocation7]  }
   0xb   :  { %s26_s15 = sshll.u32 %s8799_s14, 4  ;;  %s58_s0 = sshll.u32 %s8800_s16, 4  ;;  %s27_s15 = int_to_ptr.vmem [resolvable:$true] %s26_s15  ;;  %s59_s0 = int_to_ptr.vmem [resolvable:$true] %s58_s0 }
   0xc   :  { %32 = dma.hbm_to_vmem [thread:$0]  %s25_s3, 4096, %s27_s15, [#allocation3], %s8796_s25, %s8796_s25, %s8797_s26  }
   0xd   :  { %s8801_s17 = smov 64   ;;  %s8802_s18 = smov 4  }
   0xe   :  { %64 = dma.hbm_to_vmem [thread:$0]  %s57_s13, 9216, %s59_s0, [#allocation6], %s8801_s17, %s8801_s17, %s8802_s18  }
   0xf   :  { %s86_s21 = sshll.u32 %s12119_s9, 4  ;;  %s8803_s5 = smov [#allocation10]   ;;  %s87_s21 = int_to_ptr.hbm [resolvable:$true] %s86_s21 }
  0x10   :  { %s88_s22 = sshll.u32 %s8803_s5, 4  ;;  %s89_s22 = int_to_ptr.vmem [resolvable:$true] %s88_s22 }
  0x11   :  { %94 = dma.hbm_to_vmem [thread:$0]  %s87_s21, 9216, %s89_s22, [#allocation9], %s8801_s17, %s8801_s17, %s8802_s18  }
  0x12   :  { %8787 = dma.done.wait [#allocation3], 4096  }
  0x13   :  { %8788 = vsyncadd [#allocation3], 4294963200 }
  0x14   :  { %8789 = dma.done.wait [#allocation6], 17408  }
  0x15   :  { %8790 = vsyncadd [#allocation6], 4294949888 }
  0x16   :  { %8791 = dma.done.wait [#allocation9], 13312  }
  0x17   :  { %8792 = vsyncadd [#allocation9], 4294953984  ;;  %v132_v0 = vld [vmem:[#allocation2 + $0x70] sm:$0xff]  ;;  %v133_v1 = vld [vmem:[#allocation2 + $0x78] sm:$0xff]  ;;  %vm5690_vm0 = vcmask 523264  }
  0x18   :  { %v8892_v2 = vld [vmem:[%s12111_s1] ss:$0 sm:$0xff]  ;;  %v131_v5 = vld [vmem:[#allocation2 + $0x68] sm:$0xff]  ;;  %v128_v6 = vld [vmem:[#allocation2 + $0x50] sm:$0xff] }
  0x19   :  { %v8897_v3 = vld [vmem:[%s12112_s2] ss:$0 sm:$0xff]  ;;  %v168_v7 = vmul.f32 %v8892_v2, %v132_v0  ;;  %v169_v8 = vmul.f32 %v8892_v2, %v133_v1  ;;  %v167_v10 = vmul.f32 %v8892_v2, %v131_v5  ;;  %v129_v11 = vld [vmem:[#allocation2 + $0x58] sm:$0xff]  ;;  %v127_v13 = vld [vmem:[#allocation2 + $0x48] sm:$0xff]  ;;  %v164_v14 = vmul.f32 %v8892_v2, %v128_v6 }
  0x1a   :  { %v130_v4 = vld [vmem:[#allocation2 + $0x60] sm:$0xff]  ;;  %v165_v15 = vmul.f32 %v8892_v2, %v129_v11  ;;  %v163_v23 = vmul.f32 %v8892_v2, %v127_v13  ;;  %v124_v28 = vld [vmem:[#allocation2 + $0x30] sm:$0xff]  ;;  %v125_v29 = vld [vmem:[#allocation2 + $0x38] sm:$0xff] }
  0x1b   :  { %v166_v9 = vmul.f32 %v8892_v2, %v130_v4  ;;  %v126_v12 = vld [vmem:[#allocation2 + $0x40] sm:$0xff]  ;;  %v204_v16 = vadd.f32 %v8897_v3, %v168_v7  ;;  %v205_v17 = vadd.f32 %v8897_v3, %v169_v8  ;;  %v203_v19 = vadd.f32 %v8897_v3, %v167_v10  ;;  %v123_v39 = vld [vmem:[#allocation2 + $0x28] sm:$0xff]  ;;  %v120_v47 = vld [vmem:[#allocation2 + $0x10] sm:$0xff] }
  0x1c   :  { %v200_v20 = vadd.f32 %v8897_v3, %v164_v14  ;;  %v201_v21 = vadd.f32 %v8897_v3, %v165_v15  ;;  %v162_v22 = vmul.f32 %v8892_v2, %v126_v12  ;;  %v199_v33 = vadd.f32 %v8897_v3, %v163_v23  ;;  %v122_v38 = vld [vmem:[#allocation2 + $0x20] sm:$0xff]  ;;  %v121_v48 = vld [vmem:[#allocation2 + $0x18] sm:$0xff]  ;;  %v119_v54 = vld [vmem:[#allocation2 + $0x8] sm:$0xff] }
  0x1d   :  { %v202_v18 = vadd.f32 %v8897_v3, %v166_v9  ;;  %v236_v24 = vmax.f32 %v204_v16, 0.0  ;;  %v237_v25 = vmax.f32 %v205_v17, 0.0  ;;  %v235_v27 = vmax.f32 %v203_v19, 0.0  ;;  %v118_v53 = vld [vmem:[#allocation2] sm:$0xff]  ;;  %v148_v58 = vld [vmem:[#allocation2 + $0xf0] sm:$0xff]  ;;  %v149_v59 = vld [vmem:[#allocation2 + $0xf8] sm:$0xff] }
  0x1e   :  { %v232_v31 = vmax.f32 %v200_v20, 0.0  ;;  %v198_v32 = vadd.f32 %v8897_v3, %v162_v22  ;;  %v233_v35 = vmax.f32 %v201_v21, 0.0  ;;  %v160_v36 = vmul.f32 %v8892_v2, %v124_v28  ;;  %v146_v7 = vld [vmem:[#allocation2 + $0xe0] sm:$0xff]  ;;  %v147_v8 = vld [vmem:[#allocation2 + $0xe8] sm:$0xff]  ;;  %v145_v19 = vld [vmem:[#allocation2 + $0xd8] sm:$0xff] }
  0x1f   :  { %v234_v26 = vmax.f32 %v202_v18, 0.0  ;;  %v8913_v30 = vpack.c.bf16 %v237_v25, %v236_v24  ;;  %v161_v37 = vmul.f32 %v8892_v2, %v125_v29  ;;  %v158_v41 = vmul.f32 %v8892_v2, %v122_v38  ;;  %v144_v18 = vld [vmem:[#allocation2 + $0xd0] sm:$0xff]  ;;  %v142_v29 = vld [vmem:[#allocation2 + $0xc0] sm:$0xff] }
  0x20   :  { %v230_v40 = vmax.f32 %v198_v32, 0.0  ;;  %v159_v42 = vmul.f32 %v8892_v2, %v123_v39  ;;  %v8926_v43 = vpack.c.bf16 %v233_v35, %v232_v31  ;;  %v231_v44 = vmax.f32 %v199_v33, 0.0  ;;  %v143_v31 = vld [vmem:[#allocation2 + $0xc8] sm:$0xff]  ;;  %v6503_v32 = vld [vmem:[#allocation5 + $0x1d0] sm:$0xf] }
  0x21   :  { %8605 = vmatpush.bf16.msra.mxu1 %v8913_v30  ;;  %v8918_v34 = vpack.c.bf16 %v235_v27, %v234_v26  ;;  %654 = vmatpush.bf16.msra.mxu0 %v8913_v30  ;;  %v196_v45 = vadd.f32 %v8897_v3, %v160_v36  ;;  %v197_v46 = vadd.f32 %v8897_v3, %v161_v37  ;;  %v8200_v35 = vld [vmem:[#allocation5 + $0x1d4] sm:$0xf0]  ;;  %v140_v39 = vld [vmem:[#allocation2 + $0xb0] sm:$0xff] }
  0x22   :  { %v194_v49 = vadd.f32 %v8897_v3, %v158_v41  ;;  %v195_v50 = vadd.f32 %v8897_v3, %v159_v42  ;;  %v156_v51 = vmul.f32 %v8892_v2, %v120_v47  ;;  %v157_v52 = vmul.f32 %v8892_v2, %v121_v48 }
  0x23   :  { %v8936_v55 = vpack.c.bf16 %v231_v44, %v230_v40  ;;  %v228_v56 = vmax.f32 %v196_v45, 0.0  ;;  %v229_v57 = vmax.f32 %v197_v46, 0.0  ;;  %v154_v60 = vmul.f32 %v8892_v2, %v118_v53  ;;  %v141_v45 = vld [vmem:[#allocation2 + $0xb8] sm:$0xff] }
  0x24   :  { %v155_v61 = vmul.f32 %v8892_v2, %v119_v54  ;;  %v226_v62 = vmax.f32 %v194_v49, 0.0  ;;  %v227_v63 = vmax.f32 %v195_v50, 0.0  ;;  %v192_v0 = vadd.f32 %v8897_v3, %v156_v51  ;;  %v138_v54 = vld [vmem:[#allocation2 + $0xa0] sm:$0xff] }
  0x25   :  { %8606 = vmatpush.bf16.msra.mxu1 %v8918_v34  ;;  %655 = vmatpush.bf16.msra.mxu0 %v8918_v34  ;;  %v193_v1 = vadd.f32 %v8897_v3, %v157_v52  ;;  %v8944_v4 = vpack.c.bf16 %v229_v57, %v228_v56  ;;  %v184_v5 = vmul.f32 %v8892_v2, %v148_v58  ;;  %v139_v56 = vld [vmem:[#allocation2 + $0xa8] sm:$0xff]  ;;  %v6271_v58 = vld [vmem:[#allocation5] sm:$0xf] }
  0x26   :  { %v185_v6 = vmul.f32 %v8892_v2, %v149_v59  ;;  %v190_v9 = vadd.f32 %v8897_v3, %v154_v60  ;;  %v8950_v10 = vpack.c.bf16 %v227_v63, %v226_v62  ;;  %v224_v11 = vmax.f32 %v192_v0, 0.0  ;;  %v8142_v59 = vld [vmem:[#allocation5 + $0x4] sm:$0xf0] }
  0x27   :  { %v225_v12 = vmax.f32 %v193_v1, 0.0  ;;  %v191_v13 = vadd.f32 %v8897_v3, %v155_v61  ;;  %v220_v14 = vadd.f32 %v8897_v3, %v184_v5  ;;  %v182_v16 = vmul.f32 %v8892_v2, %v146_v7  ;;  %v137_v7 = vld [vmem:[#allocation2 + $0x98] sm:$0xff] }
  0x28   :  { %12133 = vst [vmem:[#allocation16_spill] sm:$0xff] %v8950_v10  ;;  %v221_v15 = vadd.f32 %v8897_v3, %v185_v6  ;;  %v183_v17 = vmul.f32 %v8892_v2, %v147_v8  ;;  %v222_v21 = vmax.f32 %v190_v9, 0.0  ;;  %v180_v27 = vmul.f32 %v8892_v2, %v144_v18  ;;  %v136_v6 = vld [vmem:[#allocation2 + $0x90] sm:$0xff]  ;;  %v6511_v18 = vld [vmem:[#allocation5 + $0x1e0] sm:$0xf] }
  0x29   :  { %8607 = vmatpush.bf16.msra.mxu1 %v8926_v43  ;;  %656 = vmatpush.bf16.msra.mxu0 %v8926_v43  ;;  %v8959_v20 = vpack.c.bf16 %v225_v12, %v224_v11  ;;  %v223_v22 = vmax.f32 %v191_v13, 0.0  ;;  %v252_v23 = vmax.f32 %v220_v14, 0.0  ;;  %v218_v25 = vadd.f32 %v8897_v3, %v182_v16  ;;  %v134_v16 = vld [vmem:[#allocation2 + $0x80] sm:$0xff] }
  0x2a   :  { %v253_v24 = vmax.f32 %v221_v15, 0.0  ;;  %v219_v26 = vadd.f32 %v8897_v3, %v183_v17  ;;  %v181_v28 = vmul.f32 %v8892_v2, %v145_v19  ;;  %v216_v40 = vadd.f32 %v8897_v3, %v180_v27  ;;  %v135_v17 = vld [vmem:[#allocation2 + $0x88] sm:$0xff] }
  0x2b   :  { %12134 = vst [vmem:[#allocation17_spill] sm:$0xff] %v8959_v20  ;;  %v8968_v33 = vpack.c.bf16 %v223_v22, %v222_v21  ;;  %v250_v37 = vmax.f32 %v218_v25, 0.0  ;;  %v178_v42 = vmul.f32 %v8892_v2, %v142_v29  ;;  %v179_v44 = vmul.f32 %v8892_v2, %v143_v31  ;;  %v8202_v19 = vld [vmem:[#allocation5 + $0x1e4] sm:$0xf0] }
  0x2c   :  { %v8970_v36 = vpack.c.bf16 %v253_v24, %v252_v23  ;;  %v251_v38 = vmax.f32 %v219_v26, 0.0  ;;  %v217_v41 = vadd.f32 %v8897_v3, %v181_v28  ;;  %v6504_v46 = vor.u32 %v8200_v35, %v6503_v32 }
  0x2d   :  { %8608 = vmatpush.bf16.msra.mxu1 %v8936_v55  ;;  %657 = vmatpush.bf16.msra.mxu0 %v8936_v55  ;;  %12135 = vst [vmem:[#allocation18_spill] sm:$0xff] %v8968_v33  ;;  %v176_v47 = vmul.f32 %v8892_v2, %v140_v39  ;;  %v177_v49 = vmul.f32 %v8892_v2, %v141_v45  ;;  %v248_v50 = vmax.f32 %v216_v40, 0.0  ;;  %v8144_v39 = vld [vmem:[#allocation5 + $0x14] sm:$0xf0]  ;;  %v6519_v45 = vld [vmem:[#allocation5 + $0x1f0] sm:$0xf] }
  0x2e   :  { %12136 = vst [vmem:[#allocation19_spill] sm:$0xff] %v8970_v36  ;;  %v8979_v48 = vpack.c.bf16 %v251_v38, %v250_v37  ;;  %v249_v51 = vmax.f32 %v217_v41, 0.0  ;;  %v214_v52 = vadd.f32 %v8897_v3, %v178_v42  ;;  %v215_v53 = vadd.f32 %v8897_v3, %v179_v44  ;;  %v6279_v38 = vld [vmem:[#allocation5 + $0x10] sm:$0xf] }
  0x2f   :  { %v212_v57 = vadd.f32 %v8897_v3, %v176_v47  ;;  %v213_v60 = vadd.f32 %v8897_v3, %v177_v49  ;;  %v174_v61 = vmul.f32 %v8892_v2, %v138_v54  ;;  %v175_v62 = vmul.f32 %v8892_v2, %v139_v56  ;;  %v6287_v47 = vld [vmem:[#allocation5 + $0x20] sm:$0xf]  ;;  %v8146_v49 = vld [vmem:[#allocation5 + $0x24] sm:$0xf0]  ;;  %v6295_v54 = vld [vmem:[#allocation5 + $0x30] sm:$0xf] }
  0x30   :  { %12137 = vst [vmem:[#allocation20_spill] sm:$0xff] %v8979_v48  ;;  %v6272_v63 = vor.u32 %v8142_v59, %v6271_v58  ;;  %v8991_v0 = vpack.c.bf16 %v249_v51, %v248_v50  ;;  %v246_v1 = vmax.f32 %v214_v52, 0.0  ;;  %v247_v5 = vmax.f32 %v215_v53, 0.0  ;;  %v8141_v51 = vld [vmem:[#allocation5 + $0x4] sm:$0xf] }
  0x31   :  { %8609 = vmatpush.bf16.msra.mxu1 %v8944_v4  ;;  %658 = vmatpush.bf16.msra.mxu0 %v8944_v4  ;;  %v244_v8 = vmax.f32 %v212_v57, 0.0  ;;  %v245_v9 = vmax.f32 %v213_v60, 0.0  ;;  %v210_v11 = vadd.f32 %v8897_v3, %v174_v61  ;;  %v211_v12 = vadd.f32 %v8897_v3, %v175_v62  ;;  %v6273_v52 = vld [vmem:[#allocation5 + $0x8] sm:$0xf0]  ;;  %v8148_v56 = vld [vmem:[#allocation5 + $0x34] sm:$0xf0] }
  0x32   :  { %12138 = vst [vmem:[#allocation21_spill] sm:$0xff] %v8991_v0  ;;  %v8996_v13 = vpack.c.bf16 %v247_v5, %v246_v1  ;;  %v172_v14 = vmul.f32 %v8892_v2, %v136_v6  ;;  %v173_v15 = vmul.f32 %v8892_v2, %v137_v7  ;;  %v170_v26 = vmul.f32 %v8892_v2, %v134_v16  ;;  %v8143_v58 = vld [vmem:[#allocation5 + $0x14] sm:$0xf]  ;;  %v6281_v59 = vld [vmem:[#allocation5 + $0x18] sm:$0xf0] }
  0x33   :  { %v9000_v21 = vpack.c.bf16 %v245_v9, %v244_v8  ;;  %v242_v22 = vmax.f32 %v210_v11, 0.0  ;;  %v243_v23 = vmax.f32 %v211_v12, 0.0  ;;  %v171_v27 = vmul.f32 %v8892_v2, %v135_v17  ;;  %v6303_v61 = vld [vmem:[#allocation5 + $0x40] sm:$0xf]  ;;  %v8150_v62 = vld [vmem:[#allocation5 + $0x44] sm:$0xf0] }
  0x34   :  { %12139 = vst [vmem:[#allocation22_spill] sm:$0xff] %v8996_v13  ;;  %v208_v24 = vadd.f32 %v8897_v3, %v172_v14  ;;  %v209_v25 = vadd.f32 %v8897_v3, %v173_v15  ;;  %v6512_v28 = vor.u32 %v8202_v19, %v6511_v18  ;;  %v206_v35 = vadd.f32 %v8897_v3, %v170_v26  ;;  %v8145_v1 = vld [vmem:[#allocation5 + $0x24] sm:$0xf]  ;;  %v6289_v5 = vld [vmem:[#allocation5 + $0x28] sm:$0xf0] }
  0x35   :  { %8610 = vmatpush.bf16.msra.mxu1 %v8950_v10  ;;  %659 = vmatpush.bf16.msra.mxu0 %v8950_v10  ;;  %12140 = vst [vmem:[#allocation23_spill] sm:$0xff] %v9000_v21  ;;  %v9007_v29 = vpack.c.bf16 %v243_v23, %v242_v22  ;;  %v207_v37 = vadd.f32 %v8897_v3, %v171_v27  ;;  %v6311_v7 = vld [vmem:[#allocation5 + $0x50] sm:$0xf]  ;;  %v8152_v8 = vld [vmem:[#allocation5 + $0x54] sm:$0xf0] }
  0x36   :  { %v240_v31 = vmax.f32 %v208_v24, 0.0  ;;  %v241_v32 = vmax.f32 %v209_v25, 0.0  ;;  %v6280_v40 = vor.u32 %v8144_v39, %v6279_v38  ;;  %v238_v2 = vmax.f32 %v206_v35, 0.0  ;;  %v8147_v11 = vld [vmem:[#allocation5 + $0x34] sm:$0xf] }
  0x37   :  { %12141 = vst [vmem:[#allocation24_spill] sm:$0xff] %v9007_v29  ;;  %v239_v42 = vmax.f32 %v207_v37, 0.0  ;;  %v6288_v50 = vor.u32 %v8146_v49, %v6287_v47  ;;  %v6276_v53 = vor.u32 %v8141_v51, %v6273_v52  ;;  %v6296_v57 = vor.u32 %v8148_v56, %v6295_v54  ;;  %v6297_v12 = vld [vmem:[#allocation5 + $0x38] sm:$0xf0]  ;;  %v6319_v15 = vld [vmem:[#allocation5 + $0x60] sm:$0xf] }
  0x38   :  { %v9013_v41 = vpack.c.bf16 %v241_v32, %v240_v31  ;;  %v6284_v60 = vor.u32 %v8143_v58, %v6281_v59  ;;  %v6292_v6 = vor.u32 %v8145_v1, %v6289_v5  ;;  %v6312_v9 = vor.u32 %v8152_v8, %v6311_v7  ;;  %v8154_v16 = vld [vmem:[#allocation5 + $0x64] sm:$0xf0]  ;;  %v8149_v18 = vld [vmem:[#allocation5 + $0x44] sm:$0xf]  ;;  %v6305_v19 = vld [vmem:[#allocation5 + $0x48] sm:$0xf0] }
  0x39   :  { %8611 = vmatpush.bf16.msra.mxu1 %v8959_v20  ;;  %660 = vmatpush.bf16.msra.mxu0 %v8959_v20  ;;  %v9016_v44 = vpack.c.bf16 %v239_v42, %v238_v2  ;;  %v6300_v14 = vor.u32 %v8147_v11, %v6297_v12  ;;  %v6320_v17 = vor.u32 %v8154_v16, %v6319_v15  ;;  %v6327_v23 = vld [vmem:[#allocation5 + $0x70] sm:$0xf]  ;;  %v8156_v24 = vld [vmem:[#allocation5 + $0x74] sm:$0xf0]  ;;  %v8151_v26 = vld [vmem:[#allocation5 + $0x54] sm:$0xf] }
  0x3a   :  { %12142 = vst [vmem:[#allocation25_spill] sm:$0xff] %v9013_v41  ;;  %v6308_v22 = vor.u32 %v8149_v18, %v6305_v19  ;;  %v6328_v25 = vor.u32 %v8156_v24, %v6327_v23  ;;  %v6313_v27 = vld [vmem:[#allocation5 + $0x58] sm:$0xf0]  ;;  %v6335_v37 = vld [vmem:[#allocation5 + $0x80] sm:$0xf] }
  0x3b   :  { %12143 = vst [vmem:[#allocation26_spill] sm:$0xff] %v9016_v44  ;;  %v8158_v38 = vld [vmem:[#allocation5 + $0x84] sm:$0xf0]  ;;  %v8153_v2 = vld [vmem:[#allocation5 + $0x64] sm:$0xf] }
  0x3c   :  { %v6336_v39 = vor.u32 %v8158_v38, %v6335_v37  ;;  %v6321_v42 = vld [vmem:[#allocation5 + $0x68] sm:$0xf0]  ;;  %v6343_v49 = vld [vmem:[#allocation5 + $0x90] sm:$0xf]  ;;  %v6329_v54 = vld [vmem:[#allocation5 + $0x78] sm:$0xf0] }
  0x3d   :  { %8612 = vmatpush.bf16.msra.mxu1 %v8968_v33  ;;  %661 = vmatpush.bf16.msra.mxu0 %v8968_v33  ;;  %v8157_v1 = vld [vmem:[#allocation5 + $0x84] sm:$0xf]  ;;  %v6337_v5 = vld [vmem:[#allocation5 + $0x88] sm:$0xf0]  ;;  %v6359_v12 = vld [vmem:[#allocation5 + $0xb0] sm:$0xf] }
  0x3e   :  { %v8159_v18 = vld [vmem:[#allocation5 + $0x94] sm:$0xf]  ;;  %v6345_v19 = vld [vmem:[#allocation5 + $0x98] sm:$0xf0] }
  0x40   :  { %807 = vmatmul.bf16.vlgmr.msra.gmra.mxu1 %v6504_v46  ;;  %662 = vmatmul.bf16.vlgmr.msra.gmra.mxu0 %v6272_v63  ;;  %v8204_v46 = vld [vmem:[#allocation5 + $0x1f4] sm:$0xf0]  ;;  %v6304_v63 = vor.u32 %v8150_v62, %v6303_v61  ;;  %v8162_v61 = vld [vmem:[#allocation5 + $0xa4] sm:$0xf0] }
  0x41   :  { %823 = vmatpush.bf16.msrb.mxu1 %v8970_v36  ;;  %v6520_v3 = vor.u32 %v8204_v46, %v6519_v45  ;;  %v6324_v45 = vor.u32 %v8153_v2, %v6321_v42 }
  0x45   :  { %824 = vmatpush.bf16.msrb.mxu1 %v8979_v48 }
  0x49   :  { %825 = vmatpush.bf16.msrb.mxu1 %v8991_v0 }
  0x4d   :  { %826 = vmatpush.bf16.msrb.mxu1 %v8996_v13 }
  0x50   :  { %812 = vmatmul.bf16.gmra.mxu1 %v6512_v28  ;;  %667 = vmatmul.bf16.gmra.mxu0 %v6280_v40  ;;  %v6316_v28 = vor.u32 %v8151_v26, %v6313_v27  ;;  %v6367_v27 = vld [vmem:[#allocation5 + $0xc0] sm:$0xf] }
  0x51   :  { %827 = vmatpush.bf16.msrb.mxu1 %v9000_v21 }
  0x55   :  { %828 = vmatpush.bf16.msrb.mxu1 %v9007_v29 }
  0x59   :  { %829 = vmatpush.bf16.msrb.mxu1 %v9013_v41 }
  0x5d   :  { %830 = vmatpush.bf16.msrb.mxu1 %v9016_v44 }
  0x60   :  { %817 = vmatmul.bf16.gmra.mxu1 %v6520_v3  ;;  %672 = vmatmul.bf16.gmra.mxu0 %v6288_v50  ;;  %v8160_v50 = vld [vmem:[#allocation5 + $0x94] sm:$0xf0] }
  0x61   :  { %v6344_v51 = vor.u32 %v8160_v50, %v6343_v49  ;;  %v6375_v50 = vld [vmem:[#allocation5 + $0xd0] sm:$0xf] }
  0x70   :  { %831 = vmatmul.bf16.vlgmr.msrb.gmra.mxu1 %v6276_v53  ;;  %677 = vmatmul.bf16.gmra.mxu0 %v6296_v57  ;;  %v8155_v53 = vld [vmem:[#allocation5 + $0x74] sm:$0xf] }
  0x71   :  { %v6332_v56 = vor.u32 %v8155_v53, %v6329_v54 }
  0x80   :  { %836 = vmatmul.bf16.gmra.mxu1 %v6284_v60  ;;  %682 = vmatmul.bf16.gmra.mxu0 %v6304_v63  ;;  %v6351_v60 = vld [vmem:[#allocation5 + $0xa0] sm:$0xf] }
  0x81   :  { %v6352_v62 = vor.u32 %v8162_v61, %v6351_v60 }
  0x90   :  { %841 = vmatmul.bf16.gmra.mxu1 %v6292_v6  ;;  %687 = vmatmul.bf16.gmra.mxu0 %v6312_v9  ;;  %v6340_v6 = vor.u32 %v8157_v1, %v6337_v5 }
  0xa0   :  { %846 = vmatmul.bf16.gmra.mxu1 %v6300_v14  ;;  %692 = vmatmul.bf16.gmra.mxu0 %v6320_v17  ;;  %v8164_v14 = vld [vmem:[#allocation5 + $0xb4] sm:$0xf0] }
  0xa1   :  { %v6360_v16 = vor.u32 %v8164_v14, %v6359_v12  ;;  %v6369_v14 = vld [vmem:[#allocation5 + $0xc8] sm:$0xf0] }
  0xb0   :  { %851 = vmatmul.bf16.gmra.mxu1 %v6308_v22  ;;  %697 = vmatmul.bf16.gmra.mxu0 %v6328_v25  ;;  %v6348_v22 = vor.u32 %v8159_v18, %v6345_v19 }
  0xbd   :  { %v9019_v31 = vpop.f32.mrf.mxu1  ;;  %v663_v32 = vpop.f32.mrf.mxu0 }
  0xc0   :  { %856 = vmatmul.bf16.gmra.mxu1 %v6316_v28  ;;  %702 = vmatmul.bf16.gmra.mxu0 %v6336_v39  ;;  %v8166_v28 = vld [vmem:[#allocation5 + $0xc4] sm:$0xf0]  ;;  %v8161_v39 = vld [vmem:[#allocation5 + $0xa4] sm:$0xf] }
  0xc1   :  { %v6368_v37 = vor.u32 %v8166_v28, %v6367_v27  ;;  %v8172_v27 = vld [vmem:[#allocation5 + $0xf4] sm:$0xf0] }
  0xc5   :  { %v9021_v35 = vpop.f32.mrf.mxu1  ;;  %v665_v40 = vpop.f32.mrf.mxu0 }
  0xcd   :  { %v9023_v46 = vpop.f32.mrf.mxu1  ;;  %v668_v3 = vpop.f32.mrf.mxu0 }
  0xd0   :  { %861 = vmatmul.bf16.gmra.mxu1 %v6324_v45  ;;  %707 = vmatmul.bf16.gmra.mxu0 %v6344_v51  ;;  %v8168_v51 = vld [vmem:[#allocation5 + $0xd4] sm:$0xf0] }
  0xd1   :  { %v6376_v54 = vor.u32 %v8168_v51, %v6375_v50  ;;  %v6399_v51 = vld [vmem:[#allocation5 + $0x100] sm:$0xf] }
  0xd5   :  { %v9025_v47 = vpop.f32.mrf.mxu1  ;;  %v670_v52 = vpop.f32.mrf.mxu0 }
  0xdd   :  { %v9027_v57 = vpop.f32.mrf.mxu1  ;;  %v673_v58 = vpop.f32.mrf.mxu0 }
  0xe0   :  { %866 = vmatmul.bf16.gmra.mxu1 %v6332_v56  ;;  %712 = vmatmul.bf16.gmra.mxu0 %v6352_v62  ;;  %v6361_v56 = vld [vmem:[#allocation5 + $0xb8] sm:$0xf0] }
  0xe5   :  { %v9029_v59 = vpop.f32.mrf.mxu1  ;;  %v675_v63 = vpop.f32.mrf.mxu0 }
  0xed   :  { %v832_v7 = vpop.f32.mrf.mxu1  ;;  %v678_v9 = vpop.f32.mrf.mxu0 }
  0xee   :  { %v9031_v8 = vadd.f32 %v832_v7, %v663_v32  ;;  %v8170_v7 = vld [vmem:[#allocation5 + $0xe4] sm:$0xf0] }
  0xf0   :  { %871 = vmatmul.bf16.gmra.mxu1 %v6340_v6  ;;  %717 = vmatmul.bf16.gmra.mxu0 %v6360_v16  ;;  %v6383_v6 = vld [vmem:[#allocation5 + $0xe0] sm:$0xf] }
  0xf1   :  { %v6384_v12 = vor.u32 %v8170_v7, %v6383_v6 }
  0xf5   :  { %v834_v11 = vpop.f32.mrf.mxu1  ;;  %v680_v17 = vpop.f32.mrf.mxu0 }
  0xf6   :  { %v9033_v15 = vadd.f32 %v834_v11, %v665_v40  ;;  %v6353_v40 = vld [vmem:[#allocation5 + $0xa8] sm:$0xf0] }
  0xf7   :  { %v6356_v2 = vor.u32 %v8161_v39, %v6353_v40  ;;  %v6377_v39 = vld [vmem:[#allocation5 + $0xd8] sm:$0xf0] }
  0xfd   :  { %v837_v23 = vpop.f32.mrf.mxu1  ;;  %v683_v25 = vpop.f32.mrf.mxu0 }
  0xfe   :  { %v9035_v24 = vadd.f32 %v837_v23, %v668_v3 }
 0x100   :  { %876 = vmatmul.bf16.gmra.mxu1 %v6348_v22  ;;  %722 = vmatmul.bf16.gmra.mxu0 %v6368_v37 }
 0x105   :  { %v839_v26 = vpop.f32.mrf.mxu1  ;;  %v685_v38 = vpop.f32.mrf.mxu0 }
 0x106   :  { %v9037_v32 = vadd.f32 %v839_v26, %v670_v52  ;;  %v8163_v52 = vld [vmem:[#allocation5 + $0xb4] sm:$0xf]  ;;  %v6391_v26 = vld [vmem:[#allocation5 + $0xf0] sm:$0xf] }
 0x107   :  { %v6364_v61 = vor.u32 %v8163_v52, %v6361_v56  ;;  %v6392_v37 = vor.u32 %v8172_v27, %v6391_v26 }
 0x10d   :  { %v842_v42 = vpop.f32.mrf.mxu1  ;;  %v688_v49 = vpop.f32.mrf.mxu0 }
 0x10e   :  { %v9039_v45 = vadd.f32 %v842_v42, %v673_v58 }
 0x110   :  { %881 = vmatmul.bf16.gmra.mxu1 %v6356_v2  ;;  %727 = vmatmul.bf16.gmra.mxu0 %v6376_v54  ;;  %v8174_v54 = vld [vmem:[#allocation5 + $0x104] sm:$0xf0] }
 0x111   :  { %v6400_v56 = vor.u32 %v8174_v54, %v6399_v51  ;;  %v6401_v54 = vld [vmem:[#allocation5 + $0x108] sm:$0xf0] }
 0x115   :  { %v844_v3 = vpop.f32.mrf.mxu1  ;;  %v690_v60 = vpop.f32.mrf.mxu0 }
 0x116   :  { %v9041_v53 = vadd.f32 %v844_v3, %v675_v63  ;;  %v8165_v63 = vld [vmem:[#allocation5 + $0xc4] sm:$0xf] }
 0x117   :  { %v6372_v16 = vor.u32 %v8165_v63, %v6369_v14  ;;  %v6407_v63 = vld [vmem:[#allocation5 + $0x110] sm:$0xf]  ;;  %v8176_v14 = vld [vmem:[#allocation5 + $0x114] sm:$0xf0] }
 0x11d   :  { %v847_v62 = vpop.f32.mrf.mxu1  ;;  %v693_v58 = vpop.f32.mrf.mxu0 }
 0x11e   :  { %v9043_v1 = vadd.f32 %v847_v62, %v678_v9 }
 0x120   :  { %886 = vmatmul.bf16.gmra.mxu1 %v6364_v61  ;;  %732 = vmatmul.bf16.gmra.mxu0 %v6384_v12  ;;  %v6385_v61 = vld [vmem:[#allocation5 + $0xe8] sm:$0xf0] }
 0x125   :  { %v849_v5 = vpop.f32.mrf.mxu1  ;;  %v695_v19 = vpop.f32.mrf.mxu0 }
 0x126   :  { %v9045_v11 = vadd.f32 %v849_v5, %v680_v17  ;;  %v8167_v17 = vld [vmem:[#allocation5 + $0xd4] sm:$0xf] }
 0x127   :  { %v6380_v40 = vor.u32 %v8167_v17, %v6377_v39 }
 0x12d   :  { %v852_v18 = vpop.f32.mrf.mxu1  ;;  %v698_v9 = vpop.f32.mrf.mxu0 }
 0x12e   :  { %v9047_v22 = vadd.f32 %v852_v18, %v683_v25  ;;  %v6408_v18 = vor.u32 %v8176_v14, %v6407_v63  ;;  %v6423_v63 = vld [vmem:[#allocation5 + $0x130] sm:$0xf]  ;;  %v8180_v14 = vld [vmem:[#allocation5 + $0x134] sm:$0xf0] }
 0x130   :  { %891 = vmatmul.bf16.gmra.mxu1 %v6372_v16  ;;  %737 = vmatmul.bf16.gmra.mxu0 %v6392_v37 }
 0x135   :  { %v854_v23 = vpop.f32.mrf.mxu1  ;;  %v700_v42 = vpop.f32.mrf.mxu0 }
 0x136   :  { %v9049_v28 = vadd.f32 %v854_v23, %v685_v38  ;;  %v8169_v38 = vld [vmem:[#allocation5 + $0xe4] sm:$0xf]  ;;  %v6393_v23 = vld [vmem:[#allocation5 + $0xf8] sm:$0xf0] }
 0x137   :  { %v6388_v62 = vor.u32 %v8169_v38, %v6385_v61 }
 0x13d   :  { %v857_v2 = vpop.f32.mrf.mxu1  ;;  %v703_v25 = vpop.f32.mrf.mxu0 }
 0x13e   :  { %v9051_v3 = vadd.f32 %v857_v2, %v688_v49  ;;  %v8178_v2 = vld [vmem:[#allocation5 + $0x124] sm:$0xf0] }
 0x140   :  { %896 = vmatmul.bf16.gmra.mxu1 %v6380_v40  ;;  %742 = vmatmul.bf16.gmra.mxu0 %v6400_v56  ;;  %v6415_v40 = vld [vmem:[#allocation5 + $0x120] sm:$0xf] }
 0x141   :  { %v6416_v51 = vor.u32 %v8178_v2, %v6415_v40 }
 0x145   :  { %v859_v50 = vpop.f32.mrf.mxu1  ;;  %v705_v6 = vpop.f32.mrf.mxu0 }
 0x146   :  { %v9053_v52 = vadd.f32 %v859_v50, %v690_v60  ;;  %v8171_v60 = vld [vmem:[#allocation5 + $0xf4] sm:$0xf] }
 0x147   :  { %v6396_v26 = vor.u32 %v8171_v60, %v6393_v23  ;;  %v8175_v23 = vld [vmem:[#allocation5 + $0x114] sm:$0xf] }
 0x14d   :  { %v862_v5 = vpop.f32.mrf.mxu1  ;;  %v708_v49 = vpop.f32.mrf.mxu0 }
 0x14e   :  { %v9055_v7 = vadd.f32 %v862_v5, %v693_v58 }
 0x150   :  { %901 = vmatmul.bf16.gmra.mxu1 %v6388_v62  ;;  %747 = vmatmul.bf16.gmra.mxu0 %v6408_v18 }
 0x155   :  { %v864_v12 = vpop.f32.mrf.mxu1  ;;  %v710_v37 = vpop.f32.mrf.mxu0 }
 0x156   :  { %v9057_v16 = vadd.f32 %v864_v12, %v695_v19  ;;  %v8173_v19 = vld [vmem:[#allocation5 + $0x104] sm:$0xf] }
 0x157   :  { %v6404_v56 = vor.u32 %v8173_v19, %v6401_v54  ;;  %v8182_v54 = vld [vmem:[#allocation5 + $0x144] sm:$0xf0] }
 0x15d   :  { %v867_v27 = vpop.f32.mrf.mxu1  ;;  %v713_v58 = vpop.f32.mrf.mxu0 }
 0x15e   :  { %v9059_v17 = vadd.f32 %v867_v27, %v698_v9 }
 0x160   :  { %906 = vmatmul.bf16.gmra.mxu1 %v6396_v26  ;;  %752 = vmatmul.bf16.gmra.mxu0 %v6416_v51  ;;  %v6409_v26 = vld [vmem:[#allocation5 + $0x118] sm:$0xf0] }
 0x161   :  { %v6412_v27 = vor.u32 %v8175_v23, %v6409_v26 }
 0x165   :  { %v869_v39 = vpop.f32.mrf.mxu1  ;;  %v715_v61 = vpop.f32.mrf.mxu0 }
 0x166   :  { %v9061_v50 = vadd.f32 %v869_v39, %v700_v42  ;;  %v6424_v42 = vor.u32 %v8180_v14, %v6423_v63  ;;  %v8177_v63 = vld [vmem:[#allocation5 + $0x124] sm:$0xf]  ;;  %v6417_v14 = vld [vmem:[#allocation5 + $0x128] sm:$0xf0] }
 0x16d   :  { %v872_v38 = vpop.f32.mrf.mxu1  ;;  %v718_v12 = vpop.f32.mrf.mxu0 }
 0x16e   :  { %v9063_v62 = vadd.f32 %v872_v38, %v703_v25 }
 0x170   :  { %911 = vmatmul.bf16.gmra.mxu1 %v6404_v56  ;;  %757 = vmatmul.bf16.gmra.mxu0 %v6424_v42  ;;  %v6420_v42 = vor.u32 %v8177_v63, %v6417_v14  ;;  %v8179_v63 = vld [vmem:[#allocation5 + $0x134] sm:$0xf]  ;;  %v6425_v14 = vld [vmem:[#allocation5 + $0x138] sm:$0xf0] }
 0x175   :  { %v874_v5 = vpop.f32.mrf.mxu1  ;;  %v720_v39 = vpop.f32.mrf.mxu0 }
 0x176   :  { %v9067_v18 = vadd.f32 %v874_v5, %v705_v6  ;;  %v6431_v6 = vld [vmem:[#allocation5 + $0x140] sm:$0xf]  ;;  %v6428_v5 = vor.u32 %v8179_v63, %v6425_v14  ;;  %v8181_v63 = vld [vmem:[#allocation5 + $0x144] sm:$0xf]  ;;  %v6433_v14 = vld [vmem:[#allocation5 + $0x148] sm:$0xf0] }
 0x177   :  { %v6432_v38 = vor.u32 %v8182_v54, %v6431_v6 }
 0x17d   :  { %v877_v25 = vpop.f32.mrf.mxu1  ;;  %v723_v19 = vpop.f32.mrf.mxu0 }
 0x17e   :  { %v9071_v40 = vadd.f32 %v877_v25, %v708_v49 }
 0x180   :  { %916 = vmatmul.bf16.gmra.mxu1 %v6412_v27  ;;  %762 = vmatmul.bf16.gmra.mxu0 %v6432_v38  ;;  %v6436_v38 = vor.u32 %v8181_v63, %v6433_v14  ;;  %v8183_v63 = vld [vmem:[#allocation5 + $0x154] sm:$0xf]  ;;  %v6441_v14 = vld [vmem:[#allocation5 + $0x158] sm:$0xf0] }
 0x185   :  { %v879_v51 = vpop.f32.mrf.mxu1  ;;  %v725_v23 = vpop.f32.mrf.mxu0 }
 0x186   :  { %v9075_v56 = vadd.f32 %v879_v51, %v710_v37  ;;  %v6439_v37 = vld [vmem:[#allocation5 + $0x150] sm:$0xf]  ;;  %v8184_v51 = vld [vmem:[#allocation5 + $0x154] sm:$0xf0] }
 0x187   :  { %v6440_v54 = vor.u32 %v8184_v51, %v6439_v37 }
 0x18d   :  { %v882_v49 = vpop.f32.mrf.mxu1  ;;  %v728_v2 = vpop.f32.mrf.mxu0 }
 0x18e   :  { %v9079_v26 = vadd.f32 %v882_v49, %v713_v58 }
 0x190   :  { %921 = vmatmul.bf16.gmra.mxu1 %v6420_v42  ;;  %767 = vmatmul.bf16.gmra.mxu0 %v6440_v54  ;;  %v6444_v54 = vor.u32 %v8183_v63, %v6441_v14  ;;  %v8185_v63 = vld [vmem:[#allocation5 + $0x164] sm:$0xf]  ;;  %v6449_v14 = vld [vmem:[#allocation5 + $0x168] sm:$0xf0] }
 0x195   :  { %v884_v25 = vpop.f32.mrf.mxu1  ;;  %v730_v49 = vpop.f32.mrf.mxu0 }
 0x196   :  { %v9083_v6 = vadd.f32 %v884_v25, %v715_v61  ;;  %v6447_v61 = vld [vmem:[#allocation5 + $0x160] sm:$0xf]  ;;  %v8186_v25 = vld [vmem:[#allocation5 + $0x164] sm:$0xf0] }
 0x197   :  { %v6448_v51 = vor.u32 %v8186_v25, %v6447_v61 }
 0x19d   :  { %v887_v58 = vpop.f32.mrf.mxu1  ;;  %v733_v9 = vpop.f32.mrf.mxu0 }
 0x19e   :  { %v9087_v60 = vadd.f32 %v887_v58, %v718_v12 }
 0x1a0   :  { %926 = vmatmul.bf16.gmra.mxu1 %v6428_v5  ;;  %772 = vmatmul.bf16.gmra.mxu0 %v6448_v51  ;;  %v6452_v51 = vor.u32 %v8185_v63, %v6449_v14  ;;  %v8187_v63 = vld [vmem:[#allocation5 + $0x174] sm:$0xf]  ;;  %v6457_v14 = vld [vmem:[#allocation5 + $0x178] sm:$0xf0] }
 0x1a5   :  { %v889_v27 = vpop.f32.mrf.mxu1  ;;  %v735_v58 = vpop.f32.mrf.mxu0 }
 0x1a6   :  { %v9091_v37 = vadd.f32 %v889_v27, %v720_v39  ;;  %v6455_v39 = vld [vmem:[#allocation5 + $0x170] sm:$0xf]  ;;  %v8188_v27 = vld [vmem:[#allocation5 + $0x174] sm:$0xf0] }
 0x1a7   :  { %v6456_v25 = vor.u32 %v8188_v27, %v6455_v39 }
 0x1ad   :  { %v892_v12 = vpop.f32.mrf.mxu1  ;;  %v738_v41 = vpop.f32.mrf.mxu0 }
 0x1ae   :  { %v9095_v44 = vadd.f32 %v892_v12, %v723_v19 }
 0x1b0   :  { %931 = vmatmul.bf16.gmra.mxu1 %v6436_v38  ;;  %777 = vmatmul.bf16.gmra.mxu0 %v6456_v25  ;;  %v6460_v25 = vor.u32 %v8187_v63, %v6457_v14  ;;  %v8189_v63 = vld [vmem:[#allocation5 + $0x184] sm:$0xf]  ;;  %v6465_v14 = vld [vmem:[#allocation5 + $0x188] sm:$0xf0] }
 0x1b5   :  { %v894_v42 = vpop.f32.mrf.mxu1  ;;  %v740_v12 = vpop.f32.mrf.mxu0 }
 0x1b6   :  { %v9099_v61 = vadd.f32 %v894_v42, %v725_v23  ;;  %v6463_v23 = vld [vmem:[#allocation5 + $0x180] sm:$0xf]  ;;  %v8190_v42 = vld [vmem:[#allocation5 + $0x184] sm:$0xf0] }
 0x1b7   :  { %v6464_v27 = vor.u32 %v8190_v42, %v6463_v23 }
 0x1bd   :  { %v897_v19 = vpop.f32.mrf.mxu1  ;;  %v743_v21 = vpop.f32.mrf.mxu0 }
 0x1be   :  { %v9103_v29 = vadd.f32 %v897_v19, %v728_v2 }
 0x1c0   :  { %936 = vmatmul.bf16.gmra.mxu1 %v6444_v54  ;;  %782 = vmatmul.bf16.gmra.mxu0 %v6464_v27  ;;  %v6468_v27 = vor.u32 %v8189_v63, %v6465_v14  ;;  %v8191_v63 = vld [vmem:[#allocation5 + $0x194] sm:$0xf] }
 0x1c5   :  { %v899_v5 = vpop.f32.mrf.mxu1  ;;  %v745_v19 = vpop.f32.mrf.mxu0 }
 0x1c6   :  { %v9107_v39 = vadd.f32 %v899_v5, %v730_v49  ;;  %v6471_v49 = vld [vmem:[#allocation5 + $0x190] sm:$0xf]  ;;  %v8192_v5 = vld [vmem:[#allocation5 + $0x194] sm:$0xf0] }
 0x1c7   :  { %v6472_v42 = vor.u32 %v8192_v5, %v6471_v49 }
 0x1cd   :  { %v902_v2 = vpop.f32.mrf.mxu1  ;;  %v748_v0 = vpop.f32.mrf.mxu0 }
 0x1ce   :  { %v9111_v13 = vadd.f32 %v902_v2, %v733_v9 }
 0x1d0   :  { %941 = vmatmul.bf16.gmra.mxu1 %v6452_v51  ;;  %787 = vmatmul.bf16.gmra.mxu0 %v6472_v42 }
 0x1d5   :  { %v904_v38 = vpop.f32.mrf.mxu1  ;;  %v750_v2 = vpop.f32.mrf.mxu0 }
 0x1d6   :  { %v9115_v23 = vadd.f32 %v904_v38, %v735_v58  ;;  %v6479_v58 = vld [vmem:[#allocation5 + $0x1a0] sm:$0xf]  ;;  %v8194_v38 = vld [vmem:[#allocation5 + $0x1a4] sm:$0xf0] }
 0x1d7   :  { %v6480_v5 = vor.u32 %v8194_v38, %v6479_v58 }
 0x1dd   :  { %v907_v9 = vpop.f32.mrf.mxu1  ;;  %v753_v36 = vpop.f32.mrf.mxu0 }
 0x1de   :  { %v9119_v48 = vadd.f32 %v907_v9, %v738_v41 }
 0x1e0   :  { %946 = vmatmul.bf16.gmra.mxu1 %v6460_v25  ;;  %792 = vmatmul.bf16.gmra.mxu0 %v6480_v5  ;;  %v12144_v25 = vmax.f32 %v9031_v8, %v9063_v62  ;;  %v12145_v5 = vmax.f32 %v9033_v15, %v9067_v18  ;;  %v12147_v18 = vmax.f32 %v9037_v32, %v9075_v56 }
 0x1e1   :  { %v12149_v32 = vmax.f32 %v9041_v53, %v9083_v6  ;;  %v8197_v6 = vld [vmem:[#allocation5 + $0x1c4] sm:$0xf] }
 0x1e5   :  { %v909_v54 = vpop.f32.mrf.mxu1  ;;  %v755_v9 = vpop.f32.mrf.mxu0 }
 0x1e6   :  { %v9123_v49 = vadd.f32 %v909_v54, %v740_v12  ;;  %v6487_v12 = vld [vmem:[#allocation5 + $0x1b0] sm:$0xf]  ;;  %v8196_v54 = vld [vmem:[#allocation5 + $0x1b4] sm:$0xf0] }
 0x1e7   :  { %v6488_v38 = vor.u32 %v8196_v54, %v6487_v12 }
 0x1ed   :  { %v912_v41 = vpop.f32.mrf.mxu1  ;;  %v758_v10 = vpop.f32.mrf.mxu0 }
 0x1ee   :  { %v913_v33 = vadd.f32 %v912_v41, %v743_v21  ;;  %v6473_v21 = vld [vmem:[#allocation5 + $0x198] sm:$0xf0] }
 0x1ef   :  { %v6476_v14 = vor.u32 %v8191_v63, %v6473_v21  ;;  %v12148_v63 = vmax.f32 %v9039_v45, %v9079_v26  ;;  %v12150_v45 = vmax.f32 %v9043_v1, %v9087_v60  ;;  %v12152_v1 = vmax.f32 %v9047_v22, %v9095_v44  ;;  %v8219_v44 = vld [vmem:[#allocation7 + $0x70] sm:$0xff] }
 0x1f0   :  { %v9130_v51 = vmax.f32 %v12144_v25, %v913_v33  ;;  %951 = vmatmul.bf16.gmra.mxu1 %v6468_v27  ;;  %797 = vmatmul.bf16.gmra.mxu0 %v6488_v38  ;;  %v12146_v33 = vmax.f32 %v9035_v24, %v9071_v40  ;;  %v6495_v27 = vld [vmem:[#allocation5 + $0x1c0] sm:$0xf]  ;;  %v8198_v25 = vld [vmem:[#allocation5 + $0x1c4] sm:$0xf0]  ;;  %v12153_v22 = vmax.f32 %v9051_v3, %v9103_v29  ;;  %v8208_v29 = vld [vmem:[#allocation7 + $0x18] sm:$0xff] }
 0x1f1   :  { %v6496_v15 = vor.u32 %v8198_v25, %v6495_v27  ;;  %v8216_v3 = vld [vmem:[#allocation7 + $0x58] sm:$0xff] }
 0x1f5   :  { %v914_v20 = vpop.f32.mrf.mxu1 }
 0x1f6   :  { %v915_v58 = vadd.f32 %v914_v20, %v745_v19  ;;  %v760_v20 = vpop.f32.mrf.mxu0 }
 0x1f8   :  { %v9135_v42 = vmax.f32 %v12145_v5, %v915_v58  ;;  %v8193_v58 = vld [vmem:[#allocation5 + $0x1a4] sm:$0xf] }
 0x1fd   :  { %v917_v41 = vpop.f32.mrf.mxu1 }
 0x1fe   :  { %v918_v8 = vadd.f32 %v917_v41, %v748_v0  ;;  %v6481_v0 = vld [vmem:[#allocation5 + $0x1a8] sm:$0xf0]  ;;  %v763_v38 = vpop.f32.mrf.mxu0 }
 0x1ff   :  { %v6484_v5 = vor.u32 %v8193_v58, %v6481_v0 }
 0x200   :  { %v9140_v62 = vmax.f32 %v12146_v33, %v918_v8  ;;  %956 = vmatmul.bf16.gmra.mxu1 %v6476_v14  ;;  %802 = vmatmul.bf16.gmra.mxu0 %v6496_v15  ;;  %v8195_v8 = vld [vmem:[#allocation5 + $0x1b4] sm:$0xf]  ;;  %v6489_v33 = vld [vmem:[#allocation5 + $0x1b8] sm:$0xf0] }
 0x205   :  { %v919_v19 = vpop.f32.mrf.mxu1 }
 0x206   :  { %v920_v12 = vadd.f32 %v919_v19, %v750_v2  ;;  %v9152_v14 = vpop.f32.mrf.mxu0  ;;  %v6492_v19 = vor.u32 %v8195_v8, %v6489_v33  ;;  %v8211_v8 = vld [vmem:[#allocation7 + $0x30] sm:$0xff] }
 0x208   :  { %v9145_v54 = vmax.f32 %v12147_v18, %v920_v12  ;;  %v6497_v18 = vld [vmem:[#allocation5 + $0x1c8] sm:$0xf0] }
 0x209   :  { %v6500_v0 = vor.u32 %v8197_v6, %v6497_v18 }
 0x20d   :  { %v922_v24 = vpop.f32.mrf.mxu1 }
 0x20e   :  { %v923_v40 = vadd.f32 %v922_v24, %v753_v36  ;;  %v768_v25 = vpop.f32.mrf.mxu0 }
 0x210   :  { %v9150_v21 = vmax.f32 %v12148_v63, %v923_v40  ;;  %961 = vmatmul.bf16.gmra.mxu1 %v6484_v5  ;;  %v8199_v40 = vld [vmem:[#allocation5 + $0x1d4] sm:$0xf]  ;;  %v8220_v63 = vld [vmem:[#allocation7 + $0x78] sm:$0xff] }
 0x211   :  { %1226 = vmatpush.bf16.msrb.mxu0 %v8220_v63  ;;  %8613 = vmatpush.bf16.msra.mxu3 %v8220_v63  ;;  %v8214_v63 = vld [vmem:[#allocation7 + $0x48] sm:$0xff] }
 0x215   :  { %v924_v2 = vpop.f32.mrf.mxu1  ;;  %1227 = vmatpush.bf16.msrb.mxu0 %v8219_v44  ;;  %8614 = vmatpush.bf16.msra.mxu3 %v8219_v44 }
 0x216   :  { %v925_v41 = vadd.f32 %v924_v2, %v755_v9  ;;  %v12151_v9 = vmax.f32 %v9045_v11, %v9091_v37  ;;  %v9169_v58 = vpop.f32.mrf.mxu0  ;;  %v6505_v11 = vld [vmem:[#allocation5 + $0x1d8] sm:$0xf0] }
 0x217   :  { %v8212_v37 = vld [vmem:[#allocation7 + $0x38] sm:$0xff]  ;;  %v6508_v2 = vor.u32 %v8199_v40, %v6505_v11 }
 0x218   :  { %v9157_v56 = vmax.f32 %v12149_v32, %v925_v41  ;;  %1112 = vmatpush.bf16.msra.mxu2 %v8212_v37  ;;  %v8206_v37 = vld [vmem:[#allocation7 + $0x8] sm:$0xff] }
 0x21c   :  { %1113 = vmatpush.bf16.msra.mxu2 %v8211_v8  ;;  %v6521_v8 = vld [vmem:[#allocation5 + $0x1f8] sm:$0xf0] }
 0x21d   :  { %v927_v27 = vpop.f32.mrf.mxu1 }
 0x21e   :  { %v928_v36 = vadd.f32 %v927_v27, %v758_v10  ;;  %v773_v24 = vpop.f32.mrf.mxu0  ;;  %v8218_v27 = vld [vmem:[#allocation7 + $0x68] sm:$0xff] }
 0x21f   :  { %1228 = vmatpush.bf16.msrb.mxu0 %v8218_v27  ;;  %8615 = vmatpush.bf16.msra.mxu3 %v8218_v27 }
 0x220   :  { %v9162_v26 = vmax.f32 %v12150_v45, %v928_v36  ;;  %966 = vmatmul.bf16.gmra.mxu1 %v6492_v19  ;;  %v8210_v19 = vld [vmem:[#allocation7 + $0x28] sm:$0xff]  ;;  %v8209_v45 = vld [vmem:[#allocation7 + $0x20] sm:$0xff] }
 0x221   :  { %1114 = vmatpush.bf16.msra.mxu2 %v8210_v19  ;;  %v12155_v19 = vmax.f32 %v9059_v17, %v9119_v48 }
 0x225   :  { %v929_v12 = vpop.f32.mrf.mxu1  ;;  %1115 = vmatpush.bf16.msra.mxu2 %v8209_v45 }
 0x226   :  { %v930_v15 = vadd.f32 %v929_v12, %v760_v20  ;;  %v9178_v32 = vpop.f32.mrf.mxu0  ;;  %v8217_v12 = vld [vmem:[#allocation7 + $0x60] sm:$0xff] }
 0x227   :  { %1229 = vmatpush.bf16.msrb.mxu0 %v8217_v12  ;;  %8616 = vmatpush.bf16.msra.mxu3 %v8217_v12 }
 0x228   :  { %v9167_v53 = vmax.f32 %v12151_v9, %v930_v15  ;;  %v8201_v15 = vld [vmem:[#allocation5 + $0x1e4] sm:$0xf]  ;;  %v6513_v9 = vld [vmem:[#allocation5 + $0x1e8] sm:$0xf0] }
 0x229   :  { %v6516_v6 = vor.u32 %v8201_v15, %v6513_v9  ;;  %1116 = vmatpush.bf16.msra.mxu2 %v8208_v29 }
 0x22b   :  { %1230 = vmatpush.bf16.msrb.mxu0 %v8216_v3  ;;  %8617 = vmatpush.bf16.msra.mxu3 %v8216_v3 }
 0x22d   :  { %v932_v10 = vpop.f32.mrf.mxu1 }
 0x22e   :  { %v933_v5 = vadd.f32 %v932_v10, %v763_v38  ;;  %v8207_v10 = vld [vmem:[#allocation7 + $0x10] sm:$0xff] }
 0x22f   :  { %1117 = vmatpush.bf16.msra.mxu2 %v8207_v10 }
 0x230   :  { %v9174_v60 = vmax.f32 %v12152_v1, %v933_v5  ;;  %971 = vmatmul.bf16.gmra.mxu1 %v6500_v0  ;;  %v8215_v5 = vld [vmem:[#allocation7 + $0x50] sm:$0xff]  ;;  %v12154_v1 = vmax.f32 %v9055_v7, %v9111_v13 }
 0x231   :  { %1231 = vmatpush.bf16.msrb.mxu0 %v8215_v5  ;;  %8618 = vmatpush.bf16.msra.mxu3 %v8215_v5 }
 0x233   :  { %1118 = vmatpush.bf16.msra.mxu2 %v8206_v37 }
 0x235   :  { %v9176_v20 = vpop.f32.mrf.mxu1  ;;  %1232 = vmatpush.bf16.msrb.mxu0 %v8214_v63  ;;  %8619 = vmatpush.bf16.msra.mxu3 %v8214_v63 }
 0x23d   :  { %v937_v41 = vpop.f32.mrf.mxu1 }
 0x23e   :  { %v938_v38 = vadd.f32 %v937_v41, %v768_v25  ;;  %v778_v25 = vpop.f32.mrf.mxu0  ;;  %v8213_v41 = vld [vmem:[#allocation7 + $0x40] sm:$0xff] }
 0x23f   :  { %1233 = vmatpush.bf16.msrb.mxu0 %v8213_v41  ;;  %8620 = vmatpush.bf16.msra.mxu3 %v8213_v41 }
 0x240   :  { %v9183_v33 = vmax.f32 %v12153_v22, %v938_v38  ;;  %976 = vmatmul.bf16.gmra.mxu1 %v6508_v2  ;;  %v8203_v38 = vld [vmem:[#allocation5 + $0x1f4] sm:$0xf] }
 0x241   :  { %v6524_v7 = vor.u32 %v8203_v38, %v6521_v8 }
 0x245   :  { %v9185_v36 = vpop.f32.mrf.mxu1 }
 0x246   :  { %v9192_v11 = vpop.f32.mrf.mxu0 }
 0x24d   :  { %v942_v18 = vpop.f32.mrf.mxu1 }
 0x24e   :  { %v943_v0 = vadd.f32 %v942_v18, %v773_v24  ;;  %v8205_v24 = vld [vmem:[#allocation7] sm:$0xff]  ;;  %v783_v13 = vpop.f32.mrf.mxu0 }
 0x24f   :  { %1119 = vmatpush.bf16.msra.mxu2 %v8205_v24 }
 0x250   :  { %v9190_v40 = vmax.f32 %v12154_v1, %v943_v0  ;;  %981 = vmatmul.bf16.gmra.mxu1 %v6516_v6 }
 0x255   :  { %v9194_v2 = vpop.f32.mrf.mxu1 }
 0x256   :  { %v785_v12 = vpop.f32.mrf.mxu0 }
 0x25d   :  { %v947_v44 = vpop.f32.mrf.mxu1 }
 0x25e   :  { %v948_v22 = vadd.f32 %v947_v44, %v778_v25  ;;  %v788_v9 = vpop.f32.mrf.mxu0 }
 0x260   :  { %v9199_v27 = vmax.f32 %v12155_v19, %v948_v22  ;;  %986 = vmatmul.bf16.gmra.mxu1 %v6524_v7 }
 0x265   :  { %v9201_v45 = vpop.f32.mrf.mxu1 }
 0x266   :  { %v790_v10 = vpop.f32.mrf.mxu0 }
 0x26d   :  { %v952_v15 = vpop.f32.mrf.mxu1 }
 0x26e   :  { %v953_v29 = vadd.f32 %v952_v15, %v783_v13  ;;  %v793_v17 = vpop.f32.mrf.mxu0 }
 0x270   :  { %v1024_v18 = vmax.f32 %v9130_v51, %v953_v29 }
 0x275   :  { %v954_v3 = vpop.f32.mrf.mxu1 }
 0x276   :  { %v955_v6 = vadd.f32 %v954_v3, %v785_v12  ;;  %v795_v51 = vpop.f32.mrf.mxu0  ;;  %v8275_v12 = vld [vmem:[#allocation7 + $0x230] sm:$0xff] }
 0x278   :  { %v1025_v0 = vmax.f32 %v9135_v42, %v955_v6 }
 0x27a   :  { %v9205_v25 = vpack.c.bf16 %v1025_v0, %v1024_v18 }
 0x27c   :  { %1120 = vmatmul.bf16.vlgmr.msra.gmra.mxu2 %v9205_v25  ;;  %1234 = vmatmul.bf16.vlgmr.msrb.gmra.mxu0 %v9205_v25 }
 0x27d   :  { %v957_v48 = vpop.f32.mrf.mxu1 }
 0x27e   :  { %v958_v5 = vadd.f32 %v957_v48, %v788_v9  ;;  %v798_v7 = vpop.f32.mrf.mxu0  ;;  %v8274_v9 = vld [vmem:[#allocation7 + $0x228] sm:$0xff]  ;;  %v8272_v48 = vld [vmem:[#allocation7 + $0x218] sm:$0xff] }
 0x280   :  { %v1026_v63 = vmax.f32 %v9140_v62, %v958_v5  ;;  %v8276_v62 = vld [vmem:[#allocation7 + $0x238] sm:$0xff]  ;;  %v8271_v5 = vld [vmem:[#allocation7 + $0x210] sm:$0xff] }
 0x281   :  { %2024 = vmatpush.bf16.msra.mxu0 %v8276_v62  ;;  %v8226_v62 = vld [vmem:[#allocation7 + $0xa8] sm:$0xff] }
 0x285   :  { %v959_v1 = vpop.f32.mrf.mxu1  ;;  %2025 = vmatpush.bf16.msra.mxu0 %v8275_v12 }
 0x286   :  { %v960_v37 = vadd.f32 %v959_v1, %v790_v10  ;;  %v800_v15 = vpop.f32.mrf.mxu0  ;;  %v935_v1 = vadd.f32 %v9176_v20, %v9152_v14  ;;  %v8228_v14 = vld [vmem:[#allocation7 + $0xb8] sm:$0xff] }
 0x287   :  { %v8236_v20 = vld [vmem:[#allocation7 + $0xf8] sm:$0xff]  ;;  %1340 = vmatpush.bf16.msrb.mxu2 %v8228_v14 }
 0x288   :  { %v1027_v24 = vmax.f32 %v9145_v54, %v960_v37  ;;  %v8270_v37 = vld [vmem:[#allocation7 + $0x208] sm:$0xff]  ;;  %8621 = vmatpush.bf16.msrb.mxu3 %v8236_v20 }
 0x289   :  { %2026 = vmatpush.bf16.msra.mxu0 %v8274_v9 }
 0x28a   :  { %v9211_v41 = vpack.c.bf16 %v1027_v24, %v1026_v63  ;;  %v12156_v24 = vmax.f32 %v9049_v28, %v9099_v61  ;;  %v8235_v28 = vld [vmem:[#allocation7 + $0xf0] sm:$0xff]  ;;  %v940_v61 = vadd.f32 %v9185_v36, %v9169_v58  ;;  %v8233_v58 = vld [vmem:[#allocation7 + $0xe0] sm:$0xff] }
 0x28c   :  { %1125 = vmatmul.bf16.gmra.mxu2 %v9211_v41  ;;  %1239 = vmatmul.bf16.gmra.mxu0 %v9211_v41 }
 0x28d   :  { %v962_v42 = vpop.f32.mrf.mxu1  ;;  %8622 = vmatpush.bf16.msrb.mxu3 %v8235_v28 }
 0x28e   :  { %v963_v38 = vadd.f32 %v962_v42, %v793_v17  ;;  %v803_v10 = vpop.f32.mrf.mxu0 }
 0x290   :  { %v1028_v44 = vmax.f32 %v9150_v21, %v963_v38  ;;  %v8273_v21 = vld [vmem:[#allocation7 + $0x220] sm:$0xff] }
 0x291   :  { %2027 = vmatpush.bf16.msra.mxu0 %v8273_v21  ;;  %v8269_v38 = vld [vmem:[#allocation7 + $0x200] sm:$0xff] }
 0x292   :  { %v8225_v21 = vld [vmem:[#allocation7 + $0xa0] sm:$0xff] }
 0x295   :  { %v964_v8 = vpop.f32.mrf.mxu1  ;;  %2028 = vmatpush.bf16.msra.mxu0 %v8272_v48 }
 0x296   :  { %v965_v13 = vadd.f32 %v964_v8, %v795_v51  ;;  %v805_v63 = vpop.f32.mrf.mxu0  ;;  %v1017_v51 = vmax.f32 %v12156_v24, %v935_v1 }
 0x298   :  { %v1029_v22 = vmax.f32 %v9157_v56, %v965_v13 }
 0x299   :  { %2029 = vmatpush.bf16.msra.mxu0 %v8271_v5  ;;  %v12158_v5 = vmax.f32 %v9057_v16, %v9115_v23 }
 0x29a   :  { %v9217_v19 = vpack.c.bf16 %v1029_v22, %v1028_v44  ;;  %v8227_v22 = vld [vmem:[#allocation7 + $0xb0] sm:$0xff] }
 0x29b   :  { %1341 = vmatpush.bf16.msrb.mxu2 %v8227_v22 }
 0x29c   :  { %1130 = vmatmul.bf16.gmra.mxu2 %v9217_v19  ;;  %1244 = vmatmul.bf16.gmra.mxu0 %v9217_v19 }
 0x29d   :  { %v967_v54 = vpop.f32.mrf.mxu1  ;;  %2030 = vmatpush.bf16.msra.mxu0 %v8270_v37 }
 0x29e   :  { %v968_v29 = vadd.f32 %v967_v54, %v798_v7  ;;  %v8234_v54 = vld [vmem:[#allocation7 + $0xe8] sm:$0xff] }
 0x29f   :  { %1342 = vmatpush.bf16.msrb.mxu2 %v8226_v62  ;;  %8623 = vmatpush.bf16.msrb.mxu3 %v8234_v54  ;;  %v8249_v62 = vld [vmem:[#allocation7 + $0x160] sm:$0xff] }
 0x2a0   :  { %v1030_v56 = vmax.f32 %v9162_v26, %v968_v29 }
 0x2a1   :  { %2031 = vmatpush.bf16.msra.mxu0 %v8269_v38 }
 0x2a3   :  { %1343 = vmatpush.bf16.msrb.mxu2 %v8225_v21  ;;  %8624 = vmatpush.bf16.msrb.mxu3 %v8233_v58 }
 0x2a5   :  { %v969_v3 = vpop.f32.mrf.mxu1 }
 0x2a6   :  { %v970_v6 = vadd.f32 %v969_v3, %v800_v15  ;;  %v12157_v15 = vmax.f32 %v9053_v52, %v9107_v39  ;;  %v8232_v52 = vld [vmem:[#allocation7 + $0xd8] sm:$0xff] }
 0x2a7   :  { %8625 = vmatpush.bf16.msrb.mxu3 %v8232_v52 }
 0x2a8   :  { %v1031_v18 = vmax.f32 %v9167_v53, %v970_v6  ;;  %v1019_v9 = vmax.f32 %v12157_v15, %v940_v61  ;;  %v8247_v15 = vld [vmem:[#allocation7 + $0x150] sm:$0xff] }
 0x2aa   :  { %v9223_v0 = vpack.c.bf16 %v1031_v18, %v1030_v56  ;;  %v8231_v56 = vld [vmem:[#allocation7 + $0xd0] sm:$0xff]  ;;  %v8222_v18 = vld [vmem:[#allocation7 + $0x88] sm:$0xff] }
 0x2ab   :  { %8626 = vmatpush.bf16.msrb.mxu3 %v8231_v56 }
 0x2ac   :  { %1135 = vmatmul.bf16.gmra.mxu2 %v9223_v0  ;;  %1249 = vmatmul.bf16.gmra.mxu0 %v9223_v0 }
 0x2ad   :  { %v972_v17 = vpop.f32.mrf.mxu1 }
 0x2ae   :  { %v973_v26 = vadd.f32 %v972_v17, %v803_v10  ;;  %v8230_v10 = vld [vmem:[#allocation7 + $0xc8] sm:$0xff] }
 0x2af   :  { %8627 = vmatpush.bf16.msrb.mxu3 %v8230_v10 }
 0x2b0   :  { %v1032_v8 = vmax.f32 %v9174_v60, %v973_v26 }
 0x2b5   :  { %v974_v53 = vpop.f32.mrf.mxu1 }
 0x2b6   :  { %v975_v42 = vadd.f32 %v974_v53, %v805_v63  ;;  %v8221_v53 = vld [vmem:[#allocation7 + $0x80] sm:$0xff] }
 0x2b8   :  { %v1033_v13 = vmax.f32 %v1017_v51, %v975_v42 }
 0x2ba   :  { %v9233_v7 = vpack.c.bf16 %v1033_v13, %v1032_v8  ;;  %v8252_v13 = vld [vmem:[#allocation7 + $0x178] sm:$0xff] }
 0x2bc   :  { %1140 = vmatmul.bf16.gmra.mxu2 %v9233_v7  ;;  %1254 = vmatmul.bf16.gmra.mxu0 %v9233_v7 }
 0x2bd   :  { %v977_v44 = vpop.f32.mrf.mxu1 }
 0x2be   :  { %v978_v60 = vadd.f32 %v977_v44, %v9019_v31  ;;  %v8224_v31 = vld [vmem:[#allocation7 + $0x98] sm:$0xff] }
 0x2bf   :  { %1344 = vmatpush.bf16.msrb.mxu2 %v8224_v31 }
 0x2c0   :  { %v1034_v3 = vmax.f32 %v9183_v33, %v978_v60  ;;  %v945_v33 = vadd.f32 %v9194_v2, %v9178_v32  ;;  %v8229_v32 = vld [vmem:[#allocation7 + $0xc0] sm:$0xff] }
 0x2c1   :  { %8628 = vmatpush.bf16.msrb.mxu3 %v8229_v32 }
 0x2c2   :  { %v1021_v1 = vmax.f32 %v12158_v5, %v945_v33  ;;  %v8243_v33 = vld [vmem:[#allocation7 + $0x130] sm:$0xff] }
 0x2c5   :  { %v979_v12 = vpop.f32.mrf.mxu1 }
 0x2c6   :  { %v980_v29 = vadd.f32 %v979_v12, %v9021_v35  ;;  %v8223_v35 = vld [vmem:[#allocation7 + $0x90] sm:$0xff] }
 0x2c7   :  { %1345 = vmatpush.bf16.msrb.mxu2 %v8223_v35 }
 0x2c8   :  { %v1035_v6 = vmax.f32 %v1019_v9, %v980_v29  ;;  %v8246_v9 = vld [vmem:[#allocation7 + $0x148] sm:$0xff] }
 0x2ca   :  { %v9245_v36 = vpack.c.bf16 %v1035_v6, %v1034_v3  ;;  %v8245_v6 = vld [vmem:[#allocation7 + $0x140] sm:$0xff] }
 0x2cb   :  { %1346 = vmatpush.bf16.msrb.mxu2 %v8222_v18 }
 0x2cc   :  { %1145 = vmatmul.bf16.gmra.mxu2 %v9245_v36  ;;  %1259 = vmatmul.bf16.gmra.mxu0 %v9245_v36 }
 0x2cd   :  { %v982_v39 = vpop.f32.mrf.mxu1 }
 0x2ce   :  { %v983_v48 = vadd.f32 %v982_v39, %v9023_v46 }
 0x2cf   :  { %1347 = vmatpush.bf16.msrb.mxu2 %v8221_v53 }
 0x2d0   :  { %v1036_v26 = vmax.f32 %v9190_v40, %v983_v48  ;;  %v12159_v40 = vmax.f32 %v9061_v50, %v9123_v49  ;;  %v8241_v48 = vld [vmem:[#allocation7 + $0x120] sm:$0xff] }
 0x2d3   :  { %1454 = vmatpush.bf16.msra.mxu2 %v8236_v20  ;;  %v8251_v20 = vld [vmem:[#allocation7 + $0x170] sm:$0xff] }
 0x2d5   :  { %v984_v17 = vpop.f32.mrf.mxu1 }
 0x2d6   :  { %v985_v37 = vadd.f32 %v984_v17, %v9025_v47  ;;  %v950_v47 = vadd.f32 %v9201_v45, %v9192_v11 }
 0x2d7   :  { %1455 = vmatpush.bf16.msra.mxu2 %v8235_v28  ;;  %v8250_v28 = vld [vmem:[#allocation7 + $0x168] sm:$0xff] }
 0x2d8   :  { %v1037_v63 = vmax.f32 %v1021_v1, %v985_v37  ;;  %v1023_v24 = vmax.f32 %v12159_v40, %v950_v47  ;;  %v8240_v1 = vld [vmem:[#allocation7 + $0x118] sm:$0xff]  ;;  %v8239_v37 = vld [vmem:[#allocation7 + $0x110] sm:$0xff]  ;;  %v8237_v47 = vld [vmem:[#allocation7 + $0x100] sm:$0xff] }
 0x2da   :  { %v9257_v2 = vpack.c.bf16 %v1037_v63, %v1036_v26 }
 0x2db   :  { %1456 = vmatpush.bf16.msra.mxu2 %v8234_v54  ;;  %v8248_v54 = vld [vmem:[#allocation7 + $0x158] sm:$0xff] }
 0x2dc   :  { %1150 = vmatmul.bf16.gmra.mxu2 %v9257_v2  ;;  %1264 = vmatmul.bf16.vlgmr.msra.gmra.mxu3 %v9257_v2 }
 0x2dd   :  { %2032 = vmatmul.bf16.vlgmr.msra.gmra.mxu0 %v9205_v25  ;;  %v987_v46 = vpop.f32.mrf.mxu1  ;;  %1682 = vmatpush.bf16.msra.mxu3 %v8252_v13 }
 0x2de   :  { %v988_v16 = vadd.f32 %v987_v46, %v9027_v57 }
 0x2df   :  { %1457 = vmatpush.bf16.msra.mxu2 %v8233_v58 }
 0x2e0   :  { %v1038_v42 = vmax.f32 %v9199_v27, %v988_v16 }
 0x2e1   :  { %1683 = vmatpush.bf16.msra.mxu3 %v8251_v20  ;;  %v8259_v20 = vld [vmem:[#allocation7 + $0x1b0] sm:$0xff] }
 0x2e3   :  { %1458 = vmatpush.bf16.msra.mxu2 %v8232_v52 }
 0x2e5   :  { %v989_v23 = vpop.f32.mrf.mxu1  ;;  %1684 = vmatpush.bf16.msra.mxu3 %v8250_v28 }
 0x2e6   :  { %v990_v51 = vadd.f32 %v989_v23, %v9029_v59 }
 0x2e7   :  { %1459 = vmatpush.bf16.msra.mxu2 %v8231_v56  ;;  %v8244_v56 = vld [vmem:[#allocation7 + $0x138] sm:$0xff] }
 0x2e8   :  { %v1039_v38 = vmax.f32 %v1023_v24, %v990_v51 }
 0x2e9   :  { %1685 = vmatpush.bf16.msra.mxu3 %v8249_v62 }
 0x2ea   :  { %v9270_v8 = vpack.c.bf16 %v1039_v38, %v1038_v42  ;;  %v8260_v38 = vld [vmem:[#allocation7 + $0x1b8] sm:$0xff] }
 0x2eb   :  { %1460 = vmatpush.bf16.msra.mxu2 %v8230_v10  ;;  %v8242_v10 = vld [vmem:[#allocation7 + $0x128] sm:$0xff] }
 0x2ec   :  { %1155 = vmatmul.bf16.gmra.mxu2 %v9270_v8  ;;  %1269 = vmatmul.bf16.gmra.mxu3 %v9270_v8 }
 0x2ed   :  { %2037 = vmatmul.bf16.gmra.mxu0 %v9211_v41  ;;  %1686 = vmatpush.bf16.msra.mxu3 %v8248_v54 }
 0x2ef   :  { %1461 = vmatpush.bf16.msra.mxu2 %v8229_v32  ;;  %v8238_v32 = vld [vmem:[#allocation7 + $0x108] sm:$0xff] }
 0x2f1   :  { %1687 = vmatpush.bf16.msra.mxu3 %v8247_v15 }
 0x2f5   :  { %1688 = vmatpush.bf16.msra.mxu3 %v8246_v9  ;;  %v8258_v9 = vld [vmem:[#allocation7 + $0x1a8] sm:$0xff] }
 0x2f9   :  { %v9275_v57 = vpop.f32.mrf.mxu0  ;;  %1689 = vmatpush.bf16.msra.mxu3 %v8245_v6 }
 0x2fc   :  { %1348 = vmatmul.bf16.vlgmr.msrb.gmra.mxu2 %v9205_v25  ;;  %1477 = vmatmul.bf16.vlgmr.msrb.gmra.mxu3 %v9223_v0 }
 0x2fd   :  { %2042 = vmatmul.bf16.gmra.mxu0 %v9217_v19  ;;  %1568 = vmatpush.bf16.msrb.mxu2 %v8244_v56  ;;  %v8257_v56 = vld [vmem:[#allocation7 + $0x1a0] sm:$0xff] }
 0x2ff   :  { %v9280_v59 = vpop.f32.mrf.mxu2 }
 0x301   :  { %v9282_v50 = vpop.f32.mrf.mxu0  ;;  %1569 = vmatpush.bf16.msrb.mxu2 %v8243_v33 }
 0x302   :  { %v2081_v49 = vpack.c.bf16 %v9282_v50, %v9275_v57  ;;  %v6923_v50 = vld [vmem:[%s12114_s4 + $0xd8] sm:$0xf] }
 0x305   :  { %1570 = vmatpush.bf16.msrb.mxu2 %v8242_v10 }
 0x307   :  { %v9286_v11 = vpop.f32.mrf.mxu2 }
 0x308   :  { %v2073_v27 = vpack.c.bf16 %v9286_v11, %v9280_v59 }
 0x309   :  { %v9290_v45 = vpop.f32.mrf.mxu0  ;;  %1571 = vmatpush.bf16.msrb.mxu2 %v8241_v48 }
 0x30c   :  { %1353 = vmatmul.bf16.gmra.mxu2 %v9211_v41  ;;  %1482 = vmatmul.bf16.gmra.mxu3 %v9233_v7 }
 0x30d   :  { %2047 = vmatmul.bf16.gmra.mxu0 %v9223_v0  ;;  %1572 = vmatpush.bf16.msrb.mxu2 %v8240_v1 }
 0x30f   :  { %v9295_v14 = vpop.f32.mrf.mxu2 }
 0x311   :  { %v9297_v44 = vpop.f32.mrf.mxu0  ;;  %1573 = vmatpush.bf16.msrb.mxu2 %v8239_v37 }
 0x312   :  { %v2082_v22 = vpack.c.bf16 %v9297_v44, %v9290_v45 }
 0x315   :  { %1574 = vmatpush.bf16.msrb.mxu2 %v8238_v32  ;;  %v8253_v32 = vld [vmem:[#allocation7 + $0x180] sm:$0xff] }
 0x317   :  { %v9301_v61 = vpop.f32.mrf.mxu2 }
 0x318   :  { %v2074_v60 = vpack.c.bf16 %v9301_v61, %v9295_v14  ;;  %v8264_v61 = vld [vmem:[#allocation7 + $0x1d8] sm:$0xff] }
 0x319   :  { %v9337_v46 = vpop.f32.mrf.mxu0  ;;  %1575 = vmatpush.bf16.msrb.mxu2 %v8237_v47  ;;  %v8265_v47 = vld [vmem:[#allocation7 + $0x1e0] sm:$0xff] }
 0x31c   :  { %1358 = vmatmul.bf16.gmra.mxu2 %v9217_v19  ;;  %1487 = vmatmul.bf16.gmra.mxu3 %v9245_v36 }
 0x31d   :  { %2052 = vmatmul.bf16.gmra.mxu0 %v9233_v7 }
 0x31f   :  { %v9308_v12 = vpop.f32.mrf.mxu2 }
 0x321   :  { %v9343_v40 = vpop.f32.mrf.mxu0 }
 0x327   :  { %v9310_v29 = vpop.f32.mrf.mxu2 }
 0x328   :  { %v2075_v3 = vpack.c.bf16 %v9310_v29, %v9308_v12 }
 0x329   :  { %v9349_v28 = vpop.f32.mrf.mxu0 }
 0x32c   :  { %1363 = vmatmul.bf16.gmra.mxu2 %v9223_v0  ;;  %1492 = vmatmul.bf16.gmra.mxu3 %v9257_v2 }
 0x32d   :  { %2057 = vmatmul.bf16.gmra.mxu0 %v9245_v36 }
 0x32f   :  { %v9317_v21 = vpop.f32.mrf.mxu2 }
 0x331   :  { %v9359_v48 = vpop.f32.mrf.mxu0 }
 0x337   :  { %v9319_v58 = vpop.f32.mrf.mxu2 }
 0x338   :  { %v2076_v31 = vpack.c.bf16 %v9319_v58, %v9317_v21  ;;  %v8254_v21 = vld [vmem:[#allocation7 + $0x188] sm:$0xff] }
 0x339   :  { %v1255_v58 = vpop.f32.mrf.mxu0 }
 0x33c   :  { %1368 = vmatmul.bf16.gmra.mxu2 %v9233_v7  ;;  %1497 = vmatmul.bf16.gmra.mxu3 %v9270_v8 }
 0x33d   :  { %2062 = vmatmul.bf16.gmra.mxu0 %v9257_v2 }
 0x33f   :  { %v1141_v52 = vpop.f32.mrf.mxu2 }
 0x341   :  { %v1257_v14 = vpop.f32.mrf.mxu0 }
 0x347   :  { %v1143_v39 = vpop.f32.mrf.mxu2 }
 0x348   :  { %v2077_v6 = vpack.c.bf16 %v1143_v39, %v1141_v52  ;;  %v8268_v52 = vld [vmem:[#allocation7 + $0x1f8] sm:$0xff]  ;;  %v8255_v39 = vld [vmem:[#allocation7 + $0x190] sm:$0xff] }
 0x349   :  { %1910 = vmatpush.bf16.msrb.mxu3 %v8268_v52 }
 0x34c   :  { %1373 = vmatmul.bf16.gmra.mxu2 %v9245_v36  ;;  %1690 = vmatmul.bf16.vlgmr.msra.gmra.mxu3 %v9205_v25 }
 0x34d   :  { %2067 = vmatmul.bf16.gmra.mxu0 %v9270_v8 }
 0x34f   :  { %v1146_v35 = vpop.f32.mrf.mxu2 }
 0x357   :  { %v1148_v18 = vpop.f32.mrf.mxu2 }
 0x358   :  { %v2078_v15 = vpack.c.bf16 %v1148_v18, %v1146_v35  ;;  %v8256_v35 = vld [vmem:[#allocation7 + $0x198] sm:$0xff] }
 0x35c   :  { %1378 = vmatmul.bf16.gmra.mxu2 %v9257_v2  ;;  %1695 = vmatmul.bf16.gmra.mxu3 %v9211_v41 }
 0x35f   :  { %v1151_v17 = vpop.f32.mrf.mxu2  ;;  %v9331_v5 = vpop.f32.mrf.mxu3 }
 0x367   :  { %v1153_v26 = vpop.f32.mrf.mxu2  ;;  %v9333_v63 = vpop.f32.mrf.mxu3 }
 0x368   :  { %v2087_v53 = vpack.c.bf16 %v9333_v63, %v9331_v5  ;;  %v2079_v13 = vpack.c.bf16 %v1153_v26, %v1151_v17  ;;  %v8267_v26 = vld [vmem:[#allocation7 + $0x1f0] sm:$0xff]  ;;  %v2084_v5 = vpack.c.bf16 %v9359_v48, %v9349_v28  ;;  %v2083_v63 = vpack.c.bf16 %v9343_v40, %v9337_v46 }
 0x369   :  { %1911 = vmatpush.bf16.msrb.mxu3 %v8267_v26  ;;  %v2085_v26 = vpack.c.bf16 %v1257_v14, %v1255_v58  ;;  %v6887_v28 = vld [vmem:[%s12114_s4 + $0x90] sm:$0xf]  ;;  %v8299_v48 = vld [vmem:[%s12114_s4 + $0xb0] sm:$0xf0] }
 0x36a   :  { %v6888_v46 = vor.u32 %v8299_v48, %v6887_v28 }
 0x36c   :  { %1383 = vmatmul.bf16.gmra.mxu2 %v9270_v8  ;;  %1700 = vmatmul.bf16.gmra.mxu3 %v9217_v19 }
 0x36f   :  { %v1156_v16 = vpop.f32.mrf.mxu2  ;;  %v9341_v23 = vpop.f32.mrf.mxu3 }
 0x377   :  { %v1158_v24 = vpop.f32.mrf.mxu2  ;;  %v9345_v51 = vpop.f32.mrf.mxu3 }
 0x378   :  { %v2080_v42 = vpack.c.bf16 %v1158_v24, %v1156_v16  ;;  %v1260_v16 = vpop.f32.mrf.mxu0 }
 0x37a   :  { %3046 = vmatpush.bf16.msra.mxu1 %v2080_v42 }
 0x37c   :  { %1462 = vmatmul.bf16.vlgmr.msra.gmra.mxu2 %v9205_v25  ;;  %1705 = vmatmul.bf16.gmra.mxu3 %v9223_v0 }
 0x37d   :  { %1796 = vmatpush.bf16.msra.mxu2 %v8260_v38  ;;  %v6815_v38 = vld [vmem:[%s12114_s4] sm:$0xf] }
 0x37e   :  { %3047 = vmatpush.bf16.msra.mxu1 %v2079_v13  ;;  %v8281_v13 = vld [vmem:[%s12114_s4 + $0x20] sm:$0xf0] }
 0x37f   :  { %v9351_v62 = vpop.f32.mrf.mxu2  ;;  %v9353_v54 = vpop.f32.mrf.mxu3 }
 0x380   :  { %v1262_v52 = vpop.f32.mrf.mxu0 }
 0x381   :  { %1797 = vmatpush.bf16.msra.mxu2 %v8259_v20 }
 0x382   :  { %3048 = vmatpush.bf16.msra.mxu1 %v2078_v15  ;;  %v8261_v15 = vld [vmem:[#allocation7 + $0x1c0] sm:$0xff] }
 0x385   :  { %1798 = vmatpush.bf16.msra.mxu2 %v8258_v9  ;;  %v6816_v9 = vor.u32 %v8281_v13, %v6815_v38 }
 0x386   :  { %3049 = vmatpush.bf16.msra.mxu1 %v2077_v6  ;;  %v2088_v6 = vpack.c.bf16 %v9345_v51, %v9341_v23  ;;  %v6851_v23 = vld [vmem:[%s12114_s4 + $0x48] sm:$0xf]  ;;  %v8290_v51 = vld [vmem:[%s12114_s4 + $0x68] sm:$0xf0] }
 0x387   :  { %v9355_v33 = vpop.f32.mrf.mxu2  ;;  %v9357_v10 = vpop.f32.mrf.mxu3 }
 0x388   :  { %v2089_v17 = vpack.c.bf16 %v9355_v33, %v9351_v62  ;;  %v2100_v1 = vpack.c.bf16 %v9357_v10, %v9353_v54  ;;  %v8317_v54 = vld [vmem:[%s12114_s4 + $0x140] sm:$0xf0] }
 0x389   :  { %1799 = vmatpush.bf16.msra.mxu2 %v8257_v56 }
 0x38a   :  { %3050 = vmatpush.bf16.msra.mxu1 %v2076_v31  ;;  %v8266_v31 = vld [vmem:[#allocation7 + $0x1e8] sm:$0xff] }
 0x38b   :  { %1912 = vmatpush.bf16.msrb.mxu3 %v8266_v31 }
 0x38c   :  { %1467 = vmatmul.bf16.gmra.mxu2 %v9211_v41  ;;  %1710 = vmatmul.bf16.gmra.mxu3 %v9233_v7 }
 0x38d   :  { %1800 = vmatpush.bf16.msra.mxu2 %v8256_v35 }
 0x38e   :  { %3051 = vmatpush.bf16.msra.mxu1 %v2075_v3 }
 0x38f   :  { %v9373_v18 = vpop.f32.mrf.mxu2  ;;  %v9375_v37 = vpop.f32.mrf.mxu3  ;;  %1913 = vmatpush.bf16.msrb.mxu3 %v8265_v47  ;;  %v6852_v47 = vor.u32 %v8290_v51, %v6851_v23 }
 0x391   :  { %1801 = vmatpush.bf16.msra.mxu2 %v8255_v39  ;;  %v2086_v39 = vpack.c.bf16 %v1262_v52, %v1260_v16 }
 0x392   :  { %3052 = vmatpush.bf16.msra.mxu1 %v2074_v60  ;;  %v8262_v60 = vld [vmem:[#allocation7 + $0x1c8] sm:$0xff] }
 0x393   :  { %1914 = vmatpush.bf16.msrb.mxu3 %v8264_v61 }
 0x395   :  { %1802 = vmatpush.bf16.msra.mxu2 %v8254_v21 }
 0x396   :  { %3053 = vmatpush.bf16.msra.mxu1 %v2073_v27  ;;  %v8263_v27 = vld [vmem:[#allocation7 + $0x1d0] sm:$0xff] }
 0x397   :  { %v9383_v12 = vpop.f32.mrf.mxu2  ;;  %v9385_v29 = vpop.f32.mrf.mxu3  ;;  %1915 = vmatpush.bf16.msrb.mxu3 %v8263_v27 }
 0x398   :  { %v2090_v3 = vpack.c.bf16 %v9383_v12, %v9373_v18  ;;  %v7103_v12 = vld [vmem:[%s12114_s4 + $0x240] sm:$0xf] }
 0x399   :  { %1803 = vmatpush.bf16.msra.mxu2 %v8253_v32  ;;  %3054 = vmatmul.bf16.vlgmr.msra.gmra.mxu1 %v6816_v9 }
 0x39b   :  { %1916 = vmatpush.bf16.msrb.mxu3 %v8262_v60  ;;  %v2101_v60 = vpack.c.bf16 %v9385_v29, %v9375_v37 }
 0x39c   :  { %1472 = vmatmul.bf16.gmra.mxu2 %v9217_v19  ;;  %1715 = vmatmul.bf16.gmra.mxu3 %v9245_v36 }
 0x39f   :  { %v9391_v59 = vpop.f32.mrf.mxu2  ;;  %v1488_v11 = vpop.f32.mrf.mxu3  ;;  %1917 = vmatpush.bf16.msrb.mxu3 %v8261_v15  ;;  %v6959_v15 = vld [vmem:[%s12114_s4 + $0x120] sm:$0xf] }
 0x3a7   :  { %v9393_v24 = vpop.f32.mrf.mxu2  ;;  %v1490_v42 = vpop.f32.mrf.mxu3 }
 0x3a8   :  { %v2091_v20 = vpack.c.bf16 %v9393_v24, %v9391_v59  ;;  %v2102_v40 = vpack.c.bf16 %v1490_v42, %v1488_v11  ;;  %v8344_v59 = vld [vmem:[%s12114_s4 + $0x218] sm:$0xf0] }
 0x3a9   :  { %3059 = vmatmul.bf16.gmra.mxu1 %v6852_v47 }
 0x3ac   :  { %1576 = vmatmul.bf16.vlgmr.msrb.gmra.mxu2 %v9205_v25  ;;  %1720 = vmatmul.bf16.gmra.mxu3 %v9257_v2 }
 0x3ad   :  { %3135 = vmatpush.bf16.msrb.mxu2 %v2088_v6 }
 0x3af   :  { %v9407_v56 = vpop.f32.mrf.mxu2  ;;  %v1493_v35 = vpop.f32.mrf.mxu3 }
 0x3b1   :  { %3136 = vmatpush.bf16.msrb.mxu2 %v2087_v53 }
 0x3b5   :  { %3137 = vmatpush.bf16.msrb.mxu2 %v2086_v39  ;;  %v6995_v39 = vld [vmem:[%s12114_s4 + $0x168] sm:$0xf] }
 0x3b7   :  { %v9412_v21 = vpop.f32.mrf.mxu2  ;;  %v1495_v31 = vpop.f32.mrf.mxu3 }
 0x3b8   :  { %v2092_v32 = vpack.c.bf16 %v9412_v21, %v9407_v56  ;;  %v2103_v45 = vpack.c.bf16 %v1495_v31, %v1493_v35 }
 0x3b9   :  { %3138 = vmatpush.bf16.msrb.mxu2 %v2085_v26  ;;  %3064 = vmatmul.bf16.gmra.mxu1 %v6888_v46  ;;  %v8326_v26 = vld [vmem:[%s12114_s4 + $0x188] sm:$0xf0]  ;;  %v8335_v46 = vld [vmem:[%s12114_s4 + $0x1d0] sm:$0xf0] }
 0x3ba   :  { %v6996_v51 = vor.u32 %v8326_v26, %v6995_v39 }
 0x3bc   :  { %1581 = vmatmul.bf16.gmra.mxu2 %v9211_v41  ;;  %1725 = vmatmul.bf16.gmra.mxu3 %v9270_v8 }
 0x3bd   :  { %3139 = vmatpush.bf16.msrb.mxu2 %v2084_v5 }
 0x3bf   :  { %v9428_v53 = vpop.f32.mrf.mxu2  ;;  %v1498_v58 = vpop.f32.mrf.mxu3 }
 0x3c1   :  { %3140 = vmatpush.bf16.msrb.mxu2 %v2083_v63 }
 0x3c5   :  { %3141 = vmatpush.bf16.msrb.mxu2 %v2082_v22 }
 0x3c7   :  { %v1371_v14 = vpop.f32.mrf.mxu2  ;;  %v1500_v61 = vpop.f32.mrf.mxu3 }
 0x3c8   :  { %v2104_v27 = vpack.c.bf16 %v1500_v61, %v1498_v58  ;;  %v2093_v61 = vpack.c.bf16 %v1371_v14, %v9428_v53 }
 0x3c9   :  { %3142 = vmatpush.bf16.msrb.mxu2 %v2081_v49  ;;  %v8308_v49 = vld [vmem:[%s12114_s4 + $0xf8] sm:$0xf0] }
 0x3ca   :  { %3313 = vmatpush.bf16.msrb.mxu0 %v2104_v27  ;;  %v6924_v11 = vor.u32 %v8308_v49, %v6923_v50  ;;  %v7031_v27 = vld [vmem:[%s12114_s4 + $0x1b0] sm:$0xf] }
 0x3cc   :  { %1586 = vmatmul.bf16.gmra.mxu2 %v9217_v19  ;;  %1918 = vmatmul.bf16.vlgmr.msrb.gmra.mxu3 %v9205_v25 }
 0x3cd   :  { %3069 = vmatmul.bf16.gmra.mxu1 %v6924_v11 }
 0x3ce   :  { %3314 = vmatpush.bf16.msrb.mxu0 %v2103_v45 }
 0x3cf   :  { %v1374_v44 = vpop.f32.mrf.mxu2  ;;  %v9444_v22 = vpop.f32.mrf.mxu3 }
 0x3d2   :  { %3315 = vmatpush.bf16.msrb.mxu0 %v2102_v40  ;;  %v7032_v40 = vor.u32 %v8335_v46, %v7031_v27  ;;  %v7355_v27 = vld [vmem:[%s12114_s4 + $0x438] sm:$0xf] }
 0x3d6   :  { %3316 = vmatpush.bf16.msrb.mxu0 %v2101_v60 }
 0x3d7   :  { %v1376_v16 = vpop.f32.mrf.mxu2  ;;  %v9448_v57 = vpop.f32.mrf.mxu3 }
 0x3d8   :  { %v2113_v38 = vpack.c.bf16 %v9448_v57, %v9444_v22  ;;  %v2094_v58 = vpack.c.bf16 %v1376_v16, %v1374_v44  ;;  %v9538_v16 = vpop.f32.mrf.mxu0 }
 0x3da   :  { %3317 = vmatpush.bf16.msrb.mxu0 %v2100_v1  ;;  %v6960_v1 = vor.u32 %v8317_v54, %v6959_v15 }
 0x3dc   :  { %1591 = vmatmul.bf16.gmra.mxu2 %v9223_v0  ;;  %1923 = vmatmul.bf16.gmra.mxu3 %v9211_v41 }
 0x3dd   :  { %3074 = vmatmul.bf16.gmra.mxu1 %v6960_v1 }
 0x3df   :  { %v1379_v37 = vpop.f32.mrf.mxu2  ;;  %v9463_v29 = vpop.f32.mrf.mxu3 }
 0x3e0   :  { %v9546_v15 = vpop.f32.mrf.mxu0 }
 0x3e7   :  { %v1381_v42 = vpop.f32.mrf.mxu2  ;;  %v9465_v13 = vpop.f32.mrf.mxu3 }
 0x3e8   :  { %v2114_v10 = vpack.c.bf16 %v9465_v13, %v9463_v29  ;;  %v2095_v47 = vpack.c.bf16 %v1381_v42, %v1379_v37 }
 0x3ec   :  { %1596 = vmatmul.bf16.gmra.mxu2 %v9233_v7  ;;  %1928 = vmatmul.bf16.gmra.mxu3 %v9217_v19 }
 0x3ed   :  { %3079 = vmatmul.bf16.gmra.mxu1 %v6996_v51 }
 0x3ef   :  { %v1384_v9 = vpop.f32.mrf.mxu2  ;;  %v9477_v6 = vpop.f32.mrf.mxu3 }
 0x3f7   :  { %v1386_v35 = vpop.f32.mrf.mxu2  ;;  %v9479_v52 = vpop.f32.mrf.mxu3 }
 0x3f8   :  { %v2096_v31 = vpack.c.bf16 %v1386_v35, %v1384_v9  ;;  %v2115_v23 = vpack.c.bf16 %v9479_v52, %v9477_v6  ;;  %v7139_v9 = vld [vmem:[%s12114_s4 + $0x288] sm:$0xf]  ;;  %v7247_v6 = vld [vmem:[%s12114_s4 + $0x360] sm:$0xf]  ;;  %v8389_v52 = vld [vmem:[%s12114_s4 + $0x380] sm:$0xf0] }
 0x3f9   :  { %v7248_v22 = vor.u32 %v8389_v52, %v7247_v6 }
 0x3fa   :  { %3224 = vmatpush.bf16.msra.mxu3 %v2096_v31 }
 0x3fc   :  { %1601 = vmatmul.bf16.gmra.mxu2 %v9245_v36  ;;  %1933 = vmatmul.bf16.gmra.mxu3 %v9223_v0 }
 0x3fd   :  { %3084 = vmatmul.bf16.gmra.mxu1 %v7032_v40 }
 0x3fe   :  { %3225 = vmatpush.bf16.msra.mxu3 %v2095_v47  ;;  %v9564_v47 = vpop.f32.mrf.mxu0 }
 0x3ff   :  { %v1463_v5 = vpop.f32.mrf.mxu2  ;;  %v9491_v63 = vpop.f32.mrf.mxu3 }
 0x402   :  { %3226 = vmatpush.bf16.msra.mxu3 %v2094_v58 }
 0x406   :  { %3227 = vmatpush.bf16.msra.mxu3 %v2093_v61 }
 0x407   :  { %v1465_v28 = vpop.f32.mrf.mxu2  ;;  %v9494_v48 = vpop.f32.mrf.mxu3 }
 0x408   :  { %v2116_v45 = vpack.c.bf16 %v9494_v48, %v9491_v63  ;;  %v2097_v37 = vpack.c.bf16 %v1465_v28, %v1463_v5  ;;  %v7175_v28 = vld [vmem:[%s12114_s4 + $0x2d0] sm:$0xf] }
 0x40a   :  { %3228 = vmatpush.bf16.msra.mxu3 %v2092_v32  ;;  %v7067_v32 = vld [vmem:[%s12114_s4 + $0x1f8] sm:$0xf] }
 0x40b   :  { %v7068_v24 = vor.u32 %v8344_v59, %v7067_v32 }
 0x40c   :  { %1606 = vmatmul.bf16.gmra.mxu2 %v9257_v2  ;;  %1938 = vmatmul.bf16.gmra.mxu3 %v9233_v7 }
 0x40d   :  { %3089 = vmatmul.bf16.gmra.mxu1 %v7068_v24 }
 0x40e   :  { %3229 = vmatpush.bf16.msra.mxu3 %v2091_v20 }
 0x40f   :  { %v1468_v53 = vpop.f32.mrf.mxu2  ;;  %v9512_v14 = vpop.f32.mrf.mxu3 }
 0x412   :  { %3230 = vmatpush.bf16.msra.mxu3 %v2090_v3  ;;  %v8353_v3 = vld [vmem:[%s12114_s4 + $0x260] sm:$0xf0] }
 0x413   :  { %v7104_v60 = vor.u32 %v8353_v3, %v7103_v12 }
 0x416   :  { %3231 = vmatpush.bf16.msra.mxu3 %v2089_v17  ;;  %v9536_v44 = vpop.f32.mrf.mxu1 }
 0x417   :  { %v1470_v56 = vpop.f32.mrf.mxu2  ;;  %v9520_v21 = vpop.f32.mrf.mxu3 }
 0x418   :  { %v2098_v50 = vpack.c.bf16 %v1470_v56, %v1468_v53  ;;  %v9580_v56 = vpop.f32.mrf.mxu0  ;;  %v2117_v3 = vpack.c.bf16 %v9520_v21, %v9512_v14 }
 0x41c   :  { %1611 = vmatmul.bf16.gmra.mxu2 %v9270_v8  ;;  %1943 = vmatmul.bf16.gmra.mxu3 %v9245_v36 }
 0x41d   :  { %3094 = vmatmul.bf16.gmra.mxu1 %v7104_v60 }
 0x41e   :  { %v9544_v42 = vpop.f32.mrf.mxu1 }
 0x41f   :  { %v1473_v18 = vpop.f32.mrf.mxu2  ;;  %v1716_v62 = vpop.f32.mrf.mxu3 }
 0x420   :  { %v9589_v12 = vpop.f32.mrf.mxu0 }
 0x426   :  { %v9558_v39 = vpop.f32.mrf.mxu1 }
 0x427   :  { %v1475_v33 = vpop.f32.mrf.mxu2  ;;  %v1718_v17 = vpop.f32.mrf.mxu3 }
 0x428   :  { %v2099_v20 = vpack.c.bf16 %v1475_v33, %v1473_v18  ;;  %v2118_v18 = vpack.c.bf16 %v1718_v17, %v1716_v62  ;;  %v8380_v62 = vld [vmem:[%s12114_s4 + $0x338] sm:$0xf0]  ;;  %v9611_v14 = vpop.f32.mrf.mxu0 }
 0x429   :  { %v8416_v17 = vld [vmem:[%s12114_s4 + $0x458] sm:$0xf0] }
 0x42a   :  { %3318 = vmatpush.bf16.msrb.mxu0 %v2099_v20 }
 0x42c   :  { %1804 = vmatmul.bf16.vlgmr.msra.gmra.mxu2 %v9205_v25  ;;  %1948 = vmatmul.bf16.gmra.mxu3 %v9257_v2  ;;  %v8362_v25 = vld [vmem:[%s12114_s4 + $0x2a8] sm:$0xf0] }
 0x42d   :  { %v7140_v26 = vor.u32 %v8362_v25, %v7139_v9  ;;  %v7283_v25 = vld [vmem:[%s12114_s4 + $0x3a8] sm:$0xf] }
 0x42e   :  { %3319 = vmatpush.bf16.msrb.mxu0 %v2098_v50  ;;  %v9566_v5 = vpop.f32.mrf.mxu1 }
 0x42f   :  { %v9542_v49 = vpop.f32.mrf.mxu2  ;;  %v1721_v11 = vpop.f32.mrf.mxu3  ;;  %3099 = vmatmul.bf16.gmra.mxu1 %v7140_v26 }
 0x432   :  { %3320 = vmatpush.bf16.msrb.mxu0 %v2097_v37 }
 0x436   :  { %v9578_v40 = vpop.f32.mrf.mxu1 }
 0x437   :  { %v9548_v54 = vpop.f32.mrf.mxu2  ;;  %v1723_v1 = vpop.f32.mrf.mxu3 }
 0x438   :  { %v2119_v32 = vpack.c.bf16 %v1723_v1, %v1721_v11 }
 0x43c   :  { %1809 = vmatmul.bf16.gmra.mxu2 %v9211_v41  ;;  %1953 = vmatmul.bf16.gmra.mxu3 %v9270_v8  ;;  %v8371_v41 = vld [vmem:[%s12114_s4 + $0x2f0] sm:$0xf0] }
 0x43d   :  { %v7176_v53 = vor.u32 %v8371_v41, %v7175_v28 }
 0x43e   :  { %v9587_v33 = vpop.f32.mrf.mxu1 }
 0x43f   :  { %v9562_v31 = vpop.f32.mrf.mxu2  ;;  %v1726_v51 = vpop.f32.mrf.mxu3  ;;  %3104 = vmatmul.bf16.gmra.mxu1 %v7176_v53  ;;  %v6823_v53 = vld [vmem:[%s12114_s4 + $0x8] sm:$0xf] }
 0x447   :  { %v9568_v58 = vpop.f32.mrf.mxu2  ;;  %v1728_v61 = vpop.f32.mrf.mxu3 }
 0x448   :  { %v2120_v46 = vpack.c.bf16 %v1728_v61, %v1726_v51 }
 0x44a   :  { %3491 = vmatpush.bf16.msra.mxu2 %v2120_v46  ;;  %v9605_v50 = vpop.f32.mrf.mxu1 }
 0x44c   :  { %1814 = vmatmul.bf16.gmra.mxu2 %v9217_v19  ;;  %v7211_v19 = vld [vmem:[%s12114_s4 + $0x318] sm:$0xf] }
 0x44d   :  { %v7212_v11 = vor.u32 %v8380_v62, %v7211_v19  ;;  %v7319_v62 = vld [vmem:[%s12114_s4 + $0x3f0] sm:$0xf] }
 0x44e   :  { %3492 = vmatpush.bf16.msra.mxu2 %v2119_v32  ;;  %v8282_v32 = vld [vmem:[%s12114_s4 + $0x28] sm:$0xf0] }
 0x44f   :  { %v9583_v59 = vpop.f32.mrf.mxu2  ;;  %v9585_v24 = vpop.f32.mrf.mxu3  ;;  %3109 = vmatmul.bf16.gmra.mxu1 %v7212_v11  ;;  %v8407_v11 = vld [vmem:[%s12114_s4 + $0x410] sm:$0xf0] }
 0x450   :  { %v7320_v52 = vor.u32 %v8407_v11, %v7319_v62  ;;  %v8291_v62 = vld [vmem:[%s12114_s4 + $0x70] sm:$0xf0] }
 0x452   :  { %3493 = vmatpush.bf16.msra.mxu2 %v2118_v18  ;;  %v9620_v1 = vpop.f32.mrf.mxu1  ;;  %v6824_v18 = vor.u32 %v8282_v32, %v6823_v53  ;;  %v8278_v53 = vld [vmem:[%s12114_s4 + $0xc] sm:$0xf]  ;;  %v6825_v32 = vld [vmem:[%s12114_s4 + $0x2c] sm:$0xf0] }
 0x453   :  { %12160 = vst [vmem:[#allocation27_spill] sm:$0xff] %v9620_v1 }
 0x454   :  { %3232 = vmatmul.bf16.vlgmr.msra.gmra.mxu3 %v6824_v18  ;;  %v6859_v18 = vld [vmem:[%s12114_s4 + $0x50] sm:$0xf] }
 0x455   :  { %v6860_v11 = vor.u32 %v8291_v62, %v6859_v18 }
 0x456   :  { %3494 = vmatpush.bf16.msra.mxu2 %v2117_v3 }
 0x457   :  { %v9593_v20 = vpop.f32.mrf.mxu2  ;;  %v9595_v60 = vpop.f32.mrf.mxu3 }
 0x45a   :  { %3495 = vmatpush.bf16.msra.mxu2 %v2116_v45  ;;  %v9642_v13 = vpop.f32.mrf.mxu1 }
 0x45b   :  { %12161 = vst [vmem:[#allocation28_spill] sm:$0xff] %v9642_v13 }
 0x45c   :  { %1819 = vmatmul.bf16.gmra.mxu2 %v9223_v0 }
 0x45e   :  { %3496 = vmatpush.bf16.msra.mxu2 %v2115_v23  ;;  %v9638_v23 = vpop.f32.mrf.mxu0 }
 0x45f   :  { %v9616_v21 = vpop.f32.mrf.mxu2  ;;  %v9618_v37 = vpop.f32.mrf.mxu3  ;;  %3114 = vmatmul.bf16.gmra.mxu1 %v7248_v22 }
 0x462   :  { %3497 = vmatpush.bf16.msra.mxu2 %v2114_v10  ;;  %v9649_v10 = vpop.f32.mrf.mxu1 }
 0x463   :  { %12162 = vst [vmem:[#allocation29_spill] sm:$0xff] %v9649_v10 }
 0x464   :  { %3237 = vmatmul.bf16.gmra.mxu3 %v6860_v11  ;;  %v8287_v11 = vld [vmem:[%s12114_s4 + $0x54] sm:$0xf] }
 0x466   :  { %3498 = vmatpush.bf16.msra.mxu2 %v2113_v38  ;;  %v9651_v48 = vpop.f32.mrf.mxu0 }
 0x467   :  { %v9628_v0 = vpop.f32.mrf.mxu2  ;;  %v9630_v63 = vpop.f32.mrf.mxu3 }
 0x46a   :  { %v9663_v26 = vpop.f32.mrf.mxu1 }
 0x46b   :  { %12163 = vst [vmem:[#allocation30_spill] sm:$0xff] %v9663_v26 }
 0x46c   :  { %1824 = vmatmul.bf16.gmra.mxu2 %v9233_v7  ;;  %v8398_v7 = vld [vmem:[%s12114_s4 + $0x3c8] sm:$0xf0] }
 0x46d   :  { %v7284_v51 = vor.u32 %v8398_v7, %v7283_v25 }
 0x46e   :  { %v9665_v61 = vpop.f32.mrf.mxu0 }
 0x46f   :  { %v9645_v57 = vpop.f32.mrf.mxu2  ;;  %v9647_v38 = vpop.f32.mrf.mxu3  ;;  %3119 = vmatmul.bf16.gmra.mxu1 %v7284_v51 }
 0x472   :  { %v9672_v46 = vpop.f32.mrf.mxu1 }
 0x473   :  { %12164 = vst [vmem:[#allocation31_spill] sm:$0xff] %v9672_v46 }
 0x476   :  { %v9680_v3 = vpop.f32.mrf.mxu0 }
 0x477   :  { %v9653_v45 = vpop.f32.mrf.mxu2  ;;  %v9655_v9 = vpop.f32.mrf.mxu3 }
 0x47a   :  { %v9690_v6 = vpop.f32.mrf.mxu1 }
 0x47b   :  { %12165 = vst [vmem:[#allocation32_spill] sm:$0xff] %v9690_v6  ;;  %v6817_v6 = vld [vmem:[%s12114_s4 + $0x24] sm:$0xf0] }
 0x47c   :  { %1829 = vmatmul.bf16.gmra.mxu2 %v9245_v36 }
 0x47e   :  { %v9695_v7 = vpop.f32.mrf.mxu0 }
 0x47f   :  { %v9668_v28 = vpop.f32.mrf.mxu2  ;;  %v9670_v41 = vpop.f32.mrf.mxu3  ;;  %3124 = vmatmul.bf16.gmra.mxu1 %v7320_v52 }
 0x482   :  { %v9697_v51 = vpop.f32.mrf.mxu1 }
 0x483   :  { %12166 = vst [vmem:[#allocation33_spill] sm:$0xff] %v9697_v51  ;;  %v6861_v51 = vld [vmem:[%s12114_s4 + $0x74] sm:$0xf0] }
 0x487   :  { %v1604_v19 = vpop.f32.mrf.mxu2  ;;  %v9682_v36 = vpop.f32.mrf.mxu3 }
 0x48a   :  { %v9719_v29 = vpop.f32.mrf.mxu1 }
 0x48b   :  { %12167 = vst [vmem:[#allocation34_spill] sm:$0xff] %v9719_v29  ;;  %v8277_v29 = vld [vmem:[%s12114_s4 + $0x4] sm:$0xf] }
 0x48c   :  { %1834 = vmatmul.bf16.gmra.mxu2 %v9257_v2  ;;  %v6828_v2 = vor.u32 %v8278_v53, %v6825_v32  ;;  %v7356_v53 = vor.u32 %v8416_v17, %v7355_v27  ;;  %v9721_v32 = vpop.f32.mrf.mxu0  ;;  %v6895_v27 = vld [vmem:[%s12114_s4 + $0x98] sm:$0xf]  ;;  %v6864_v17 = vor.u32 %v8287_v11, %v6861_v51  ;;  %v6820_v11 = vor.u32 %v8277_v29, %v6817_v6  ;;  %v6931_v29 = vld [vmem:[%s12114_s4 + $0xe0] sm:$0xf]  ;;  %v8286_v6 = vld [vmem:[%s12114_s4 + $0x4c] sm:$0xf] }
 0x48e   :  { %3321 = vmatmul.bf16.vlgmr.msrb.gmra.mxu0 %v6828_v2 }
 0x48f   :  { %v1607_v22 = vpop.f32.mrf.mxu2  ;;  %v9693_v25 = vpop.f32.mrf.mxu3  ;;  %3129 = vmatmul.bf16.gmra.mxu1 %v7356_v53 }
 0x492   :  { %v9726_v62 = vpop.f32.mrf.mxu1 }
 0x493   :  { %12168 = vst [vmem:[#allocation35_spill] sm:$0xff] %v9726_v62 }
 0x494   :  { %v9740_v53 = vpop.f32.mrf.mxu0 }
 0x497   :  { %v1609_v52 = vpop.f32.mrf.mxu2  ;;  %v9711_v35 = vpop.f32.mrf.mxu3 }
 0x498   :  { %v2111_v13 = vpack.c.bf16 %v1609_v52, %v1607_v22  ;;  %v6853_v22 = vld [vmem:[%s12114_s4 + $0x6c] sm:$0xf0] }
 0x49a   :  { %v9750_v10 = vpop.f32.mrf.mxu1 }
 0x49c   :  { %1839 = vmatmul.bf16.gmra.mxu2 %v9270_v8  ;;  %v8300_v8 = vld [vmem:[%s12114_s4 + $0xb8] sm:$0xf0] }
 0x49d   :  { %v6896_v62 = vor.u32 %v8300_v8, %v6895_v27  ;;  %v9753_v27 = vpop.f32.mrf.mxu0 }
 0x49e   :  { %3326 = vmatmul.bf16.gmra.mxu0 %v6864_v17 }
 0x49f   :  { %v1612_v18 = vpop.f32.mrf.mxu2  ;;  %v9724_v2 = vpop.f32.mrf.mxu3  ;;  %3242 = vmatmul.bf16.gmra.mxu3 %v6896_v62  ;;  %v2110_v62 = vpack.c.bf16 %v1604_v19, %v9668_v28  ;;  %v6897_v28 = vld [vmem:[%s12114_s4 + $0xbc] sm:$0xf0] }
 0x4a2   :  { %v9760_v17 = vpop.f32.mrf.mxu1 }
 0x4a7   :  { %v1614_v46 = vpop.f32.mrf.mxu2  ;;  %v9748_v26 = vpop.f32.mrf.mxu3 }
 0x4a8   :  { %v2112_v51 = vpack.c.bf16 %v1614_v46, %v1612_v18 }
 0x4aa   :  { %3402 = vmatpush.bf16.msrb.mxu1 %v2112_v51  ;;  %v2068_v51 = vpop.f32.mrf.mxu0 }
 0x4ac   :  { %3143 = vmatmul.bf16.vlgmr.msrb.gmra.mxu2 %v6820_v11  ;;  %v12169_v11 = vpack.c.bf16 %v9628_v0, %v9616_v21  ;;  %v12172_v0 = vpack.c.bf16 %v9568_v58, %v9562_v31  ;;  %v6933_v31 = vld [vmem:[%s12114_s4 + $0x104] sm:$0xf0] }
 0x4ad   :  { %4071 = vmatpush.bf16.msrb.mxu2 %v8913_v30  ;;  %v8309_v30 = vld [vmem:[%s12114_s4 + $0x100] sm:$0xf0] }
 0x4ae   :  { %3403 = vmatpush.bf16.msrb.mxu1 %v2111_v13  ;;  %v8296_v13 = vld [vmem:[%s12114_s4 + $0x9c] sm:$0xf]  ;;  %v6932_v46 = vor.u32 %v8309_v30, %v6931_v29 }
 0x4af   :  { %v9755_v8 = vpop.f32.mrf.mxu2  ;;  %v9757_v1 = vpop.f32.mrf.mxu3  ;;  %v6900_v19 = vor.u32 %v8296_v13, %v6897_v28  ;;  %v12171_v13 = vld [vmem:[#allocation16_spill] sm:$0xff] }
 0x4b0   :  { %3247 = vmatmul.bf16.gmra.mxu3 %v6932_v46  ;;  %v8305_v28 = vld [vmem:[%s12114_s4 + $0xe4] sm:$0xf] }
 0x4b1   :  { %4072 = vmatpush.bf16.msrb.mxu2 %v8918_v34  ;;  %v2109_v34 = vpack.c.bf16 %v9653_v45, %v9645_v57  ;;  %3331 = vmatmul.bf16.gmra.mxu0 %v6900_v19  ;;  %v6856_v45 = vor.u32 %v8286_v6, %v6853_v22  ;;  %v8295_v22 = vld [vmem:[%s12114_s4 + $0x94] sm:$0xf] }
 0x4b2   :  { %3404 = vmatpush.bf16.msrb.mxu1 %v2110_v62  ;;  %v9792_v62 = vpop.f32.mrf.mxu1  ;;  %v2070_v21 = vpop.f32.mrf.mxu0 }
 0x4b3   :  { %v2144_v19 = vpack.c.bf16 %v2070_v21, %v2068_v51 }
 0x4b5   :  { %4073 = vmatpush.bf16.msrb.mxu2 %v8926_v43  ;;  %v12170_v43 = vpack.c.bf16 %v9593_v20, %v9583_v59  ;;  %v6967_v59 = vld [vmem:[%s12114_s4 + $0x128] sm:$0xf]  ;;  %v8318_v20 = vld [vmem:[%s12114_s4 + $0x148] sm:$0xf0] }
 0x4b6   :  { %3405 = vmatpush.bf16.msrb.mxu1 %v2109_v34  ;;  %v6968_v58 = vor.u32 %v8318_v20, %v6967_v59  ;;  %v6936_v34 = vor.u32 %v8305_v28, %v6933_v31  ;;  %v12175_v59 = vld [vmem:[#allocation18_spill] sm:$0xff]  ;;  %v2140_v31 = vpack.c.bf16 %v9651_v48, %v9638_v23 }
 0x4b7   :  { %v9784_v52 = vpop.f32.mrf.mxu2  ;;  %v1951_v18 = vpop.f32.mrf.mxu3 }
 0x4b8   :  { %v2121_v57 = vpack.c.bf16 %v9784_v52, %v9755_v8 }
 0x4b9   :  { %4074 = vmatpush.bf16.msrb.mxu2 %v8936_v55  ;;  %v6831_v55 = vld [vmem:[%s12114_s4 + $0x10] sm:$0xf] }
 0x4ba   :  { %3406 = vmatpush.bf16.msrb.mxu1 %v12169_v11  ;;  %v9822_v46 = vpop.f32.mrf.mxu1  ;;  %v12173_v11 = vld [vmem:[#allocation17_spill] sm:$0xff] }
 0x4bc   :  { %3148 = vmatmul.bf16.gmra.mxu2 %v6856_v45  ;;  %v6889_v45 = vld [vmem:[%s12114_s4 + $0xb4] sm:$0xf0] }
 0x4bd   :  { %4075 = vmatpush.bf16.msrb.mxu2 %v8944_v4  ;;  %v8283_v4 = vld [vmem:[%s12114_s4 + $0x30] sm:$0xf0]  ;;  %v6892_v21 = vor.u32 %v8295_v22, %v6889_v45  ;;  %v2139_v22 = vpack.c.bf16 %v9611_v14, %v9589_v12  ;;  %v2131_v45 = vpack.c.bf16 %v9655_v9, %v9647_v38  ;;  %v7005_v14 = vld [vmem:[%s12114_s4 + $0x194] sm:$0xf0]  ;;  %v2137_v38 = vpack.c.bf16 %v9546_v15, %v9538_v16  ;;  %v8336_v9 = vld [vmem:[%s12114_s4 + $0x1d8] sm:$0xf0] }
 0x4be   :  { %3407 = vmatpush.bf16.msrb.mxu1 %v12170_v43  ;;  %v6832_v6 = vor.u32 %v8283_v4, %v6831_v55  ;;  %v12174_v43 = vpack.c.bf16 %v9548_v54, %v9542_v49  ;;  %v2143_v4 = vpack.c.bf16 %v9753_v27, %v9740_v53  ;;  %v2135_v49 = vpack.c.bf16 %v1951_v18, %v9757_v1  ;;  %v8314_v27 = vld [vmem:[%s12114_s4 + $0x12c] sm:$0xf]  ;;  %v6969_v1 = vld [vmem:[%s12114_s4 + $0x14c] sm:$0xf0]  ;;  %v8327_v18 = vld [vmem:[%s12114_s4 + $0x190] sm:$0xf0] }
 0x4bf   :  { %v9798_v29 = vpop.f32.mrf.mxu2  ;;  %v1954_v30 = vpop.f32.mrf.mxu3  ;;  %v2142_v54 = vpack.c.bf16 %v9721_v32, %v9695_v7  ;;  %v2134_v53 = vpack.c.bf16 %v9748_v26, %v9724_v2  ;;  %v2141_v7 = vpack.c.bf16 %v9680_v3, %v9665_v61  ;;  %v6867_v32 = vld [vmem:[%s12114_s4 + $0x58] sm:$0xf]  ;;  %v8292_v26 = vld [vmem:[%s12114_s4 + $0x78] sm:$0xf0]  ;;  %v7003_v2 = vld [vmem:[%s12114_s4 + $0x170] sm:$0xf]  ;;  %v2133_v61 = vpack.c.bf16 %v9711_v35, %v9693_v25 }
 0x4c0   :  { %3252 = vmatmul.bf16.gmra.mxu3 %v6968_v58  ;;  %v7004_v3 = vor.u32 %v8327_v18, %v7003_v2  ;;  %v6868_v58 = vor.u32 %v8292_v26, %v6867_v32  ;;  %v2132_v35 = vpack.c.bf16 %v9682_v36, %v9670_v41  ;;  %v2138_v41 = vpack.c.bf16 %v9580_v56, %v9564_v47  ;;  %v8323_v12 = vld [vmem:[%s12114_s4 + $0x174] sm:$0xf]  ;;  %v6903_v47 = vld [vmem:[%s12114_s4 + $0xa0] sm:$0xf]  ;;  %v8301_v56 = vld [vmem:[%s12114_s4 + $0xc0] sm:$0xf0] }
 0x4c1   :  { %4076 = vmatpush.bf16.msrb.mxu2 %v12171_v13  ;;  %3336 = vmatmul.bf16.gmra.mxu0 %v6936_v34  ;;  %v8304_v34 = vld [vmem:[%s12114_s4 + $0xdc] sm:$0xf]  ;;  %v7008_v16 = vor.u32 %v8323_v12, %v7005_v14  ;;  %v2129_v15 = vpack.c.bf16 %v9595_v60, %v9585_v24  ;;  %v8345_v32 = vld [vmem:[%s12114_s4 + $0x220] sm:$0xf0] }
 0x4c2   :  { %3408 = vmatpush.bf16.msrb.mxu1 %v12172_v0  ;;  %v9844_v20 = vpop.f32.mrf.mxu1 }
 0x4c5   :  { %4077 = vmatpush.bf16.msrb.mxu2 %v12173_v11  ;;  %v2130_v11 = vpack.c.bf16 %v9630_v63, %v9618_v37  ;;  %v7039_v63 = vld [vmem:[%s12114_s4 + $0x1b8] sm:$0xf] }
 0x4c6   :  { %3409 = vmatpush.bf16.msrb.mxu1 %v12174_v43  ;;  %v7040_v43 = vor.u32 %v8336_v9, %v7039_v63 }
 0x4c7   :  { %v9834_v13 = vpop.f32.mrf.mxu2  ;;  %v1956_v0 = vpop.f32.mrf.mxu3 }
 0x4c8   :  { %v2122_v51 = vpack.c.bf16 %v9834_v13, %v9798_v29  ;;  %v2136_v55 = vpack.c.bf16 %v1956_v0, %v1954_v30  ;;  %v6972_v30 = vor.u32 %v8314_v27, %v6969_v1  ;;  %v6904_v0 = vor.u32 %v8301_v56, %v6903_v47  ;;  %v6939_v27 = vld [vmem:[%s12114_s4 + $0xe8] sm:$0xf]  ;;  %v8310_v1 = vld [vmem:[%s12114_s4 + $0x108] sm:$0xf0]  ;;  %v8331_v47 = vld [vmem:[%s12114_s4 + $0x1b4] sm:$0xf] }
 0x4c9   :  { %3410 = vmatmul.bf16.vlgmr.msrb.gmra.mxu1 %v6832_v6  ;;  %4078 = vmatpush.bf16.msrb.mxu2 %v12175_v59  ;;  %v6940_v18 = vor.u32 %v8310_v1, %v6939_v27  ;;  %v7033_v56 = vld [vmem:[%s12114_s4 + $0x1d4] sm:$0xf0]  ;;  %v8350_v1 = vld [vmem:[%s12114_s4 + $0x24c] sm:$0xf]  ;;  %v8377_v29 = vld [vmem:[%s12114_s4 + $0x324] sm:$0xf] }
 0x4ca   :  { %3758 = vmatpush.bf16.msra.mxu1 %v2144_v19  ;;  %3669 = vmatpush.bf16.msra.mxu0 %v2136_v55  ;;  %v6925_v19 = vld [vmem:[%s12114_s4 + $0xfc] sm:$0xf0]  ;;  %v9886_v25 = vpop.f32.mrf.mxu1  ;;  %v8313_v55 = vld [vmem:[%s12114_s4 + $0x124] sm:$0xf]  ;;  %v7036_v9 = vor.u32 %v8331_v47, %v7033_v56  ;;  %v8372_v47 = vld [vmem:[%s12114_s4 + $0x2f8] sm:$0xf0] }
 0x4cb   :  { %v6928_v48 = vor.u32 %v8304_v34, %v6925_v19  ;;  %v8359_v56 = vld [vmem:[%s12114_s4 + $0x294] sm:$0xf]  ;;  %v7221_v13 = vld [vmem:[%s12114_s4 + $0x344] sm:$0xf0] }
 0x4cc   :  { %3153 = vmatmul.bf16.gmra.mxu2 %v6892_v21  ;;  %v6961_v21 = vld [vmem:[%s12114_s4 + $0x144] sm:$0xf0] }
 0x4ce   :  { %3759 = vmatpush.bf16.msra.mxu1 %v2143_v4  ;;  %3670 = vmatpush.bf16.msra.mxu0 %v2135_v49  ;;  %v6964_v49 = vor.u32 %v8313_v55, %v6961_v21  ;;  %v7011_v55 = vld [vmem:[%s12114_s4 + $0x178] sm:$0xf]  ;;  %v8328_v21 = vld [vmem:[%s12114_s4 + $0x198] sm:$0xf0] }
 0x4cf   :  { %v9846_v28 = vpop.f32.mrf.mxu2 }
 0x4d0   :  { %3257 = vmatmul.bf16.gmra.mxu3 %v7004_v3 }
 0x4d1   :  { %3341 = vmatmul.bf16.gmra.mxu0 %v6972_v30  ;;  %v8322_v30 = vld [vmem:[%s12114_s4 + $0x16c] sm:$0xf] }
 0x4d2   :  { %3760 = vmatpush.bf16.msra.mxu1 %v2142_v54  ;;  %3671 = vmatpush.bf16.msra.mxu0 %v2134_v53  ;;  %v9912_v37 = vpop.f32.mrf.mxu1  ;;  %v8332_v54 = vld [vmem:[%s12114_s4 + $0x1bc] sm:$0xf]  ;;  %v7041_v53 = vld [vmem:[%s12114_s4 + $0x1dc] sm:$0xf0] }
 0x4d3   :  { %v7044_v26 = vor.u32 %v8332_v54, %v7041_v53  ;;  %v7147_v54 = vld [vmem:[%s12114_s4 + $0x290] sm:$0xf]  ;;  %v8363_v53 = vld [vmem:[%s12114_s4 + $0x2b0] sm:$0xf0] }
 0x4d6   :  { %3761 = vmatpush.bf16.msra.mxu1 %v2141_v7  ;;  %3672 = vmatpush.bf16.msra.mxu0 %v2133_v61  ;;  %v7075_v7 = vld [vmem:[%s12114_s4 + $0x200] sm:$0xf]  ;;  %v6997_v61 = vld [vmem:[%s12114_s4 + $0x18c] sm:$0xf0] }
 0x4d7   :  { %v9880_v6 = vpop.f32.mrf.mxu2  ;;  %v7076_v2 = vor.u32 %v8345_v32, %v7075_v7  ;;  %v7113_v7 = vld [vmem:[%s12114_s4 + $0x26c] sm:$0xf0]  ;;  %v7148_v32 = vor.u32 %v8363_v53, %v7147_v54  ;;  %v8349_v54 = vld [vmem:[%s12114_s4 + $0x244] sm:$0xf]  ;;  %v7105_v53 = vld [vmem:[%s12114_s4 + $0x264] sm:$0xf0] }
 0x4d8   :  { %v2123_v23 = vpack.c.bf16 %v9880_v6, %v9846_v28  ;;  %v8390_v28 = vld [vmem:[%s12114_s4 + $0x388] sm:$0xf0] }
 0x4d9   :  { %3415 = vmatmul.bf16.gmra.mxu1 %v6868_v58  ;;  %v7000_v58 = vor.u32 %v8322_v30, %v6997_v61  ;;  %v7116_v30 = vor.u32 %v8350_v1, %v7113_v7 }
 0x4da   :  { %3762 = vmatpush.bf16.msra.mxu1 %v2140_v31  ;;  %3673 = vmatpush.bf16.msra.mxu0 %v2132_v35  ;;  %v9932_v24 = vpop.f32.mrf.mxu1  ;;  %v8341_v35 = vld [vmem:[%s12114_s4 + $0x204] sm:$0xf] }
 0x4dc   :  { %3158 = vmatmul.bf16.gmra.mxu2 %v6928_v48  ;;  %v7077_v48 = vld [vmem:[%s12114_s4 + $0x224] sm:$0xf0] }
 0x4dd   :  { %v7080_v12 = vor.u32 %v8341_v35, %v7077_v48 }
 0x4de   :  { %3763 = vmatpush.bf16.msra.mxu1 %v2139_v22  ;;  %3674 = vmatpush.bf16.msra.mxu0 %v2131_v45  ;;  %v6975_v22 = vld [vmem:[%s12114_s4 + $0x130] sm:$0xf]  ;;  %v8319_v45 = vld [vmem:[%s12114_s4 + $0x150] sm:$0xf0] }
 0x4df   :  { %v9894_v36 = vpop.f32.mrf.mxu2 }
 0x4e0   :  { %3262 = vmatmul.bf16.gmra.mxu3 %v7040_v43 }
 0x4e1   :  { %3346 = vmatmul.bf16.gmra.mxu0 %v7008_v16  ;;  %v3233_v16 = vpop.f32.mrf.mxu3 }
 0x4e2   :  { %3764 = vmatpush.bf16.msra.mxu1 %v2138_v41  ;;  %3675 = vmatpush.bf16.msra.mxu0 %v2130_v11  ;;  %v9960_v3 = vpop.f32.mrf.mxu1  ;;  %v7111_v41 = vld [vmem:[%s12114_s4 + $0x248] sm:$0xf]  ;;  %v8354_v11 = vld [vmem:[%s12114_s4 + $0x268] sm:$0xf0] }
 0x4e3   :  { %v7112_v14 = vor.u32 %v8354_v11, %v7111_v41  ;;  %v7047_v41 = vld [vmem:[%s12114_s4 + $0x1c0] sm:$0xf] }
 0x4e6   :  { %3765 = vmatpush.bf16.msra.mxu1 %v2137_v38  ;;  %3676 = vmatpush.bf16.msra.mxu0 %v2129_v15  ;;  %v6976_v38 = vor.u32 %v8319_v45, %v6975_v22 }
 0x4e7   :  { %v9928_v4 = vpop.f32.mrf.mxu2 }
 0x4e8   :  { %v2124_v59 = vpack.c.bf16 %v9928_v4, %v9894_v36  ;;  %v7119_v36 = vld [vmem:[%s12114_s4 + $0x250] sm:$0xf] }
 0x4e9   :  { %3420 = vmatmul.bf16.gmra.mxu1 %v6904_v0  ;;  %v9996_v0 = vpop.f32.mrf.mxu3 }
 0x4ea   :  { %v9966_v19 = vpop.f32.mrf.mxu1 }
 0x4ec   :  { %3163 = vmatmul.bf16.gmra.mxu2 %v6964_v49 }
 0x4ef   :  { %v9934_v60 = vpop.f32.mrf.mxu2 }
 0x4f0   :  { %3267 = vmatmul.bf16.gmra.mxu3 %v7076_v2  ;;  %v8340_v2 = vld [vmem:[%s12114_s4 + $0x1fc] sm:$0xf] }
 0x4f1   :  { %3351 = vmatmul.bf16.gmra.mxu0 %v7044_v26  ;;  %v7012_v26 = vor.u32 %v8328_v21, %v7011_v55  ;;  %v10024_v35 = vpop.f32.mrf.mxu3 }
 0x4f2   :  { %v9994_v15 = vpop.f32.mrf.mxu1 }
 0x4f7   :  { %v9962_v31 = vpop.f32.mrf.mxu2 }
 0x4f9   :  { %3425 = vmatmul.bf16.gmra.mxu1 %v6940_v18  ;;  %v7069_v18 = vld [vmem:[%s12114_s4 + $0x21c] sm:$0xf0]  ;;  %v10031_v11 = vpop.f32.mrf.mxu3 }
 0x4fa   :  { %v10010_v27 = vpop.f32.mrf.mxu1 }
 0x4fc   :  { %3168 = vmatmul.bf16.gmra.mxu2 %v7000_v58  ;;  %v7072_v58 = vor.u32 %v8340_v2, %v7069_v18 }
 0x4ff   :  { %v9964_v34 = vpop.f32.mrf.mxu2 }
 0x500   :  { %3272 = vmatmul.bf16.gmra.mxu3 %v7112_v14 }
 0x501   :  { %3356 = vmatmul.bf16.gmra.mxu0 %v7080_v12  ;;  %v8337_v12 = vld [vmem:[%s12114_s4 + $0x1e0] sm:$0xf0] }
 0x502   :  { %v10026_v22 = vpop.f32.mrf.mxu1  ;;  %v7048_v21 = vor.u32 %v8337_v12, %v7047_v41 }
 0x507   :  { %v9992_v63 = vpop.f32.mrf.mxu2 }
 0x508   :  { %v2126_v12 = vpack.c.bf16 %v9992_v63, %v9964_v34  ;;  %v7219_v34 = vld [vmem:[%s12114_s4 + $0x320] sm:$0xf] }
 0x509   :  { %3430 = vmatmul.bf16.gmra.mxu1 %v6976_v38  ;;  %v7183_v38 = vld [vmem:[%s12114_s4 + $0x2d8] sm:$0xf] }
 0x50a   :  { %v7184_v55 = vor.u32 %v8372_v47, %v7183_v38  ;;  %v10056_v2 = vpop.f32.mrf.mxu1 }
 0x50b   :  { %v3322_v49 = vpop.f32.mrf.mxu0 }
 0x50c   :  { %3173 = vmatmul.bf16.gmra.mxu2 %v7036_v9  ;;  %v7149_v9 = vld [vmem:[%s12114_s4 + $0x2b4] sm:$0xf0] }
 0x50d   :  { %v7152_v1 = vor.u32 %v8359_v56, %v7149_v9 }
 0x50f   :  { %v1835_v43 = vpop.f32.mrf.mxu2 }
 0x510   :  { %3277 = vmatmul.bf16.gmra.mxu3 %v7148_v32 }
 0x511   :  { %3361 = vmatmul.bf16.gmra.mxu0 %v7116_v30 }
 0x512   :  { %v10070_v9 = vpop.f32.mrf.mxu1 }
 0x513   :  { %v3324_v48 = vpop.f32.mrf.mxu0 }
 0x517   :  { %v1837_v61 = vpop.f32.mrf.mxu2 }
 0x519   :  { %3435 = vmatmul.bf16.gmra.mxu1 %v7012_v26  ;;  %v7108_v26 = vor.u32 %v8349_v54, %v7105_v53 }
 0x51b   :  { %v10036_v14 = vpop.f32.mrf.mxu0 }
 0x51c   :  { %3178 = vmatmul.bf16.gmra.mxu2 %v7072_v58  ;;  %v2127_v58 = vpack.c.bf16 %v1837_v61, %v1835_v43  ;;  %v8346_v43 = vld [vmem:[%s12114_s4 + $0x228] sm:$0xf0] }
 0x51f   :  { %v1840_v45 = vpop.f32.mrf.mxu2 }
 0x520   :  { %3282 = vmatmul.bf16.gmra.mxu3 %v7184_v55  ;;  %v8368_v55 = vld [vmem:[%s12114_s4 + $0x2dc] sm:$0xf] }
 0x521   :  { %3366 = vmatmul.bf16.gmra.mxu0 %v7152_v1  ;;  %v8358_v1 = vld [vmem:[%s12114_s4 + $0x28c] sm:$0xf] }
 0x522   :  { %v10058_v18 = vpop.f32.mrf.mxu3 }
 0x523   :  { %v10060_v30 = vpop.f32.mrf.mxu0 }
 0x527   :  { %v1842_v7 = vpop.f32.mrf.mxu2 }
 0x528   :  { %v2128_v32 = vpack.c.bf16 %v1842_v7, %v1840_v45  ;;  %v7083_v45 = vld [vmem:[%s12114_s4 + $0x208] sm:$0xf]  ;;  %v7141_v7 = vld [vmem:[%s12114_s4 + $0x2ac] sm:$0xf0] }
 0x529   :  { %3440 = vmatmul.bf16.gmra.mxu1 %v7048_v21  ;;  %v7185_v21 = vld [vmem:[%s12114_s4 + $0x2fc] sm:$0xf0]  ;;  %v7084_v53 = vor.u32 %v8346_v43, %v7083_v45  ;;  %v7224_v43 = vor.u32 %v8377_v29, %v7221_v13 }
 0x52a   :  { %3580 = vmatpush.bf16.msrb.mxu3 %v2128_v32  ;;  %v10068_v47 = vpop.f32.mrf.mxu3  ;;  %v7144_v32 = vor.u32 %v8358_v1, %v7141_v7  ;;  %v12177_v7 = vld [vmem:[#allocation20_spill] sm:$0xff] }
 0x52c   :  { %3183 = vmatmul.bf16.gmra.mxu2 %v7108_v26 }
 0x52e   :  { %3581 = vmatpush.bf16.msrb.mxu3 %v2127_v58  ;;  %v10081_v63 = vpop.f32.mrf.mxu0 }
 0x52f   :  { %v3144_v41 = vpop.f32.mrf.mxu2 }
 0x530   :  { %v3145_v38 = vadd.f32 %v3144_v41, %v9536_v44  ;;  %v8381_v44 = vld [vmem:[%s12114_s4 + $0x340] sm:$0xf0] }
 0x531   :  { %v7220_v54 = vor.u32 %v8381_v44, %v7219_v34 }
 0x532   :  { %v3234_v56 = vadd.f32 %v3233_v16, %v3145_v38  ;;  %3582 = vmatpush.bf16.msrb.mxu3 %v2126_v12  ;;  %v2125_v16 = vpack.c.bf16 %v9962_v31, %v9934_v60  ;;  %v7188_v60 = vor.u32 %v8368_v55, %v7185_v21  ;;  %v10106_v38 = vpop.f32.mrf.mxu1 }
 0x533   :  { %3287 = vmatmul.bf16.gmra.mxu3 %v7220_v54  ;;  %v10102_v58 = vpop.f32.mrf.mxu3 }
 0x534   :  { %v3323_v61 = vadd.f32 %v3322_v49, %v3234_v56  ;;  %3371 = vmatmul.bf16.gmra.mxu0 %v7188_v60  ;;  %v7177_v56 = vld [vmem:[%s12114_s4 + $0x2f4] sm:$0xf0]  ;;  %v12178_v60 = vld [vmem:[#allocation21_spill] sm:$0xff] }
 0x536   :  { %3583 = vmatpush.bf16.msrb.mxu3 %v2125_v16  ;;  %v10104_v41 = vpop.f32.mrf.mxu0  ;;  %v12176_v16 = vld [vmem:[#allocation19_spill] sm:$0xff] }
 0x537   :  { %v3146_v31 = vpop.f32.mrf.mxu2 }
 0x538   :  { %v3147_v49 = vadd.f32 %v3146_v31, %v9544_v42 }
 0x539   :  { %3445 = vmatmul.bf16.gmra.mxu1 %v7084_v53 }
 0x53a   :  { %v3236_v26 = vadd.f32 %v9996_v0, %v3147_v49  ;;  %3584 = vmatpush.bf16.msrb.mxu3 %v2124_v59  ;;  %v8355_v59 = vld [vmem:[%s12114_s4 + $0x270] sm:$0xf0]  ;;  %v8364_v49 = vld [vmem:[%s12114_s4 + $0x2b8] sm:$0xf0] }
 0x53b   :  { %v10122_v0 = vpop.f32.mrf.mxu3 }
 0x53c   :  { %v3325_v12 = vadd.f32 %v3324_v48, %v3236_v26  ;;  %3188 = vmatmul.bf16.gmra.mxu2 %v7144_v32  ;;  %v8367_v48 = vld [vmem:[%s12114_s4 + $0x2d4] sm:$0xf]  ;;  %v7291_v32 = vld [vmem:[%s12114_s4 + $0x3b0] sm:$0xf] }
 0x53d   :  { %v7180_v21 = vor.u32 %v8367_v48, %v7177_v56  ;;  %v12179_v26 = vld [vmem:[#allocation22_spill] sm:$0xff] }
 0x53e   :  { %3585 = vmatpush.bf16.msrb.mxu3 %v2123_v23  ;;  %v10130_v6 = vpop.f32.mrf.mxu0 }
 0x53f   :  { %v3149_v42 = vpop.f32.mrf.mxu2 }
 0x540   :  { %v3150_v45 = vadd.f32 %v3149_v42, %v9558_v39  ;;  %v7255_v39 = vld [vmem:[%s12114_s4 + $0x368] sm:$0xf] }
 0x542   :  { %v3239_v4 = vadd.f32 %v10024_v35, %v3150_v45  ;;  %3586 = vmatpush.bf16.msrb.mxu3 %v2122_v51  ;;  %v7256_v51 = vor.u32 %v8390_v28, %v7255_v39  ;;  %v7120_v35 = vor.u32 %v8355_v59, %v7119_v36  ;;  %v7257_v45 = vld [vmem:[%s12114_s4 + $0x38c] sm:$0xf0]  ;;  %v8376_v59 = vld [vmem:[%s12114_s4 + $0x31c] sm:$0xf] }
 0x543   :  { %v10153_v53 = vpop.f32.mrf.mxu3 }
 0x544   :  { %v3328_v23 = vadd.f32 %v10036_v14, %v3239_v4  ;;  %3376 = vmatmul.bf16.gmra.mxu0 %v7224_v43  ;;  %3292 = vmatmul.bf16.gmra.mxu3 %v7256_v51  ;;  %v12180_v51 = vld [vmem:[#allocation23_spill] sm:$0xff] }
 0x546   :  { %v3411_v14 = vpop.f32.mrf.mxu1  ;;  %3587 = vmatpush.bf16.msrb.mxu3 %v2121_v57  ;;  %v10155_v1 = vpop.f32.mrf.mxu0 }
 0x547   :  { %v10148_v34 = vadd.f32 %v3411_v14, %v3323_v61  ;;  %v3151_v44 = vpop.f32.mrf.mxu2  ;;  %v12181_v14 = vld [vmem:[#allocation24_spill] sm:$0xff] }
 0x548   :  { %v3152_v55 = vadd.f32 %v3151_v44, %v9566_v5 }
 0x549   :  { %3450 = vmatmul.bf16.gmra.mxu1 %v7120_v35 }
 0x54a   :  { %4160 = vmatpush.bf16.msra.mxu3 %v12176_v16  ;;  %v3241_v54 = vadd.f32 %v10031_v11, %v3152_v55  ;;  %v7155_v11 = vld [vmem:[%s12114_s4 + $0x298] sm:$0xf] }
 0x54b   :  { %v7156_v4 = vor.u32 %v8364_v49, %v7155_v11  ;;  %v7293_v11 = vld [vmem:[%s12114_s4 + $0x3d4] sm:$0xf0] }
 0x54c   :  { %v3330_v8 = vadd.f32 %v10060_v30, %v3241_v54  ;;  %3193 = vmatmul.bf16.gmra.mxu2 %v7180_v21  ;;  %v10170_v30 = vpop.f32.mrf.mxu3  ;;  %v12182_v54 = vld [vmem:[#allocation25_spill] sm:$0xff] }
 0x54e   :  { %4161 = vmatpush.bf16.msra.mxu3 %v12177_v7  ;;  %v3413_v52 = vpop.f32.mrf.mxu1  ;;  %v10180_v42 = vpop.f32.mrf.mxu0 }
 0x54f   :  { %v10159_v57 = vadd.f32 %v3413_v52, %v3325_v12  ;;  %v3154_v61 = vpop.f32.mrf.mxu2  ;;  %v8408_v52 = vld [vmem:[%s12114_s4 + $0x418] sm:$0xf0] }
 0x550   :  { %v3155_v5 = vadd.f32 %v3154_v61, %v9578_v40  ;;  %v8399_v40 = vld [vmem:[%s12114_s4 + $0x3d0] sm:$0xf0] }
 0x551   :  { %v7292_v36 = vor.u32 %v8399_v40, %v7291_v32  ;;  %v8385_v32 = vld [vmem:[%s12114_s4 + $0x364] sm:$0xf] }
 0x552   :  { %4162 = vmatpush.bf16.msra.mxu3 %v12178_v60  ;;  %v3244_v31 = vadd.f32 %v10058_v18, %v3155_v5  ;;  %v8386_v18 = vld [vmem:[%s12114_s4 + $0x36c] sm:$0xf] }
 0x553   :  { %v7260_v39 = vor.u32 %v8386_v18, %v7257_v45 }
 0x554   :  { %v3333_v12 = vadd.f32 %v10081_v63, %v3244_v31  ;;  %v7213_v63 = vld [vmem:[%s12114_s4 + $0x33c] sm:$0xf0]  ;;  %3297 = vmatmul.bf16.gmra.mxu3 %v7292_v36  ;;  %v10199_v43 = vpop.f32.mrf.mxu3  ;;  %v12184_v36 = vld [vmem:[#allocation27_spill] sm:$0xff] }
 0x555   :  { %3381 = vmatmul.bf16.gmra.mxu0 %v7260_v39  ;;  %v7216_v48 = vor.u32 %v8376_v59, %v7213_v63 }
 0x556   :  { %4163 = vmatpush.bf16.msra.mxu3 %v12179_v26  ;;  %v3416_v28 = vpop.f32.mrf.mxu1 }
 0x557   :  { %v10194_v29 = vadd.f32 %v3416_v28, %v3328_v23  ;;  %v3156_v13 = vpop.f32.mrf.mxu2  ;;  %v10203_v23 = vpop.f32.mrf.mxu0 }
 0x558   :  { %v3157_v35 = vadd.f32 %v3156_v13, %v9587_v33 }
 0x559   :  { %3455 = vmatmul.bf16.gmra.mxu1 %v7156_v4 }
 0x55a   :  { %4164 = vmatpush.bf16.msra.mxu3 %v12180_v51  ;;  %v3246_v56 = vadd.f32 %v10068_v47, %v3157_v35  ;;  %v7191_v47 = vld [vmem:[%s12114_s4 + $0x2e0] sm:$0xf] }
 0x55c   :  { %v3335_v44 = vadd.f32 %v10104_v41, %v3246_v56  ;;  %3198 = vmatmul.bf16.gmra.mxu2 %v7216_v48  ;;  %v8373_v41 = vld [vmem:[%s12114_s4 + $0x300] sm:$0xf0]  ;;  %v10222_v61 = vpop.f32.mrf.mxu3 }
 0x55d   :  { %v7192_v49 = vor.u32 %v8373_v41, %v7191_v47  ;;  %v12185_v48 = vld [vmem:[#allocation28_spill] sm:$0xff] }
 0x55e   :  { %4165 = vmatpush.bf16.msra.mxu3 %v12181_v14  ;;  %v3418_v16 = vpop.f32.mrf.mxu1  ;;  %v7227_v14 = vld [vmem:[%s12114_s4 + $0x328] sm:$0xf]  ;;  %v7329_v47 = vld [vmem:[%s12114_s4 + $0x41c] sm:$0xf0] }
 0x55f   :  { %v10205_v55 = vadd.f32 %v3418_v16, %v3330_v8  ;;  %v3159_v21 = vpop.f32.mrf.mxu2  ;;  %v7327_v8 = vld [vmem:[%s12114_s4 + $0x3f8] sm:$0xf]  ;;  %v10226_v5 = vpop.f32.mrf.mxu0 }
 0x560   :  { %v3160_v33 = vadd.f32 %v3159_v21, %v9605_v50  ;;  %v12183_v50 = vld [vmem:[#allocation26_spill] sm:$0xff]  ;;  %v7328_v31 = vor.u32 %v8408_v52, %v7327_v8  ;;  %v8394_v8 = vld [vmem:[%s12114_s4 + $0x3ac] sm:$0xf] }
 0x562   :  { %4166 = vmatpush.bf16.msra.mxu3 %v12182_v54  ;;  %v3249_v7 = vadd.f32 %v10102_v58, %v3160_v33  ;;  %v8395_v58 = vld [vmem:[%s12114_s4 + $0x3b4] sm:$0xf] }
 0x563   :  { %v7296_v40 = vor.u32 %v8395_v58, %v7293_v11 }
 0x564   :  { %v3338_v60 = vadd.f32 %v10130_v6, %v3249_v7  ;;  %v7249_v6 = vld [vmem:[%s12114_s4 + $0x384] sm:$0xf0]  ;;  %3302 = vmatmul.bf16.gmra.mxu3 %v7328_v31  ;;  %v10244_v39 = vpop.f32.mrf.mxu3 }
 0x565   :  { %3386 = vmatmul.bf16.gmra.mxu0 %v7296_v40  ;;  %v7252_v59 = vor.u32 %v8385_v32, %v7249_v6  ;;  %v12186_v31 = vld [vmem:[#allocation29_spill] sm:$0xff] }
 0x566   :  { %4167 = vmatpush.bf16.msra.mxu3 %v12183_v50  ;;  %v3421_v26 = vpop.f32.mrf.mxu1 }
 0x567   :  { %v10240_v18 = vadd.f32 %v3421_v26, %v3333_v12  ;;  %v3161_v45 = vpop.f32.mrf.mxu2  ;;  %v3349_v13 = vpop.f32.mrf.mxu0 }
 0x568   :  { %v3162_v4 = vadd.f32 %v3161_v45, %v12184_v36 }
 0x569   :  { %3460 = vmatmul.bf16.gmra.mxu1 %v7192_v49 }
 0x56a   :  { %v3251_v63 = vadd.f32 %v10122_v0, %v3162_v4  ;;  %v8382_v0 = vld [vmem:[%s12114_s4 + $0x348] sm:$0xf0] }
 0x56b   :  { %v7228_v41 = vor.u32 %v8382_v0, %v7227_v14 }
 0x56c   :  { %v3340_v28 = vadd.f32 %v10155_v1, %v3251_v63  ;;  %3203 = vmatmul.bf16.gmra.mxu2 %v7252_v59  ;;  %v7363_v1 = vld [vmem:[%s12114_s4 + $0x440] sm:$0xf]  ;;  %v10263_v21 = vpop.f32.mrf.mxu3  ;;  %v12187_v59 = vld [vmem:[#allocation30_spill] sm:$0xff] }
 0x56e   :  { %v3423_v51 = vpop.f32.mrf.mxu1 }
 0x56f   :  { %v10247_v35 = vadd.f32 %v3423_v51, %v3335_v44  ;;  %v3164_v12 = vpop.f32.mrf.mxu2  ;;  %v8417_v44 = vld [vmem:[%s12114_s4 + $0x460] sm:$0xf0]  ;;  %v10266_v33 = vpop.f32.mrf.mxu0  ;;  %v7263_v51 = vld [vmem:[%s12114_s4 + $0x370] sm:$0xf] }
 0x570   :  { %v3165_v56 = vadd.f32 %v3164_v12, %v12185_v48  ;;  %v7364_v7 = vor.u32 %v8417_v44, %v7363_v1  ;;  %v8403_v44 = vld [vmem:[%s12114_s4 + $0x3f4] sm:$0xf] }
 0x572   :  { %v3254_v16 = vadd.f32 %v10153_v53, %v3165_v56  ;;  %v8404_v53 = vld [vmem:[%s12114_s4 + $0x3fc] sm:$0xf] }
 0x573   :  { %v7332_v52 = vor.u32 %v8404_v53, %v7329_v47 }
 0x574   :  { %v3343_v54 = vadd.f32 %v10180_v42, %v3254_v16  ;;  %v7285_v42 = vld [vmem:[%s12114_s4 + $0x3cc] sm:$0xf0]  ;;  %3307 = vmatmul.bf16.gmra.mxu3 %v7364_v7  ;;  %v10284_v40 = vpop.f32.mrf.mxu3  ;;  %v7365_v16 = vld [vmem:[%s12114_s4 + $0x464] sm:$0xf0] }
 0x575   :  { %3391 = vmatmul.bf16.gmra.mxu0 %v7332_v52  ;;  %v7288_v32 = vor.u32 %v8394_v8, %v7285_v42  ;;  %v12188_v8 = vld [vmem:[#allocation31_spill] sm:$0xff] }
 0x576   :  { %v3426_v50 = vpop.f32.mrf.mxu1 }
 0x577   :  { %v10280_v58 = vadd.f32 %v3426_v50, %v3338_v60  ;;  %v3166_v11 = vpop.f32.mrf.mxu2  ;;  %v3354_v45 = vpop.f32.mrf.mxu0 }
 0x578   :  { %v3167_v49 = vadd.f32 %v3166_v11, %v12186_v31 }
 0x579   :  { %3465 = vmatmul.bf16.gmra.mxu1 %v7228_v41 }
 0x57a   :  { %v3256_v6 = vadd.f32 %v10170_v30, %v3167_v49  ;;  %v8391_v30 = vld [vmem:[%s12114_s4 + $0x390] sm:$0xf0] }
 0x57b   :  { %v7264_v1 = vor.u32 %v8391_v30, %v7263_v51 }
 0x57c   :  { %v3345_v26 = vadd.f32 %v10203_v23, %v3256_v6  ;;  %3208 = vmatmul.bf16.gmra.mxu2 %v7288_v32  ;;  %v6839_v23 = vld [vmem:[%s12114_s4 + $0x18] sm:$0xf]  ;;  %v10303_v48 = vpop.f32.mrf.mxu3 }
 0x57e   :  { %v3428_v36 = vpop.f32.mrf.mxu1 }
 0x57f   :  { %v10287_v4 = vadd.f32 %v3428_v36, %v3340_v28  ;;  %v3169_v60 = vpop.f32.mrf.mxu2  ;;  %v8284_v28 = vld [vmem:[%s12114_s4 + $0x38] sm:$0xf0]  ;;  %v10306_v14 = vpop.f32.mrf.mxu0 }
 0x580   :  { %v3170_v63 = vadd.f32 %v3169_v60, %v12187_v59  ;;  %v6840_v0 = vor.u32 %v8284_v28, %v6839_v23  ;;  %v7299_v59 = vld [vmem:[%s12114_s4 + $0x3b8] sm:$0xf]  ;;  %v6841_v23 = vld [vmem:[%s12114_s4 + $0x3c] sm:$0xf0] }
 0x582   :  { %v3259_v12 = vadd.f32 %v10199_v43, %v3170_v63  ;;  %v8413_v43 = vld [vmem:[%s12114_s4 + $0x444] sm:$0xf] }
 0x583   :  { %v7368_v53 = vor.u32 %v8413_v43, %v7365_v16  ;;  %v8412_v16 = vld [vmem:[%s12114_s4 + $0x43c] sm:$0xf] }
 0x584   :  { %v3348_v56 = vadd.f32 %v10226_v5, %v3259_v12  ;;  %v7321_v5 = vld [vmem:[%s12114_s4 + $0x414] sm:$0xf0]  ;;  %3588 = vmatmul.bf16.vlgmr.msrb.gmra.mxu3 %v6840_v0  ;;  %v10324_v11 = vpop.f32.mrf.mxu3 }
 0x585   :  { %3396 = vmatmul.bf16.gmra.mxu0 %v7368_v53  ;;  %v7324_v52 = vor.u32 %v8403_v44, %v7321_v5  ;;  %v12190_v53 = vld [vmem:[#allocation33_spill] sm:$0xff] }
 0x586   :  { %v3431_v47 = vpop.f32.mrf.mxu1 }
 0x587   :  { %v10320_v7 = vadd.f32 %v3431_v47, %v3343_v54  ;;  %v3171_v41 = vpop.f32.mrf.mxu2  ;;  %v3359_v49 = vpop.f32.mrf.mxu0  ;;  %v12189_v54 = vld [vmem:[#allocation32_spill] sm:$0xff] }
 0x588   :  { %v3172_v42 = vadd.f32 %v3171_v41, %v12188_v8 }
 0x589   :  { %3470 = vmatmul.bf16.gmra.mxu1 %v7264_v1 }
 0x58a   :  { %v3261_v50 = vadd.f32 %v10222_v61, %v3172_v42  ;;  %v8400_v61 = vld [vmem:[%s12114_s4 + $0x3d8] sm:$0xf0] }
 0x58b   :  { %v7300_v43 = vor.u32 %v8400_v61, %v7299_v59  ;;  %v7335_v59 = vld [vmem:[%s12114_s4 + $0x400] sm:$0xf] }
 0x58c   :  { %v3350_v31 = vadd.f32 %v3349_v13, %v3261_v50  ;;  %3213 = vmatmul.bf16.gmra.mxu2 %v7324_v52  ;;  %v6875_v13 = vld [vmem:[%s12114_s4 + $0x60] sm:$0xf]  ;;  %v10342_v51 = vpop.f32.mrf.mxu3 }
 0x58e   :  { %v3433_v32 = vpop.f32.mrf.mxu1 }
 0x58f   :  { %v10326_v6 = vadd.f32 %v3433_v32, %v3345_v26  ;;  %v3174_v36 = vpop.f32.mrf.mxu2  ;;  %v8293_v26 = vld [vmem:[%s12114_s4 + $0x80] sm:$0xf0]  ;;  %v10345_v30 = vpop.f32.mrf.mxu0 }
 0x590   :  { %v3175_v60 = vadd.f32 %v3174_v36, %v12189_v54  ;;  %v6876_v28 = vor.u32 %v8293_v26, %v6875_v13 }
 0x592   :  { %v3264_v63 = vadd.f32 %v10244_v39, %v3175_v60  ;;  %v8280_v39 = vld [vmem:[%s12114_s4 + $0x1c] sm:$0xf] }
 0x593   :  { %v6844_v0 = vor.u32 %v8280_v39, %v6841_v23  ;;  %v6877_v39 = vld [vmem:[%s12114_s4 + $0x84] sm:$0xf0] }
 0x594   :  { %v3353_v12 = vadd.f32 %v10266_v33, %v3264_v63  ;;  %v7357_v33 = vld [vmem:[%s12114_s4 + $0x45c] sm:$0xf0]  ;;  %3593 = vmatmul.bf16.gmra.mxu3 %v6876_v28  ;;  %v10363_v42 = vpop.f32.mrf.mxu3 }
 0x595   :  { %3677 = vmatmul.bf16.vlgmr.msra.gmra.mxu0 %v6844_v0  ;;  %v7360_v41 = vor.u32 %v8412_v16, %v7357_v33 }
 0x596   :  { %v3436_v1 = vpop.f32.mrf.mxu1 }
 0x597   :  { %v10359_v44 = vadd.f32 %v3436_v1, %v3348_v56  ;;  %v3176_v5 = vpop.f32.mrf.mxu2  ;;  %v3364_v50 = vpop.f32.mrf.mxu0  ;;  %v12191_v56 = vld [vmem:[#allocation34_spill] sm:$0xff] }
 0x598   :  { %v3177_v47 = vadd.f32 %v3176_v5, %v12190_v53  ;;  %v12192_v5 = vld [vmem:[#allocation35_spill] sm:$0xff] }
 0x599   :  { %3475 = vmatmul.bf16.gmra.mxu1 %v7300_v43  ;;  %v8279_v43 = vld [vmem:[%s12114_s4 + $0x14] sm:$0xf] }
 0x59a   :  { %v3266_v8 = vadd.f32 %v10263_v21, %v3177_v47  ;;  %v8409_v21 = vld [vmem:[%s12114_s4 + $0x420] sm:$0xf0] }
 0x59b   :  { %v7336_v28 = vor.u32 %v8409_v21, %v7335_v59 }
 0x59c   :  { %v3355_v52 = vadd.f32 %v3354_v45, %v3266_v8  ;;  %3218 = vmatmul.bf16.gmra.mxu2 %v7360_v41  ;;  %v6911_v45 = vld [vmem:[%s12114_s4 + $0xa8] sm:$0xf]  ;;  %v10381_v61 = vpop.f32.mrf.mxu3 }
 0x59e   :  { %v3438_v32 = vpop.f32.mrf.mxu1 }
 0x59f   :  { %v10365_v36 = vadd.f32 %v3438_v32, %v3350_v31  ;;  %v3179_v54 = vpop.f32.mrf.mxu2  ;;  %v8302_v31 = vld [vmem:[%s12114_s4 + $0xc8] sm:$0xf0]  ;;  %v10384_v26 = vpop.f32.mrf.mxu0 }
 0x5a0   :  { %v3180_v60 = vadd.f32 %v3179_v54, %v12191_v56  ;;  %v6912_v23 = vor.u32 %v8302_v31, %v6911_v45 }
 0x5a2   :  { %v3269_v63 = vadd.f32 %v10284_v40, %v3180_v60  ;;  %v8289_v40 = vld [vmem:[%s12114_s4 + $0x64] sm:$0xf] }
 0x5a3   :  { %v6880_v16 = vor.u32 %v8289_v40, %v6877_v39  ;;  %v6913_v40 = vld [vmem:[%s12114_s4 + $0xcc] sm:$0xf0] }
 0x5a4   :  { %v3358_v13 = vadd.f32 %v10306_v14, %v3269_v63  ;;  %v6833_v14 = vld [vmem:[%s12114_s4 + $0x34] sm:$0xf0]  ;;  %3598 = vmatmul.bf16.gmra.mxu3 %v6912_v23  ;;  %v10402_v8 = vpop.f32.mrf.mxu3  ;;  %v7371_v63 = vld [vmem:[%s12114_s4 + $0x448] sm:$0xf] }
 0x5a5   :  { %3682 = vmatmul.bf16.gmra.mxu0 %v6880_v16  ;;  %v6836_v47 = vor.u32 %v8279_v43, %v6833_v14 }
 0x5a6   :  { %v3441_v33 = vpop.f32.mrf.mxu1 }
 0x5a7   :  { %v10398_v0 = vadd.f32 %v3441_v33, %v3353_v12  ;;  %v3181_v1 = vpop.f32.mrf.mxu2  ;;  %v3369_v54 = vpop.f32.mrf.mxu0 }
 0x5a8   :  { %v3182_v53 = vadd.f32 %v3181_v1, %v12192_v5 }
 0x5a9   :  { %3480 = vmatmul.bf16.gmra.mxu1 %v7336_v28  ;;  %v8288_v28 = vld [vmem:[%s12114_s4 + $0x5c] sm:$0xf] }
 0x5aa   :  { %v3271_v41 = vadd.f32 %v10303_v48, %v3182_v53  ;;  %v8418_v48 = vld [vmem:[%s12114_s4 + $0x468] sm:$0xf0] }
 0x5ab   :  { %v7372_v23 = vor.u32 %v8418_v48, %v7371_v63 }
 0x5ac   :  { %v3360_v32 = vadd.f32 %v3359_v49, %v3271_v41  ;;  %3499 = vmatmul.bf16.vlgmr.msra.gmra.mxu2 %v6836_v47  ;;  %v6947_v49 = vld [vmem:[%s12114_s4 + $0xf0] sm:$0xf]  ;;  %v10420_v45 = vpop.f32.mrf.mxu3 }
 0x5ae   :  { %v3443_v56 = vpop.f32.mrf.mxu1 }
 0x5af   :  { %v10404_v60 = vadd.f32 %v3443_v56, %v3355_v52  ;;  %v3184_v59 = vpop.f32.mrf.mxu2  ;;  %v8311_v52 = vld [vmem:[%s12114_s4 + $0x110] sm:$0xf0] }
 0x5b0   :  { %v3185_v12 = vadd.f32 %v3184_v59, %v9750_v10  ;;  %v6948_v39 = vor.u32 %v8311_v52, %v6947_v49  ;;  %v6949_v52 = vld [vmem:[%s12114_s4 + $0x114] sm:$0xf0] }
 0x5b1   :  { %v10423_v31 = vpop.f32.mrf.mxu0 }
 0x5b2   :  { %v3274_v21 = vadd.f32 %v10324_v11, %v3185_v12  ;;  %v8298_v11 = vld [vmem:[%s12114_s4 + $0xac] sm:$0xf] }
 0x5b3   :  { %v6916_v43 = vor.u32 %v8298_v11, %v6913_v40 }
 0x5b4   :  { %v3363_v10 = vadd.f32 %v10345_v30, %v3274_v21  ;;  %v6869_v30 = vld [vmem:[%s12114_s4 + $0x7c] sm:$0xf0]  ;;  %3603 = vmatmul.bf16.gmra.mxu3 %v6948_v39  ;;  %v8297_v39 = vld [vmem:[%s12114_s4 + $0xa4] sm:$0xf] }
 0x5b5   :  { %3687 = vmatmul.bf16.gmra.mxu0 %v6916_v43  ;;  %v6872_v5 = vor.u32 %v8288_v28, %v6869_v30 }
 0x5b6   :  { %v3446_v14 = vpop.f32.mrf.mxu1  ;;  %v10441_v47 = vpop.f32.mrf.mxu3 }
 0x5b7   :  { %v10437_v16 = vadd.f32 %v3446_v14, %v3358_v13  ;;  %v3186_v33 = vpop.f32.mrf.mxu2 }
 0x5b8   :  { %v3187_v1 = vadd.f32 %v3186_v33, %v9760_v17  ;;  %v6847_v17 = vld [vmem:[%s12114_s4 + $0x20] sm:$0xf] }
 0x5b9   :  { %3485 = vmatmul.bf16.gmra.mxu1 %v7372_v23  ;;  %v3374_v56 = vpop.f32.mrf.mxu0 }
 0x5ba   :  { %v3276_v53 = vadd.f32 %v10342_v51, %v3187_v1  ;;  %v8285_v51 = vld [vmem:[%s12114_s4 + $0x40] sm:$0xf0] }
 0x5bb   :  { %v6848_v40 = vor.u32 %v8285_v51, %v6847_v17 }
 0x5bc   :  { %v3365_v41 = vadd.f32 %v3364_v50, %v3276_v53  ;;  %3504 = vmatmul.bf16.gmra.mxu2 %v6872_v5  ;;  %v6983_v50 = vld [vmem:[%s12114_s4 + $0x138] sm:$0xf] }
 0x5be   :  { %v3448_v59 = vpop.f32.mrf.mxu1  ;;  %v10459_v48 = vpop.f32.mrf.mxu3 }
 0x5bf   :  { %v10443_v12 = vadd.f32 %v3448_v59, %v3360_v32  ;;  %v3189_v63 = vpop.f32.mrf.mxu2  ;;  %v8320_v32 = vld [vmem:[%s12114_s4 + $0x158] sm:$0xf0] }
 0x5c0   :  { %v3190_v13 = vadd.f32 %v3189_v63, %v9792_v62  ;;  %v6984_v11 = vor.u32 %v8320_v32, %v6983_v50  ;;  %v6985_v32 = vld [vmem:[%s12114_s4 + $0x15c] sm:$0xf0] }
 0x5c1   :  { %v10462_v49 = vpop.f32.mrf.mxu0 }
 0x5c2   :  { %v3279_v21 = vadd.f32 %v10363_v42, %v3190_v13  ;;  %v8307_v42 = vld [vmem:[%s12114_s4 + $0xf4] sm:$0xf] }
 0x5c3   :  { %v6952_v23 = vor.u32 %v8307_v42, %v6949_v52 }
 0x5c4   :  { %v3368_v62 = vadd.f32 %v10384_v26, %v3279_v21  ;;  %v6905_v26 = vld [vmem:[%s12114_s4 + $0xc4] sm:$0xf0]  ;;  %3608 = vmatmul.bf16.gmra.mxu3 %v6984_v11  ;;  %v8306_v11 = vld [vmem:[%s12114_s4 + $0xec] sm:$0xf] }
 0x5c5   :  { %3692 = vmatmul.bf16.gmra.mxu0 %v6952_v23  ;;  %v6908_v33 = vor.u32 %v8297_v39, %v6905_v26 }
 0x5c6   :  { %v3451_v28 = vpop.f32.mrf.mxu1 }
 0x5c7   :  { %v10476_v30 = vadd.f32 %v3451_v28, %v3363_v10  ;;  %v3191_v43 = vpop.f32.mrf.mxu2  ;;  %v10480_v5 = vpop.f32.mrf.mxu3 }
 0x5c8   :  { %v3192_v14 = vadd.f32 %v3191_v43, %v9822_v46  ;;  %v6883_v46 = vld [vmem:[%s12114_s4 + $0x68] sm:$0xf] }
 0x5c9   :  { %3766 = vmatmul.bf16.vlgmr.msra.gmra.mxu1 %v6848_v40  ;;  %v3379_v59 = vpop.f32.mrf.mxu0 }
 0x5ca   :  { %v3281_v1 = vadd.f32 %v10381_v61, %v3192_v14  ;;  %v8294_v61 = vld [vmem:[%s12114_s4 + $0x88] sm:$0xf0] }
 0x5cb   :  { %v6884_v52 = vor.u32 %v8294_v61, %v6883_v46 }
 0x5cc   :  { %v3370_v53 = vadd.f32 %v3369_v54, %v3281_v1  ;;  %3509 = vmatmul.bf16.gmra.mxu2 %v6908_v33  ;;  %v7019_v54 = vld [vmem:[%s12114_s4 + $0x180] sm:$0xf] }
 0x5ce   :  { %v3453_v63 = vpop.f32.mrf.mxu1 }
 0x5cf   :  { %v10482_v13 = vadd.f32 %v3453_v63, %v3365_v41  ;;  %v3194_v17 = vpop.f32.mrf.mxu2  ;;  %v8329_v41 = vld [vmem:[%s12114_s4 + $0x1a0] sm:$0xf0]  ;;  %v10498_v51 = vpop.f32.mrf.mxu3 }
 0x5d0   :  { %v3195_v10 = vadd.f32 %v3194_v17, %v9844_v20  ;;  %v7020_v42 = vor.u32 %v8329_v41, %v7019_v54  ;;  %v7021_v41 = vld [vmem:[%s12114_s4 + $0x1a4] sm:$0xf0] }
 0x5d2   :  { %v3284_v21 = vadd.f32 %v10402_v8, %v3195_v10  ;;  %v10501_v50 = vpop.f32.mrf.mxu0  ;;  %v8316_v8 = vld [vmem:[%s12114_s4 + $0x13c] sm:$0xf] }
 0x5d3   :  { %v6988_v40 = vor.u32 %v8316_v8, %v6985_v32 }
 0x5d4   :  { %v3373_v20 = vadd.f32 %v10423_v31, %v3284_v21  ;;  %v6941_v31 = vld [vmem:[%s12114_s4 + $0x10c] sm:$0xf0]  ;;  %3613 = vmatmul.bf16.gmra.mxu3 %v7020_v42  ;;  %v8315_v42 = vld [vmem:[%s12114_s4 + $0x134] sm:$0xf] }
 0x5d5   :  { %3697 = vmatmul.bf16.gmra.mxu0 %v6988_v40  ;;  %v6944_v43 = vor.u32 %v8306_v11, %v6941_v31 }
 0x5d6   :  { %v3456_v39 = vpop.f32.mrf.mxu1 }
 0x5d7   :  { %v10515_v26 = vadd.f32 %v3456_v39, %v3368_v62  ;;  %v3196_v23 = vpop.f32.mrf.mxu2  ;;  %v10519_v33 = vpop.f32.mrf.mxu3 }
 0x5d8   :  { %v3197_v28 = vadd.f32 %v3196_v23, %v9886_v25  ;;  %v6919_v25 = vld [vmem:[%s12114_s4 + $0xb0] sm:$0xf] }
 0x5d9   :  { %3771 = vmatmul.bf16.gmra.mxu1 %v6884_v52 }
 0x5da   :  { %v3286_v14 = vadd.f32 %v10420_v45, %v3197_v28  ;;  %v3384_v63 = vpop.f32.mrf.mxu0  ;;  %v8303_v45 = vld [vmem:[%s12114_s4 + $0xd0] sm:$0xf0] }
 0x5db   :  { %v6920_v32 = vor.u32 %v8303_v45, %v6919_v25 }
 0x5dc   :  { %v3375_v1 = vadd.f32 %v3374_v56, %v3286_v14  ;;  %3514 = vmatmul.bf16.gmra.mxu2 %v6944_v43  ;;  %v7055_v56 = vld [vmem:[%s12114_s4 + $0x1c8] sm:$0xf] }
 0x5de   :  { %v3458_v17 = vpop.f32.mrf.mxu1 }
 0x5df   :  { %v10521_v10 = vadd.f32 %v3458_v17, %v3370_v53  ;;  %v3199_v46 = vpop.f32.mrf.mxu2  ;;  %v8338_v53 = vld [vmem:[%s12114_s4 + $0x1e8] sm:$0xf0]  ;;  %v10537_v61 = vpop.f32.mrf.mxu3 }
 0x5e0   :  { %v3200_v62 = vadd.f32 %v3199_v46, %v9912_v37  ;;  %v7056_v8 = vor.u32 %v8338_v53, %v7055_v56  ;;  %v7057_v53 = vld [vmem:[%s12114_s4 + $0x1ec] sm:$0xf0] }
 0x5e2   :  { %v3289_v21 = vadd.f32 %v10441_v47, %v3200_v62  ;;  %v10540_v54 = vpop.f32.mrf.mxu0  ;;  %v8325_v47 = vld [vmem:[%s12114_s4 + $0x184] sm:$0xf] }
 0x5e3   :  { %v7024_v52 = vor.u32 %v8325_v47, %v7021_v41 }
 0x5e4   :  { %v3378_v37 = vadd.f32 %v10462_v49, %v3289_v21  ;;  %v6977_v49 = vld [vmem:[%s12114_s4 + $0x154] sm:$0xf0]  ;;  %3618 = vmatmul.bf16.gmra.mxu3 %v7056_v8  ;;  %v8324_v8 = vld [vmem:[%s12114_s4 + $0x17c] sm:$0xf] }
 0x5e5   :  { %3702 = vmatmul.bf16.gmra.mxu0 %v7024_v52  ;;  %v6980_v23 = vor.u32 %v8315_v42, %v6977_v49 }
 0x5e6   :  { %v3461_v11 = vpop.f32.mrf.mxu1 }
 0x5e7   :  { %v10554_v31 = vadd.f32 %v3461_v11, %v3373_v20  ;;  %v3201_v40 = vpop.f32.mrf.mxu2  ;;  %v10558_v43 = vpop.f32.mrf.mxu3 }
 0x5e8   :  { %v3202_v39 = vadd.f32 %v3201_v40, %v9932_v24  ;;  %v6955_v24 = vld [vmem:[%s12114_s4 + $0xf8] sm:$0xf] }
 0x5e9   :  { %3776 = vmatmul.bf16.gmra.mxu1 %v6920_v32 }
 0x5ea   :  { %v3291_v28 = vadd.f32 %v10459_v48, %v3202_v39  ;;  %v3389_v17 = vpop.f32.mrf.mxu0  ;;  %v8312_v48 = vld [vmem:[%s12114_s4 + $0x118] sm:$0xf0] }
 0x5eb   :  { %v6956_v41 = vor.u32 %v8312_v48, %v6955_v24 }
 0x5ec   :  { %v3380_v14 = vadd.f32 %v3379_v59, %v3291_v28  ;;  %3519 = vmatmul.bf16.gmra.mxu2 %v6980_v23  ;;  %v7091_v59 = vld [vmem:[%s12114_s4 + $0x210] sm:$0xf] }
 0x5ee   :  { %v3463_v46 = vpop.f32.mrf.mxu1 }
 0x5ef   :  { %v10560_v62 = vadd.f32 %v3463_v46, %v3375_v1  ;;  %v3204_v25 = vpop.f32.mrf.mxu2  ;;  %v8347_v1 = vld [vmem:[%s12114_s4 + $0x230] sm:$0xf0]  ;;  %v10576_v45 = vpop.f32.mrf.mxu3 }
 0x5f0   :  { %v3205_v20 = vadd.f32 %v3204_v25, %v9960_v3  ;;  %v7092_v47 = vor.u32 %v8347_v1, %v7091_v59  ;;  %v7093_v1 = vld [vmem:[%s12114_s4 + $0x234] sm:$0xf0] }
 0x5f2   :  { %v3294_v21 = vadd.f32 %v10480_v5, %v3205_v20  ;;  %v10579_v56 = vpop.f32.mrf.mxu0  ;;  %v8334_v5 = vld [vmem:[%s12114_s4 + $0x1cc] sm:$0xf] }
 0x5f3   :  { %v7060_v32 = vor.u32 %v8334_v5, %v7057_v53 }
 0x5f4   :  { %v3383_v3 = vadd.f32 %v10501_v50, %v3294_v21  ;;  %v7013_v50 = vld [vmem:[%s12114_s4 + $0x19c] sm:$0xf0]  ;;  %3623 = vmatmul.bf16.gmra.mxu3 %v7092_v47  ;;  %v8333_v47 = vld [vmem:[%s12114_s4 + $0x1c4] sm:$0xf] }
 0x5f5   :  { %3707 = vmatmul.bf16.gmra.mxu0 %v7060_v32  ;;  %v7016_v40 = vor.u32 %v8324_v8, %v7013_v50 }
 0x5f6   :  { %v3466_v42 = vpop.f32.mrf.mxu1 }
 0x5f7   :  { %v10593_v49 = vadd.f32 %v3466_v42, %v3378_v37  ;;  %v3206_v52 = vpop.f32.mrf.mxu2  ;;  %v10597_v23 = vpop.f32.mrf.mxu3 }
 0x5f8   :  { %v3207_v11 = vadd.f32 %v3206_v52, %v9966_v19  ;;  %v6991_v19 = vld [vmem:[%s12114_s4 + $0x140] sm:$0xf] }
 0x5f9   :  { %3781 = vmatmul.bf16.gmra.mxu1 %v6956_v41 }
 0x5fa   :  { %v3296_v39 = vadd.f32 %v10498_v51, %v3207_v11  ;;  %v3394_v46 = vpop.f32.mrf.mxu0  ;;  %v8321_v51 = vld [vmem:[%s12114_s4 + $0x160] sm:$0xf0] }
 0x5fb   :  { %v6992_v53 = vor.u32 %v8321_v51, %v6991_v19 }
 0x5fc   :  { %v3385_v28 = vadd.f32 %v3384_v63, %v3296_v39  ;;  %3524 = vmatmul.bf16.gmra.mxu2 %v7016_v40  ;;  %v7127_v63 = vld [vmem:[%s12114_s4 + $0x258] sm:$0xf] }
 0x5fe   :  { %v3468_v25 = vpop.f32.mrf.mxu1 }
 0x5ff   :  { %v10599_v20 = vadd.f32 %v3468_v25, %v3380_v14  ;;  %v3209_v24 = vpop.f32.mrf.mxu2  ;;  %v8356_v14 = vld [vmem:[%s12114_s4 + $0x278] sm:$0xf0]  ;;  %v10615_v48 = vpop.f32.mrf.mxu3 }
 0x600   :  { %v3210_v37 = vadd.f32 %v3209_v24, %v9994_v15  ;;  %v7128_v5 = vor.u32 %v8356_v14, %v7127_v63  ;;  %v7129_v14 = vld [vmem:[%s12114_s4 + $0x27c] sm:$0xf0] }
 0x602   :  { %v3299_v21 = vadd.f32 %v10519_v33, %v3210_v37  ;;  %v10618_v59 = vpop.f32.mrf.mxu0  ;;  %v8343_v33 = vld [vmem:[%s12114_s4 + $0x214] sm:$0xf] }
 0x603   :  { %v7096_v41 = vor.u32 %v8343_v33, %v7093_v1 }
 0x604   :  { %v3388_v15 = vadd.f32 %v10540_v54, %v3299_v21  ;;  %v7049_v54 = vld [vmem:[%s12114_s4 + $0x1e4] sm:$0xf0]  ;;  %3628 = vmatmul.bf16.gmra.mxu3 %v7128_v5  ;;  %v8342_v5 = vld [vmem:[%s12114_s4 + $0x20c] sm:$0xf] }
 0x605   :  { %3712 = vmatmul.bf16.gmra.mxu0 %v7096_v41  ;;  %v7052_v52 = vor.u32 %v8333_v47, %v7049_v54 }
 0x606   :  { %v3471_v8 = vpop.f32.mrf.mxu1 }
 0x607   :  { %v10632_v50 = vadd.f32 %v3471_v8, %v3383_v3  ;;  %v3211_v32 = vpop.f32.mrf.mxu2  ;;  %v10636_v40 = vpop.f32.mrf.mxu3 }
 0x608   :  { %v3212_v42 = vadd.f32 %v3211_v32, %v10010_v27  ;;  %v7027_v27 = vld [vmem:[%s12114_s4 + $0x188] sm:$0xf] }
 0x609   :  { %3786 = vmatmul.bf16.gmra.mxu1 %v6992_v53 }
 0x60a   :  { %v3301_v11 = vadd.f32 %v10537_v61, %v3212_v42  ;;  %v3399_v25 = vpop.f32.mrf.mxu0  ;;  %v8330_v61 = vld [vmem:[%s12114_s4 + $0x1a8] sm:$0xf0] }
 0x60b   :  { %v7028_v1 = vor.u32 %v8330_v61, %v7027_v27 }
 0x60c   :  { %v3390_v39 = vadd.f32 %v3389_v17, %v3301_v11  ;;  %3529 = vmatmul.bf16.gmra.mxu2 %v7052_v52  ;;  %v7163_v17 = vld [vmem:[%s12114_s4 + $0x2a0] sm:$0xf] }
 0x60e   :  { %v3473_v24 = vpop.f32.mrf.mxu1 }
 0x60f   :  { %v10638_v37 = vadd.f32 %v3473_v24, %v3385_v28  ;;  %v3214_v19 = vpop.f32.mrf.mxu2  ;;  %v8365_v28 = vld [vmem:[%s12114_s4 + $0x2c0] sm:$0xf0]  ;;  %v10654_v51 = vpop.f32.mrf.mxu3 }
 0x610   :  { %v3215_v3 = vadd.f32 %v3214_v19, %v10026_v22  ;;  %v7164_v33 = vor.u32 %v8365_v28, %v7163_v17  ;;  %v7165_v28 = vld [vmem:[%s12114_s4 + $0x2c4] sm:$0xf0] }
 0x612   :  { %v3304_v21 = vadd.f32 %v10558_v43, %v3215_v3  ;;  %v10657_v63 = vpop.f32.mrf.mxu0  ;;  %v8352_v43 = vld [vmem:[%s12114_s4 + $0x25c] sm:$0xf] }
 0x613   :  { %v7132_v53 = vor.u32 %v8352_v43, %v7129_v14 }
 0x614   :  { %v3393_v22 = vadd.f32 %v10579_v56, %v3304_v21  ;;  %v7085_v56 = vld [vmem:[%s12114_s4 + $0x22c] sm:$0xf0]  ;;  %3633 = vmatmul.bf16.gmra.mxu3 %v7164_v33  ;;  %v8351_v33 = vld [vmem:[%s12114_s4 + $0x254] sm:$0xf] }
 0x615   :  { %3717 = vmatmul.bf16.gmra.mxu0 %v7132_v53  ;;  %v7088_v32 = vor.u32 %v8342_v5, %v7085_v56 }
 0x616   :  { %v3476_v47 = vpop.f32.mrf.mxu1 }
 0x617   :  { %v10671_v54 = vadd.f32 %v3476_v47, %v3388_v15  ;;  %v3216_v41 = vpop.f32.mrf.mxu2  ;;  %v10675_v52 = vpop.f32.mrf.mxu3 }
 0x618   :  { %v3217_v8 = vadd.f32 %v3216_v41, %v10056_v2  ;;  %v7063_v2 = vld [vmem:[%s12114_s4 + $0x1d0] sm:$0xf] }
 0x619   :  { %3791 = vmatmul.bf16.gmra.mxu1 %v7028_v1 }
 0x61a   :  { %v3306_v42 = vadd.f32 %v10576_v45, %v3217_v8  ;;  %v3680_v24 = vpop.f32.mrf.mxu0  ;;  %v8339_v45 = vld [vmem:[%s12114_s4 + $0x1f0] sm:$0xf0] }
 0x61b   :  { %v7064_v14 = vor.u32 %v8339_v45, %v7063_v2 }
 0x61c   :  { %v3395_v11 = vadd.f32 %v3394_v46, %v3306_v42  ;;  %3534 = vmatmul.bf16.gmra.mxu2 %v7088_v32  ;;  %v7199_v46 = vld [vmem:[%s12114_s4 + $0x2e8] sm:$0xf] }
 0x61e   :  { %v3478_v19 = vpop.f32.mrf.mxu1 }
 0x61f   :  { %v10677_v3 = vadd.f32 %v3478_v19, %v3390_v39  ;;  %v3219_v27 = vpop.f32.mrf.mxu2  ;;  %v8374_v39 = vld [vmem:[%s12114_s4 + $0x308] sm:$0xf0]  ;;  %v10693_v61 = vpop.f32.mrf.mxu3 }
 0x620   :  { %v3220_v15 = vadd.f32 %v3219_v27, %v10070_v9  ;;  %v7200_v43 = vor.u32 %v8374_v39, %v7199_v46  ;;  %v7201_v39 = vld [vmem:[%s12114_s4 + $0x30c] sm:$0xf0] }
 0x622   :  { %v3309_v21 = vadd.f32 %v10597_v23, %v3220_v15  ;;  %v10696_v17 = vpop.f32.mrf.mxu0  ;;  %v8361_v23 = vld [vmem:[%s12114_s4 + $0x2a4] sm:$0xf] }
 0x623   :  { %v7168_v1 = vor.u32 %v8361_v23, %v7165_v28 }
 0x624   :  { %v3398_v9 = vadd.f32 %v10618_v59, %v3309_v21  ;;  %v7121_v59 = vld [vmem:[%s12114_s4 + $0x274] sm:$0xf0]  ;;  %3638 = vmatmul.bf16.gmra.mxu3 %v7200_v43  ;;  %v8360_v43 = vld [vmem:[%s12114_s4 + $0x29c] sm:$0xf] }
 0x625   :  { %3722 = vmatmul.bf16.gmra.mxu0 %v7168_v1  ;;  %v7124_v41 = vor.u32 %v8351_v33, %v7121_v59 }
 0x626   :  { %v3481_v5 = vpop.f32.mrf.mxu1 }
 0x627   :  { %v10710_v56 = vadd.f32 %v3481_v5, %v3393_v22  ;;  %v3221_v53 = vpop.f32.mrf.mxu2  ;;  %v10714_v32 = vpop.f32.mrf.mxu3 }
 0x628   :  { %v3222_v47 = vadd.f32 %v3221_v53, %v10106_v38  ;;  %v7099_v38 = vld [vmem:[%s12114_s4 + $0x218] sm:$0xf] }
 0x629   :  { %3796 = vmatmul.bf16.gmra.mxu1 %v7064_v14 }
 0x62a   :  { %v3311_v8 = vadd.f32 %v10615_v48, %v3222_v47  ;;  %v3685_v19 = vpop.f32.mrf.mxu0  ;;  %v8348_v48 = vld [vmem:[%s12114_s4 + $0x238] sm:$0xf0] }
 0x62b   :  { %v7100_v28 = vor.u32 %v8348_v48, %v7099_v38 }
 0x62c   :  { %v3400_v42 = vadd.f32 %v3399_v25, %v3311_v8  ;;  %3539 = vmatmul.bf16.gmra.mxu2 %v7124_v41  ;;  %v7235_v25 = vld [vmem:[%s12114_s4 + $0x330] sm:$0xf] }
 0x62e   :  { %v3483_v27 = vpop.f32.mrf.mxu1 }
 0x62f   :  { %v10716_v15 = vadd.f32 %v3483_v27, %v3395_v11  ;;  %v3500_v2 = vpop.f32.mrf.mxu2  ;;  %v8383_v11 = vld [vmem:[%s12114_s4 + $0x350] sm:$0xf0]  ;;  %v10732_v45 = vpop.f32.mrf.mxu3 }
 0x630   :  { %v3501_v22 = vadd.f32 %v3500_v2, %v10148_v34  ;;  %v7236_v23 = vor.u32 %v8383_v11, %v7235_v25  ;;  %v7237_v11 = vld [vmem:[%s12114_s4 + $0x354] sm:$0xf0] }
 0x632   :  { %v3590_v21 = vadd.f32 %v10636_v40, %v3501_v22  ;;  %v10735_v46 = vpop.f32.mrf.mxu0  ;;  %v8370_v40 = vld [vmem:[%s12114_s4 + $0x2ec] sm:$0xf] }
 0x633   :  { %v7204_v14 = vor.u32 %v8370_v40, %v7201_v39 }
 0x634   :  { %v3679_v34 = vadd.f32 %v10657_v63, %v3590_v21  ;;  %v7157_v63 = vld [vmem:[%s12114_s4 + $0x2bc] sm:$0xf0]  ;;  %3643 = vmatmul.bf16.gmra.mxu3 %v7236_v23  ;;  %v8369_v23 = vld [vmem:[%s12114_s4 + $0x2e4] sm:$0xf] }
 0x635   :  { %3727 = vmatmul.bf16.gmra.mxu0 %v7204_v14  ;;  %v7160_v53 = vor.u32 %v8360_v43, %v7157_v63 }
 0x636   :  { %v3486_v33 = vpop.f32.mrf.mxu1 }
 0x637   :  { %v10749_v59 = vadd.f32 %v3486_v33, %v3398_v9  ;;  %v3502_v1 = vpop.f32.mrf.mxu2  ;;  %v10753_v41 = vpop.f32.mrf.mxu3 }
 0x638   :  { %v3503_v5 = vadd.f32 %v3502_v1, %v10159_v57  ;;  %v7135_v57 = vld [vmem:[%s12114_s4 + $0x260] sm:$0xf] }
 0x639   :  { %3801 = vmatmul.bf16.gmra.mxu1 %v7100_v28 }
 0x63a   :  { %v3592_v47 = vadd.f32 %v10654_v51, %v3503_v5  ;;  %v3690_v27 = vpop.f32.mrf.mxu0  ;;  %v8357_v51 = vld [vmem:[%s12114_s4 + $0x280] sm:$0xf0] }
 0x63b   :  { %v7136_v39 = vor.u32 %v8357_v51, %v7135_v57 }
 0x63c   :  { %v3681_v8 = vadd.f32 %v3680_v24, %v3592_v47  ;;  %3544 = vmatmul.bf16.gmra.mxu2 %v7160_v53  ;;  %v7271_v24 = vld [vmem:[%s12114_s4 + $0x378] sm:$0xf] }
 0x63e   :  { %v3488_v2 = vpop.f32.mrf.mxu1 }
 0x63f   :  { %v10755_v22 = vadd.f32 %v3488_v2, %v3400_v42  ;;  %v3505_v38 = vpop.f32.mrf.mxu2  ;;  %v8392_v42 = vld [vmem:[%s12114_s4 + $0x398] sm:$0xf0]  ;;  %v10771_v48 = vpop.f32.mrf.mxu3 }
 0x640   :  { %v3506_v9 = vadd.f32 %v3505_v38, %v10194_v29  ;;  %v7272_v40 = vor.u32 %v8392_v42, %v7271_v24  ;;  %v7273_v42 = vld [vmem:[%s12114_s4 + $0x39c] sm:$0xf0] }
 0x642   :  { %v3595_v21 = vadd.f32 %v10675_v52, %v3506_v9  ;;  %v10774_v25 = vpop.f32.mrf.mxu0  ;;  %v8379_v52 = vld [vmem:[%s12114_s4 + $0x334] sm:$0xf] }
 0x643   :  { %v7240_v28 = vor.u32 %v8379_v52, %v7237_v11 }
 0x644   :  { %v3684_v29 = vadd.f32 %v10696_v17, %v3595_v21  ;;  %v7193_v17 = vld [vmem:[%s12114_s4 + $0x304] sm:$0xf0]  ;;  %3648 = vmatmul.bf16.gmra.mxu3 %v7272_v40  ;;  %v8378_v40 = vld [vmem:[%s12114_s4 + $0x32c] sm:$0xf] }
 0x645   :  { %3732 = vmatmul.bf16.gmra.mxu0 %v7240_v28  ;;  %v7196_v1 = vor.u32 %v8369_v23, %v7193_v17 }
 0x646   :  { %v3767_v43 = vpop.f32.mrf.mxu1 }
 0x647   :  { %v10788_v63 = vadd.f32 %v3767_v43, %v3679_v34  ;;  %v3507_v14 = vpop.f32.mrf.mxu2  ;;  %v10792_v53 = vpop.f32.mrf.mxu3 }
 0x648   :  { %v3508_v33 = vadd.f32 %v3507_v14, %v10205_v55  ;;  %v7171_v55 = vld [vmem:[%s12114_s4 + $0x2a8] sm:$0xf] }
 0x649   :  { %3806 = vmatmul.bf16.gmra.mxu1 %v7136_v39 }
 0x64a   :  { %v3597_v5 = vadd.f32 %v10693_v61, %v3508_v33  ;;  %v3695_v2 = vpop.f32.mrf.mxu0  ;;  %v8366_v61 = vld [vmem:[%s12114_s4 + $0x2c8] sm:$0xf0] }
 0x64b   :  { %v7172_v11 = vor.u32 %v8366_v61, %v7171_v55 }
 0x64c   :  { %v3686_v47 = vadd.f32 %v3685_v19, %v3597_v5  ;;  %3549 = vmatmul.bf16.gmra.mxu2 %v7196_v1  ;;  %v7307_v19 = vld [vmem:[%s12114_s4 + $0x3c0] sm:$0xf] }
 0x64e   :  { %v3769_v38 = vpop.f32.mrf.mxu1 }
 0x64f   :  { %v10794_v9 = vadd.f32 %v3769_v38, %v3681_v8  ;;  %v3510_v57 = vpop.f32.mrf.mxu2  ;;  %v8401_v8 = vld [vmem:[%s12114_s4 + $0x3e0] sm:$0xf0]  ;;  %v10810_v51 = vpop.f32.mrf.mxu3 }
 0x650   :  { %v3511_v34 = vadd.f32 %v3510_v57, %v10240_v18  ;;  %v7308_v52 = vor.u32 %v8401_v8, %v7307_v19  ;;  %v7309_v8 = vld [vmem:[%s12114_s4 + $0x3e4] sm:$0xf0] }
 0x652   :  { %v3600_v21 = vadd.f32 %v10714_v32, %v3511_v34  ;;  %v10813_v24 = vpop.f32.mrf.mxu0  ;;  %v8388_v32 = vld [vmem:[%s12114_s4 + $0x37c] sm:$0xf] }
 0x653   :  { %v7276_v39 = vor.u32 %v8388_v32, %v7273_v42 }
 0x654   :  { %v3689_v18 = vadd.f32 %v10735_v46, %v3600_v21  ;;  %v7229_v46 = vld [vmem:[%s12114_s4 + $0x34c] sm:$0xf0]  ;;  %3653 = vmatmul.bf16.gmra.mxu3 %v7308_v52  ;;  %v8387_v52 = vld [vmem:[%s12114_s4 + $0x374] sm:$0xf] }
 0x655   :  { %3737 = vmatmul.bf16.gmra.mxu0 %v7276_v39  ;;  %v7232_v14 = vor.u32 %v8378_v40, %v7229_v46 }
 0x656   :  { %v3772_v23 = vpop.f32.mrf.mxu1 }
 0x657   :  { %v10827_v17 = vadd.f32 %v3772_v23, %v3684_v29  ;;  %v3512_v28 = vpop.f32.mrf.mxu2  ;;  %v10831_v1 = vpop.f32.mrf.mxu3 }
 0x658   :  { %v3513_v43 = vadd.f32 %v3512_v28, %v10247_v35  ;;  %v7207_v35 = vld [vmem:[%s12114_s4 + $0x2f0] sm:$0xf] }
 0x659   :  { %3811 = vmatmul.bf16.gmra.mxu1 %v7172_v11  ;;  %v7265_v11 = vld [vmem:[%s12114_s4 + $0x394] sm:$0xf0] }
 0x65a   :  { %v3602_v33 = vadd.f32 %v10732_v45, %v3513_v43  ;;  %v10833_v38 = vpop.f32.mrf.mxu0  ;;  %v8375_v45 = vld [vmem:[%s12114_s4 + $0x310] sm:$0xf0]  ;;  %v7268_v28 = vor.u32 %v8387_v52, %v7265_v11 }
 0x65b   :  { %v7208_v42 = vor.u32 %v8375_v45, %v7207_v35 }
 0x65c   :  { %v3691_v5 = vadd.f32 %v3690_v27, %v3602_v33  ;;  %3554 = vmatmul.bf16.gmra.mxu2 %v7232_v14  ;;  %v7343_v27 = vld [vmem:[%s12114_s4 + $0x408] sm:$0xf] }
 0x65e   :  { %v3774_v57 = vpop.f32.mrf.mxu1 }
 0x65f   :  { %v10835_v34 = vadd.f32 %v3774_v57, %v3686_v47  ;;  %v3515_v29 = vpop.f32.mrf.mxu2  ;;  %v8410_v47 = vld [vmem:[%s12114_s4 + $0x428] sm:$0xf0]  ;;  %v10851_v61 = vpop.f32.mrf.mxu3 }
 0x660   :  { %v3516_v55 = vadd.f32 %v3515_v29, %v10280_v58  ;;  %v7344_v32 = vor.u32 %v8410_v47, %v7343_v27  ;;  %v7345_v47 = vld [vmem:[%s12114_s4 + $0x42c] sm:$0xf0] }
 0x662   :  { %v3605_v21 = vadd.f32 %v10753_v41, %v3516_v55  ;;  %v3703_v19 = vpop.f32.mrf.mxu0  ;;  %v8397_v41 = vld [vmem:[%s12114_s4 + $0x3c4] sm:$0xf] }
 0x664   :  { %v3694_v58 = vadd.f32 %v10774_v25, %v3605_v21  ;;  %v7312_v25 = vor.u32 %v8397_v41, %v7309_v8  ;;  %3658 = vmatmul.bf16.gmra.mxu3 %v7344_v32  ;;  %v8396_v32 = vld [vmem:[%s12114_s4 + $0x3bc] sm:$0xf] }
 0x666   :  { %v3777_v40 = vpop.f32.mrf.mxu1  ;;  %3742 = vmatmul.bf16.gmra.mxu0 %v7312_v25 }
 0x667   :  { %v10866_v46 = vadd.f32 %v3777_v40, %v3689_v18  ;;  %v3517_v39 = vpop.f32.mrf.mxu2  ;;  %v10870_v14 = vpop.f32.mrf.mxu3 }
 0x668   :  { %v3518_v23 = vadd.f32 %v3517_v39, %v10287_v4  ;;  %v7243_v4 = vld [vmem:[%s12114_s4 + $0x338] sm:$0xf] }
 0x669   :  { %3816 = vmatmul.bf16.gmra.mxu1 %v7208_v42  ;;  %v7301_v42 = vld [vmem:[%s12114_s4 + $0x3dc] sm:$0xf0] }
 0x66a   :  { %v3607_v43 = vadd.f32 %v10771_v48, %v3518_v23  ;;  %v10872_v57 = vpop.f32.mrf.mxu0  ;;  %v8384_v48 = vld [vmem:[%s12114_s4 + $0x358] sm:$0xf0]  ;;  %v7304_v39 = vor.u32 %v8396_v32, %v7301_v42 }
 0x66b   :  { %v7244_v8 = vor.u32 %v8384_v48, %v7243_v4  ;;  %v7393_v48 = vld [vmem:[#allocation8 + $0x8] sm:$0xf0] }
 0x66c   :  { %v3696_v33 = vadd.f32 %v3695_v2, %v3607_v43  ;;  %3559 = vmatmul.bf16.gmra.mxu2 %v7268_v28  ;;  %v7379_v2 = vld [vmem:[%s12114_s4 + $0x450] sm:$0xf] }
 0x66e   :  { %v3779_v29 = vpop.f32.mrf.mxu1 }
 0x66f   :  { %v10874_v55 = vadd.f32 %v3779_v29, %v3691_v5  ;;  %v3520_v18 = vpop.f32.mrf.mxu2  ;;  %v8419_v5 = vld [vmem:[%s12114_s4 + $0x470] sm:$0xf0]  ;;  %v10890_v45 = vpop.f32.mrf.mxu3 }
 0x670   :  { %v3521_v35 = vadd.f32 %v3520_v18, %v10320_v7  ;;  %v7380_v41 = vor.u32 %v8419_v5, %v7379_v2 }
 0x672   :  { %v3610_v21 = vadd.f32 %v10792_v53, %v3521_v35  ;;  %v3708_v27 = vpop.f32.mrf.mxu0  ;;  %v8406_v53 = vld [vmem:[%s12114_s4 + $0x40c] sm:$0xf] }
 0x674   :  { %v3699_v7 = vadd.f32 %v10813_v24, %v3610_v21  ;;  %v7348_v24 = vor.u32 %v8406_v53, %v7345_v47  ;;  %3663 = vmatmul.bf16.gmra.mxu3 %v7380_v41  ;;  %v8421_v21 = vld [vmem:[#allocation8 + $0x4] sm:$0xf]  ;;  %v7381_v53 = vld [vmem:[%s12114_s4 + $0x474] sm:$0xf0] }
 0x675   :  { %v7396_v47 = vor.u32 %v8421_v21, %v7393_v48  ;;  %v8405_v41 = vld [vmem:[%s12114_s4 + $0x404] sm:$0xf] }
 0x676   :  { %v3782_v52 = vpop.f32.mrf.mxu1  ;;  %3747 = vmatmul.bf16.gmra.mxu0 %v7348_v24 }
 0x677   :  { %v10905_v11 = vadd.f32 %v3782_v52, %v3694_v58  ;;  %v3522_v25 = vpop.f32.mrf.mxu2  ;;  %v10911_v28 = vpop.f32.mrf.mxu3 }
 0x678   :  { %v3523_v40 = vadd.f32 %v3522_v25, %v10326_v6  ;;  %v7279_v6 = vld [vmem:[%s12114_s4 + $0x380] sm:$0xf] }
 0x679   :  { %3821 = vmatmul.bf16.gmra.mxu1 %v7244_v8  ;;  %v7337_v8 = vld [vmem:[%s12114_s4 + $0x424] sm:$0xf0] }
 0x67a   :  { %v10909_v23 = vadd.f32 %v10810_v51, %v3523_v40  ;;  %v10913_v43 = vpop.f32.mrf.mxu0  ;;  %v8393_v51 = vld [vmem:[%s12114_s4 + $0x3a0] sm:$0xf0]  ;;  %v7340_v25 = vor.u32 %v8405_v41, %v7337_v8 }
 0x67b   :  { %12193 = vst [vmem:[#allocation16_spill] sm:$0xff] %v10913_v43 }
 0x67c   :  { %3564 = vmatmul.bf16.gmra.mxu2 %v7304_v39 }
 0x67e   :  { %v3784_v29 = vpop.f32.mrf.mxu1 }
 0x67f   :  { %v10915_v18 = vadd.f32 %v3784_v29, %v3696_v33  ;;  %v3525_v58 = vpop.f32.mrf.mxu2  ;;  %v10925_v2 = vpop.f32.mrf.mxu3 }
 0x680   :  { %v3526_v35 = vadd.f32 %v3525_v58, %v10359_v44  ;;  %v8415_v44 = vld [vmem:[%s12114_s4 + $0x454] sm:$0xf] }
 0x682   :  { %v3615_v4 = vadd.f32 %v10831_v1, %v3526_v35  ;;  %v3713_v33 = vpop.f32.mrf.mxu0  ;;  %v7280_v1 = vor.u32 %v8393_v51, %v7279_v6  ;;  %v7315_v6 = vld [vmem:[%s12114_s4 + $0x3c8] sm:$0xf]  ;;  %v7401_v51 = vld [vmem:[#allocation8 + $0x18] sm:$0xf0] }
 0x684   :  { %v3704_v5 = vadd.f32 %v3703_v19, %v3615_v4  ;;  %v7384_v19 = vor.u32 %v8415_v44, %v7381_v53  ;;  %4168 = vmatmul.bf16.vlgmr.msra.gmra.mxu3 %v7396_v47  ;;  %v8423_v4 = vld [vmem:[#allocation8 + $0x14] sm:$0xf]  ;;  %v7373_v47 = vld [vmem:[%s12114_s4 + $0x46c] sm:$0xf0] }
 0x685   :  { %v7404_v44 = vor.u32 %v8423_v4, %v7401_v51 }
 0x686   :  { %v3787_v32 = vpop.f32.mrf.mxu1  ;;  %3752 = vmatmul.bf16.gmra.mxu0 %v7384_v19 }
 0x687   :  { %v10939_v42 = vadd.f32 %v3787_v32, %v3699_v7  ;;  %v3527_v24 = vpop.f32.mrf.mxu2  ;;  %v3629_v39 = vpop.f32.mrf.mxu3 }
 0x688   :  { %v3528_v52 = vadd.f32 %v3527_v24, %v10365_v36 }
 0x689   :  { %3826 = vmatmul.bf16.gmra.mxu1 %v7280_v1 }
 0x68a   :  { %v10943_v40 = vadd.f32 %v10851_v61, %v3528_v52  ;;  %v10945_v29 = vpop.f32.mrf.mxu0  ;;  %v8402_v61 = vld [vmem:[%s12114_s4 + $0x3e8] sm:$0xf0] }
 0x68b   :  { %12194 = vst [vmem:[#allocation17_spill] sm:$0xff] %v10945_v29  ;;  %v7316_v53 = vor.u32 %v8402_v61, %v7315_v6  ;;  %v8425_v6 = vld [vmem:[#allocation8 + $0x24] sm:$0xf] }
 0x68c   :  { %3569 = vmatmul.bf16.gmra.mxu2 %v7340_v25 }
 0x68e   :  { %v10947_v58 = vpop.f32.mrf.mxu1 }
 0x68f   :  { %v3530_v35 = vpop.f32.mrf.mxu2  ;;  %v10957_v21 = vpop.f32.mrf.mxu3 }
 0x690   :  { %v3531_v7 = vadd.f32 %v3530_v35, %v10398_v0  ;;  %v8414_v0 = vld [vmem:[%s12114_s4 + $0x44c] sm:$0xf] }
 0x691   :  { %v7376_v32 = vor.u32 %v8414_v0, %v7373_v47  ;;  %v8422_v0 = vld [vmem:[#allocation8 + $0x4] sm:$0xf0] }
 0x692   :  { %v3620_v36 = vadd.f32 %v10870_v14, %v3531_v7  ;;  %v3718_v14 = vpop.f32.mrf.mxu0 }
 0x694   :  { %v3709_v48 = vadd.f32 %v3708_v27, %v3620_v36  ;;  %4173 = vmatmul.bf16.gmra.mxu3 %v7404_v44  ;;  %v7409_v36 = vld [vmem:[#allocation8 + $0x28] sm:$0xf0] }
 0x695   :  { %v7412_v51 = vor.u32 %v8425_v6, %v7409_v36  ;;  %v7417_v6 = vld [vmem:[#allocation8 + $0x38] sm:$0xf0] }
 0x696   :  { %v3792_v1 = vpop.f32.mrf.mxu1 }
 0x697   :  { %v10965_v41 = vadd.f32 %v3792_v1, %v3704_v5  ;;  %v3532_v8 = vpop.f32.mrf.mxu2  ;;  %v3634_v24 = vpop.f32.mrf.mxu3  ;;  %v7351_v5 = vld [vmem:[%s12114_s4 + $0x410] sm:$0xf] }
 0x698   :  { %v3533_v19 = vadd.f32 %v3532_v8, %v10404_v60 }
 0x699   :  { %3831 = vmatmul.bf16.gmra.mxu1 %v7316_v53  ;;  %v7391_v53 = vld [vmem:[#allocation8] sm:$0xf] }
 0x69a   :  { %v10969_v27 = vadd.f32 %v10890_v45, %v3533_v19  ;;  %v10973_v35 = vpop.f32.mrf.mxu0  ;;  %v8411_v45 = vld [vmem:[%s12114_s4 + $0x430] sm:$0xf0]  ;;  %v7392_v19 = vor.u32 %v8422_v0, %v7391_v53  ;;  %v7399_v0 = vld [vmem:[#allocation8 + $0x10] sm:$0xf] }
 0x69b   :  { %12195 = vst [vmem:[#allocation18_spill] sm:$0xff] %v10973_v35  ;;  %v7352_v44 = vor.u32 %v8411_v45, %v7351_v5  ;;  %v8427_v45 = vld [vmem:[#allocation8 + $0x34] sm:$0xf] }
 0x69c   :  { %3574 = vmatmul.bf16.gmra.mxu2 %v7376_v32 }
 0x69e   :  { %v10971_v52 = vpop.f32.mrf.mxu1 }
 0x69f   :  { %v3535_v25 = vpop.f32.mrf.mxu2  ;;  %v3636_v61 = vpop.f32.mrf.mxu3 }
 0x6a0   :  { %v3536_v7 = vadd.f32 %v3535_v25, %v10437_v16 }
 0x6a2   :  { %v3625_v60 = vadd.f32 %v10911_v28, %v3536_v7  ;;  %v3723_v28 = vpop.f32.mrf.mxu0 }
 0x6a4   :  { %v3714_v4 = vadd.f32 %v3713_v33, %v3625_v60  ;;  %4178 = vmatmul.bf16.gmra.mxu3 %v7412_v51 }
 0x6a6   :  { %v3797_v47 = vpop.f32.mrf.mxu1 }
 0x6a7   :  { %v10983_v16 = vadd.f32 %v3797_v47, %v3709_v48  ;;  %v3537_v1 = vpop.f32.mrf.mxu2  ;;  %v3639_v25 = vpop.f32.mrf.mxu3  ;;  %v7387_v48 = vld [vmem:[%s12114_s4 + $0x458] sm:$0xf] }
 0x6a8   :  { %v3538_v8 = vadd.f32 %v3537_v1, %v10443_v12  ;;  %v8420_v12 = vld [vmem:[%s12114_s4 + $0x478] sm:$0xf0]  ;;  %v8424_v47 = vld [vmem:[#allocation8 + $0x14] sm:$0xf0] }
 0x6a9   :  { %3836 = vmatmul.bf16.gmra.mxu1 %v7352_v44  ;;  %v7420_v44 = vor.u32 %v8427_v45, %v7417_v6  ;;  %v7388_v53 = vor.u32 %v8420_v12, %v7387_v48  ;;  %v7425_v45 = vld [vmem:[#allocation8 + $0x48] sm:$0xf0] }
 0x6aa   :  { %v10987_v32 = vadd.f32 %v10925_v2, %v3538_v8  ;;  %v10998_v2 = vpop.f32.mrf.mxu0 }
 0x6ab   :  { %12198 = vst [vmem:[#allocation21_spill] sm:$0xff] %v10998_v2 }
 0x6ac   :  { %12196 = vst [vmem:[#allocation19_spill] sm:$0xff] %v10987_v32  ;;  %4079 = vmatmul.bf16.vlgmr.msrb.gmra.mxu2 %v7392_v19  ;;  %v7400_v19 = vor.u32 %v8424_v47, %v7399_v0  ;;  %v7407_v0 = vld [vmem:[#allocation8 + $0x20] sm:$0xf] }
 0x6ae   :  { %v10989_v33 = vpop.f32.mrf.mxu1 }
 0x6af   :  { %12197 = vst [vmem:[#allocation20_spill] sm:$0xff] %v10989_v33  ;;  %v3540_v7 = vpop.f32.mrf.mxu2  ;;  %v3641_v36 = vpop.f32.mrf.mxu3 }
 0x6b0   :  { %v3541_v5 = vadd.f32 %v3540_v7, %v10476_v30 }
 0x6b2   :  { %v3630_v60 = vadd.f32 %v3629_v39, %v3541_v5  ;;  %v3728_v2 = vpop.f32.mrf.mxu0 }
 0x6b4   :  { %v3719_v51 = vadd.f32 %v3718_v14, %v3630_v60  ;;  %4183 = vmatmul.bf16.gmra.mxu3 %v7420_v44  ;;  %v8426_v44 = vld [vmem:[#allocation8 + $0x24] sm:$0xf0] }
 0x6b6   :  { %v3802_v30 = vpop.f32.mrf.mxu1 }
 0x6b7   :  { %v11000_v1 = vadd.f32 %v3802_v30, %v3714_v4  ;;  %v3542_v8 = vpop.f32.mrf.mxu2  ;;  %v3644_v5 = vpop.f32.mrf.mxu3  ;;  %v8429_v4 = vld [vmem:[#allocation8 + $0x44] sm:$0xf] }
 0x6b8   :  { %v3543_v39 = vadd.f32 %v3542_v8, %v10482_v13  ;;  %v7428_v13 = vor.u32 %v8429_v4, %v7425_v45  ;;  %v7433_v4 = vld [vmem:[#allocation8 + $0x58] sm:$0xf0] }
 0x6b9   :  { %12199 = vst [vmem:[#allocation22_spill] sm:$0xff] %v11000_v1  ;;  %3841 = vmatmul.bf16.gmra.mxu1 %v7388_v53 }
 0x6ba   :  { %v11004_v7 = vadd.f32 %v10957_v21, %v3543_v39  ;;  %v11011_v8 = vpop.f32.mrf.mxu0 }
 0x6bb   :  { %12203 = vst [vmem:[#allocation26_spill] sm:$0xff] %v11011_v8 }
 0x6bc   :  { %12200 = vst [vmem:[#allocation23_spill] sm:$0xff] %v11004_v7  ;;  %4084 = vmatmul.bf16.gmra.mxu2 %v7400_v19  ;;  %v7408_v19 = vor.u32 %v8426_v44, %v7407_v0  ;;  %v7415_v7 = vld [vmem:[#allocation8 + $0x30] sm:$0xf] }
 0x6be   :  { %v11006_v14 = vpop.f32.mrf.mxu1 }
 0x6bf   :  { %12201 = vst [vmem:[#allocation24_spill] sm:$0xff] %v11006_v14  ;;  %v3545_v48 = vpop.f32.mrf.mxu2  ;;  %v3646_v6 = vpop.f32.mrf.mxu3 }
 0x6c0   :  { %v3546_v60 = vadd.f32 %v3545_v48, %v10515_v26 }
 0x6c2   :  { %v3635_v12 = vadd.f32 %v3634_v24, %v3546_v60  ;;  %v3733_v60 = vpop.f32.mrf.mxu0 }
 0x6c4   :  { %v3724_v30 = vadd.f32 %v3723_v28, %v3635_v12  ;;  %4188 = vmatmul.bf16.gmra.mxu3 %v7428_v13 }
 0x6c6   :  { %v3807_v53 = vpop.f32.mrf.mxu1 }
 0x6c7   :  { %v11009_v47 = vadd.f32 %v3807_v53, %v3719_v51  ;;  %v3547_v21 = vpop.f32.mrf.mxu2  ;;  %v3649_v26 = vpop.f32.mrf.mxu3  ;;  %v8431_v51 = vld [vmem:[#allocation8 + $0x54] sm:$0xf] }
 0x6c8   :  { %v3548_v39 = vadd.f32 %v3547_v21, %v10521_v10  ;;  %v7436_v8 = vor.u32 %v8431_v51, %v7433_v4  ;;  %v8428_v10 = vld [vmem:[#allocation8 + $0x34] sm:$0xf0] }
 0x6c9   :  { %12202 = vst [vmem:[#allocation25_spill] sm:$0xff] %v11009_v47  ;;  %v7416_v21 = vor.u32 %v8428_v10, %v7415_v7  ;;  %v8430_v7 = vld [vmem:[#allocation8 + $0x44] sm:$0xf0] }
 0x6ca   :  { %v11014_v35 = vadd.f32 %v3636_v61, %v3548_v39 }
 0x6cc   :  { %12204 = vst [vmem:[#allocation27_spill] sm:$0xff] %v11014_v35  ;;  %4089 = vmatmul.bf16.gmra.mxu2 %v7408_v19  ;;  %v8487_v35 = vld [vmem:[#allocation10 + $0x110] sm:$0xff] }
 0x6ce   :  { %v11016_v24 = vpop.f32.mrf.mxu1 }
 0x6cf   :  { %12205 = vst [vmem:[#allocation28_spill] sm:$0xff] %v11016_v24  ;;  %v3550_v28 = vpop.f32.mrf.mxu2  ;;  %v3651_v45 = vpop.f32.mrf.mxu3 }
 0x6d0   :  { %v3551_v48 = vadd.f32 %v3550_v28, %v10554_v31  ;;  %v11024_v31 = vpop.f32.mrf.mxu0 }
 0x6d1   :  { %12208 = vst [vmem:[#allocation31_spill] sm:$0xff] %v11024_v31 }
 0x6d2   :  { %v3640_v12 = vadd.f32 %v3639_v25, %v3551_v48 }
 0x6d4   :  { %v3729_v53 = vadd.f32 %v3728_v2, %v3640_v12  ;;  %4193 = vmatmul.bf16.gmra.mxu3 %v7436_v8  ;;  %v8433_v12 = vld [vmem:[#allocation8 + $0x64] sm:$0xf] }
 0x6d6   :  { %v3812_v0 = vpop.f32.mrf.mxu1 }
 0x6d7   :  { %v11019_v13 = vadd.f32 %v3812_v0, %v3724_v30  ;;  %v3552_v61 = vpop.f32.mrf.mxu2  ;;  %v3654_v25 = vpop.f32.mrf.mxu3  ;;  %v7441_v30 = vld [vmem:[#allocation8 + $0x68] sm:$0xf0] }
 0x6d8   :  { %v3553_v44 = vadd.f32 %v3552_v61, %v10560_v62  ;;  %v7444_v0 = vor.u32 %v8433_v12, %v7441_v30  ;;  %v7423_v62 = vld [vmem:[#allocation8 + $0x40] sm:$0xf]  ;;  %v3738_v8 = vpop.f32.mrf.mxu0  ;;  %v8435_v12 = vld [vmem:[#allocation8 + $0x74] sm:$0xf] }
 0x6d9   :  { %12206 = vst [vmem:[#allocation29_spill] sm:$0xff] %v11019_v13  ;;  %v8495_v13 = vld [vmem:[#allocation10 + $0x150] sm:$0xff] }
 0x6da   :  { %v11022_v39 = vadd.f32 %v3641_v36, %v3553_v44 }
 0x6dc   :  { %12207 = vst [vmem:[#allocation30_spill] sm:$0xff] %v11022_v39  ;;  %4094 = vmatmul.bf16.gmra.mxu2 %v7416_v21  ;;  %v7424_v21 = vor.u32 %v8430_v7, %v7423_v62  ;;  %v8432_v62 = vld [vmem:[#allocation8 + $0x54] sm:$0xf0] }
 0x6de   :  { %v11026_v19 = vpop.f32.mrf.mxu1 }
 0x6df   :  { %12209 = vst [vmem:[#allocation32_spill] sm:$0xff] %v11026_v19  ;;  %v3555_v2 = vpop.f32.mrf.mxu2  ;;  %v3656_v51 = vpop.f32.mrf.mxu3 }
 0x6e0   :  { %v3556_v28 = vadd.f32 %v3555_v2, %v10593_v49 }
 0x6e2   :  { %v3645_v48 = vadd.f32 %v3644_v5, %v3556_v28 }
 0x6e4   :  { %v3734_v4 = vadd.f32 %v3733_v60, %v3645_v48  ;;  %4198 = vmatmul.bf16.gmra.mxu3 %v7444_v0  ;;  %v11036_v60 = vpop.f32.mrf.mxu0 }
 0x6e5   :  { %12213 = vst [vmem:[#allocation36_spill] sm:$0xff] %v11036_v60 }
 0x6e6   :  { %v3817_v36 = vpop.f32.mrf.mxu1 }
 0x6e7   :  { %v11029_v10 = vadd.f32 %v3817_v36, %v3729_v53  ;;  %v3557_v61 = vpop.f32.mrf.mxu2  ;;  %v3659_v49 = vpop.f32.mrf.mxu3  ;;  %v7449_v53 = vld [vmem:[#allocation8 + $0x78] sm:$0xf0] }
 0x6e8   :  { %v3558_v44 = vadd.f32 %v3557_v61, %v10599_v20  ;;  %v7452_v39 = vor.u32 %v8435_v12, %v7449_v53  ;;  %v7431_v20 = vld [vmem:[#allocation8 + $0x50] sm:$0xf]  ;;  %v7457_v12 = vld [vmem:[#allocation8 + $0x88] sm:$0xf0] }
 0x6e9   :  { %12210 = vst [vmem:[#allocation33_spill] sm:$0xff] %v11029_v10  ;;  %v8491_v10 = vld [vmem:[#allocation10 + $0x130] sm:$0xff] }
 0x6ea   :  { %v11032_v31 = vadd.f32 %v3646_v6, %v3558_v44  ;;  %v7432_v44 = vor.u32 %v8432_v62, %v7431_v20  ;;  %v7439_v20 = vld [vmem:[#allocation8 + $0x60] sm:$0xf] }
 0x6ec   :  { %12211 = vst [vmem:[#allocation34_spill] sm:$0xff] %v11032_v31  ;;  %4099 = vmatmul.bf16.gmra.mxu2 %v7424_v21  ;;  %v3743_v21 = vpop.f32.mrf.mxu0 }
 0x6ee   :  { %v11034_v5 = vpop.f32.mrf.mxu1 }
 0x6ef   :  { %12212 = vst [vmem:[#allocation35_spill] sm:$0xff] %v11034_v5  ;;  %v3560_v2 = vpop.f32.mrf.mxu2  ;;  %v3661_v30 = vpop.f32.mrf.mxu3  ;;  %v8483_v5 = vld [vmem:[#allocation10 + $0xf0] sm:$0xff] }
 0x6f0   :  { %v3561_v28 = vadd.f32 %v3560_v2, %v10632_v50 }
 0x6f2   :  { %v3650_v48 = vadd.f32 %v3649_v26, %v3561_v28 }
 0x6f4   :  { %v3739_v36 = vadd.f32 %v3738_v8, %v3650_v48  ;;  %4203 = vmatmul.bf16.gmra.mxu3 %v7452_v39  ;;  %v8437_v48 = vld [vmem:[#allocation8 + $0x84] sm:$0xf]  ;;  %v8434_v39 = vld [vmem:[#allocation8 + $0x64] sm:$0xf0] }
 0x6f6   :  { %v3822_v0 = vpop.f32.mrf.mxu1 }
 0x6f7   :  { %v11039_v6 = vadd.f32 %v3822_v0, %v3734_v4  ;;  %v3562_v7 = vpop.f32.mrf.mxu2  ;;  %v3664_v50 = vpop.f32.mrf.mxu3 }
 0x6f8   :  { %v3563_v61 = vadd.f32 %v3562_v7, %v10638_v37  ;;  %v11047_v4 = vpop.f32.mrf.mxu0  ;;  %v7460_v37 = vor.u32 %v8437_v48, %v7457_v12  ;;  %v8439_v48 = vld [vmem:[#allocation8 + $0x94] sm:$0xf]  ;;  %v7465_v12 = vld [vmem:[#allocation8 + $0x98] sm:$0xf0] }
 0x6f9   :  { %12214 = vst [vmem:[#allocation37_spill] sm:$0xff] %v11039_v6 }
 0x6fa   :  { %v11042_v60 = vadd.f32 %v3651_v45, %v3563_v61  ;;  %12217 = vst [vmem:[#allocation40_spill] sm:$0xff] %v11047_v4  ;;  %v7468_v4 = vor.u32 %v8439_v48, %v7465_v12  ;;  %v7473_v48 = vld [vmem:[#allocation8 + $0xa8] sm:$0xf0] }
 0x6fc   :  { %12215 = vst [vmem:[#allocation38_spill] sm:$0xff] %v11042_v60  ;;  %4104 = vmatmul.bf16.gmra.mxu2 %v7432_v44  ;;  %v7440_v44 = vor.u32 %v8434_v39, %v7439_v20 }
 0x6fe   :  { %v11044_v26 = vpop.f32.mrf.mxu1 }
 0x6ff   :  { %12216 = vst [vmem:[#allocation39_spill] sm:$0xff] %v11044_v26  ;;  %v3565_v2 = vpop.f32.mrf.mxu2  ;;  %v3666_v53 = vpop.f32.mrf.mxu3 }
 0x700   :  { %v3566_v8 = vadd.f32 %v3565_v2, %v10671_v54 }
 0x702   :  { %v3655_v28 = vadd.f32 %v3654_v25, %v3566_v8  ;;  %v3748_v25 = vpop.f32.mrf.mxu0 }
 0x704   :  { %v3744_v0 = vadd.f32 %v3743_v21, %v3655_v28  ;;  %4208 = vmatmul.bf16.gmra.mxu3 %v7460_v37 }
 0x706   :  { %v3827_v62 = vpop.f32.mrf.mxu1 }
 0x707   :  { %v11049_v45 = vadd.f32 %v3827_v62, %v3739_v36  ;;  %v3567_v7 = vpop.f32.mrf.mxu2  ;;  %v4169_v54 = vpop.f32.mrf.mxu3 }
 0x708   :  { %v3568_v61 = vadd.f32 %v3567_v7, %v10677_v3  ;;  %v8436_v3 = vld [vmem:[#allocation8 + $0x74] sm:$0xf0] }
 0x709   :  { %12218 = vst [vmem:[#allocation41_spill] sm:$0xff] %v11049_v45  ;;  %v7447_v45 = vld [vmem:[#allocation8 + $0x70] sm:$0xf] }
 0x70a   :  { %v11052_v60 = vadd.f32 %v3656_v51, %v3568_v61  ;;  %v11059_v39 = vpop.f32.mrf.mxu0  ;;  %v7448_v61 = vor.u32 %v8436_v3, %v7447_v45 }
 0x70b   :  { %12222 = vst [vmem:[#allocation45_spill] sm:$0xff] %v11059_v39 }
 0x70c   :  { %12219 = vst [vmem:[#allocation42_spill] sm:$0xff] %v11052_v60  ;;  %4109 = vmatmul.bf16.gmra.mxu2 %v7440_v44  ;;  %v7455_v60 = vld [vmem:[#allocation8 + $0x80] sm:$0xf] }
 0x70e   :  { %v11054_v2 = vpop.f32.mrf.mxu1 }
 0x70f   :  { %12220 = vst [vmem:[#allocation43_spill] sm:$0xff] %v11054_v2  ;;  %v3570_v8 = vpop.f32.mrf.mxu2  ;;  %v4171_v36 = vpop.f32.mrf.mxu3 }
 0x710   :  { %v3571_v21 = vadd.f32 %v3570_v8, %v10710_v56 }
 0x712   :  { %v3660_v28 = vadd.f32 %v3659_v49, %v3571_v21  ;;  %v3753_v21 = vpop.f32.mrf.mxu0 }
 0x714   :  { %v3749_v62 = vadd.f32 %v3748_v25, %v3660_v28  ;;  %4213 = vmatmul.bf16.gmra.mxu3 %v7468_v4 }
 0x716   :  { %v3832_v20 = vpop.f32.mrf.mxu1 }
 0x717   :  { %v11057_v37 = vadd.f32 %v3832_v20, %v3744_v0  ;;  %v3572_v51 = vpop.f32.mrf.mxu2  ;;  %v4174_v56 = vpop.f32.mrf.mxu3  ;;  %v8441_v0 = vld [vmem:[#allocation8 + $0xa4] sm:$0xf] }
 0x718   :  { %v3573_v7 = vadd.f32 %v3572_v51, %v10716_v15  ;;  %v7476_v39 = vor.u32 %v8441_v0, %v7473_v48  ;;  %v8438_v15 = vld [vmem:[#allocation8 + $0x84] sm:$0xf0]  ;;  %v8440_v48 = vld [vmem:[#allocation8 + $0x94] sm:$0xf0] }
 0x719   :  { %12221 = vst [vmem:[#allocation44_spill] sm:$0xff] %v11057_v37  ;;  %v7456_v51 = vor.u32 %v8438_v15, %v7455_v60  ;;  %v7495_v37 = vld [vmem:[#allocation8 + $0xd0] sm:$0xf] }
 0x71a   :  { %v11062_v44 = vadd.f32 %v3661_v30, %v3573_v7 }
 0x71c   :  { %12223 = vst [vmem:[#allocation46_spill] sm:$0xff] %v11062_v44  ;;  %4114 = vmatmul.bf16.gmra.mxu2 %v7448_v61 }
 0x71e   :  { %v11064_v49 = vpop.f32.mrf.mxu1 }
 0x71f   :  { %12224 = vst [vmem:[#allocation47_spill] sm:$0xff] %v11064_v49  ;;  %v3575_v25 = vpop.f32.mrf.mxu2  ;;  %v4176_v12 = vpop.f32.mrf.mxu3 }
 0x720   :  { %v3576_v8 = vadd.f32 %v3575_v25, %v10749_v59 }
 0x722   :  { %v3665_v28 = vadd.f32 %v3664_v50, %v3576_v8  ;;  %v8443_v8 = vld [vmem:[#allocation8 + $0xb4] sm:$0xf] }
 0x724   :  { %v3754_v20 = vadd.f32 %v3753_v21, %v3665_v28  ;;  %4218 = vmatmul.bf16.gmra.mxu3 %v7476_v39  ;;  %v7481_v21 = vld [vmem:[#allocation8 + $0xb8] sm:$0xf0] }
 0x725   :  { %v7484_v0 = vor.u32 %v8443_v8, %v7481_v21  ;;  %v7471_v8 = vld [vmem:[#allocation8 + $0xa0] sm:$0xf]  ;;  %v8442_v21 = vld [vmem:[#allocation8 + $0xa4] sm:$0xf0] }
 0x726   :  { %v3837_v45 = vpop.f32.mrf.mxu1 }
 0x727   :  { %v11067_v4 = vadd.f32 %v3837_v45, %v3749_v62  ;;  %v3577_v30 = vpop.f32.mrf.mxu2  ;;  %v4179_v59 = vpop.f32.mrf.mxu3  ;;  %v7463_v62 = vld [vmem:[#allocation8 + $0x90] sm:$0xf] }
 0x728   :  { %v3578_v3 = vadd.f32 %v3577_v30, %v10755_v22 }
 0x729   :  { %12225 = vst [vmem:[#allocation48_spill] sm:$0xff] %v11067_v4 }
 0x72a   :  { %v11070_v7 = vadd.f32 %v3666_v53, %v3578_v3  ;;  %v7464_v53 = vor.u32 %v8440_v48, %v7463_v62  ;;  %v7489_v3 = vld [vmem:[#allocation8 + $0xc8] sm:$0xf0]  ;;  %v8447_v48 = vld [vmem:[#allocation8 + $0xd4] sm:$0xf] }
 0x72c   :  { %12226 = vst [vmem:[#allocation49_spill] sm:$0xff] %v11070_v7  ;;  %4119 = vmatmul.bf16.gmra.mxu2 %v7456_v51 }
 0x72e   :  { %v11072_v50 = vpop.f32.mrf.mxu1 }
 0x72f   :  { %12227 = vst [vmem:[#allocation50_spill] sm:$0xff] %v11072_v50  ;;  %v4080_v61 = vpop.f32.mrf.mxu2  ;;  %v4181_v28 = vpop.f32.mrf.mxu3 }
 0x730   :  { %v11074_v25 = vadd.f32 %v4169_v54, %v4080_v61  ;;  %v8445_v54 = vld [vmem:[#allocation8 + $0xc4] sm:$0xf] }
 0x731   :  { %v7492_v61 = vor.u32 %v8445_v54, %v7489_v3 }
 0x734   :  { %4223 = vmatmul.bf16.gmra.mxu3 %v7484_v0 }
 0x736   :  { %v3842_v45 = vpop.f32.mrf.mxu1 }
 0x737   :  { %v11076_v44 = vadd.f32 %v3842_v45, %v3754_v20  ;;  %v4082_v22 = vpop.f32.mrf.mxu2  ;;  %v4184_v39 = vpop.f32.mrf.mxu3  ;;  %v7472_v20 = vor.u32 %v8442_v21, %v7471_v8  ;;  %v7497_v45 = vld [vmem:[#allocation8 + $0xd8] sm:$0xf0]  ;;  %v7505_v21 = vld [vmem:[#allocation8 + $0xe8] sm:$0xf0] }
 0x738   :  { %v11078_v60 = vadd.f32 %v4171_v36, %v4082_v22  ;;  %v7500_v22 = vor.u32 %v8447_v48, %v7497_v45  ;;  %v7487_v48 = vld [vmem:[#allocation8 + $0xc0] sm:$0xf]  ;;  %v8446_v45 = vld [vmem:[#allocation8 + $0xc4] sm:$0xf0] }
 0x739   :  { %12228 = vst [vmem:[#allocation51_spill] sm:$0xff] %v11076_v44 }
 0x73c   :  { %4124 = vmatmul.bf16.gmra.mxu2 %v7464_v53  ;;  %v7479_v53 = vld [vmem:[#allocation8 + $0xb0] sm:$0xf] }
 0x73f   :  { %v4085_v15 = vpop.f32.mrf.mxu2  ;;  %v4186_v51 = vpop.f32.mrf.mxu3 }
 0x740   :  { %v11080_v30 = vadd.f32 %v4174_v56, %v4085_v15  ;;  %v8444_v15 = vld [vmem:[#allocation8 + $0xb4] sm:$0xf0] }
 0x741   :  { %v7480_v44 = vor.u32 %v8444_v15, %v7479_v53 }
 0x744   :  { %4228 = vmatmul.bf16.gmra.mxu3 %v7492_v61 }
 0x747   :  { %v4087_v7 = vpop.f32.mrf.mxu2  ;;  %v4189_v36 = vpop.f32.mrf.mxu3 }
 0x748   :  { %v11082_v50 = vadd.f32 %v4176_v12, %v4087_v7  ;;  %v8460_v7 = vld [vmem:[#allocation10 + $0x38] sm:$0xff] }
 0x749   :  { %4341 = vmatpush.bf16.msrb.mxu0 %v8460_v7 }
 0x74c   :  { %4129 = vmatmul.bf16.gmra.mxu2 %v7472_v20 }
 0x74f   :  { %v4090_v62 = vpop.f32.mrf.mxu2  ;;  %v11086_v56 = vpop.f32.mrf.mxu3 }
 0x750   :  { %v11084_v0 = vadd.f32 %v4179_v59, %v4090_v62  ;;  %v8449_v59 = vld [vmem:[#allocation8 + $0xe4] sm:$0xf] }
 0x751   :  { %v7508_v62 = vor.u32 %v8449_v59, %v7505_v21  ;;  %v8448_v59 = vld [vmem:[#allocation8 + $0xd4] sm:$0xf0] }
 0x752   :  { %v7496_v2 = vor.u32 %v8448_v59, %v7495_v37  ;;  %v8452_v59 = vld [vmem:[#allocation8 + $0xf4] sm:$0xf0] }
 0x754   :  { %4233 = vmatmul.bf16.gmra.mxu3 %v7500_v22 }
 0x757   :  { %v4092_v54 = vpop.f32.mrf.mxu2  ;;  %v4194_v12 = vpop.f32.mrf.mxu3 }
 0x758   :  { %v11088_v3 = vadd.f32 %v4181_v28, %v4092_v54  ;;  %v7488_v28 = vor.u32 %v8446_v45, %v7487_v48  ;;  %v7513_v54 = vld [vmem:[#allocation8 + $0xf8] sm:$0xf0]  ;;  %v8450_v45 = vld [vmem:[#allocation8 + $0xe4] sm:$0xf0] }
 0x75c   :  { %4134 = vmatmul.bf16.gmra.mxu2 %v7480_v44 }
 0x75f   :  { %v4095_v61 = vpop.f32.mrf.mxu2  ;;  %v11092_v20 = vpop.f32.mrf.mxu3 }
 0x760   :  { %v11090_v8 = vadd.f32 %v4184_v39, %v4095_v61  ;;  %v8451_v39 = vld [vmem:[#allocation8 + $0xf4] sm:$0xf] }
 0x761   :  { %v7516_v61 = vor.u32 %v8451_v39, %v7513_v54 }
 0x764   :  { %4238 = vmatmul.bf16.gmra.mxu3 %v7508_v62 }
 0x767   :  { %v4097_v4 = vpop.f32.mrf.mxu2  ;;  %v4199_v22 = vpop.f32.mrf.mxu3 }
 0x768   :  { %v11094_v49 = vadd.f32 %v4186_v51, %v4097_v4  ;;  %v8459_v4 = vld [vmem:[#allocation10 + $0x30] sm:$0xff] }
 0x769   :  { %4342 = vmatpush.bf16.msrb.mxu0 %v8459_v4  ;;  %v8458_v4 = vld [vmem:[#allocation10 + $0x28] sm:$0xff] }
 0x76c   :  { %4139 = vmatmul.bf16.gmra.mxu2 %v7488_v28 }
 0x76d   :  { %4343 = vmatpush.bf16.msrb.mxu0 %v8458_v4  ;;  %v8484_v4 = vld [vmem:[#allocation10 + $0xf8] sm:$0xff] }
 0x76e   :  { %4623 = vmatpush.bf16.msrb.mxu1 %v8484_v4  ;;  %v8456_v4 = vld [vmem:[#allocation10 + $0x18] sm:$0xff] }
 0x76f   :  { %v4100_v44 = vpop.f32.mrf.mxu2  ;;  %v11097_v7 = vpop.f32.mrf.mxu3 }
 0x770   :  { %v4190_v53 = vadd.f32 %v4189_v36, %v4100_v44 }
 0x772   :  { %v4249_v15 = vmax.f32 %v11074_v25, %v4190_v53  ;;  %v7503_v25 = vld [vmem:[#allocation8 + $0xe0] sm:$0xf]  ;;  %4624 = vmatpush.bf16.msrb.mxu1 %v8483_v5  ;;  %v8488_v5 = vld [vmem:[#allocation10 + $0x118] sm:$0xff] }
 0x773   :  { %v7504_v53 = vor.u32 %v8450_v45, %v7503_v25 }
 0x774   :  { %4243 = vmatmul.bf16.gmra.mxu3 %v7516_v61  ;;  %v7511_v61 = vld [vmem:[#allocation8 + $0xf0] sm:$0xf] }
 0x777   :  { %v11099_v21 = vpop.f32.mrf.mxu2  ;;  %v4204_v51 = vpop.f32.mrf.mxu3 }
 0x77c   :  { %4144 = vmatmul.bf16.gmra.mxu2 %v7496_v2 }
 0x77f   :  { %v4105_v62 = vpop.f32.mrf.mxu2  ;;  %v11104_v44 = vpop.f32.mrf.mxu3 }
 0x780   :  { %v4195_v48 = vadd.f32 %v4194_v12, %v4105_v62 }
 0x782   :  { %v4251_v36 = vmax.f32 %v11080_v30, %v4195_v48  ;;  %v7512_v30 = vor.u32 %v8452_v59, %v7511_v61 }
 0x787   :  { %v11102_v28 = vpop.f32.mrf.mxu2  ;;  %v4209_v37 = vpop.f32.mrf.mxu3 }
 0x78c   :  { %4149 = vmatmul.bf16.gmra.mxu2 %v7504_v53 }
 0x78f   :  { %v4110_v39 = vpop.f32.mrf.mxu2  ;;  %v11112_v62 = vpop.f32.mrf.mxu3 }
 0x790   :  { %v11106_v54 = vadd.f32 %v4199_v22, %v4110_v39 }
 0x792   :  { %v4253_v2 = vmax.f32 %v11084_v0, %v11106_v54 }
 0x797   :  { %v11110_v12 = vpop.f32.mrf.mxu2  ;;  %v4214_v45 = vpop.f32.mrf.mxu3 }
 0x79c   :  { %4154 = vmatmul.bf16.gmra.mxu2 %v7512_v30  ;;  %v8457_v30 = vld [vmem:[#allocation10 + $0x20] sm:$0xff] }
 0x79d   :  { %4344 = vmatpush.bf16.msrb.mxu0 %v8457_v30  ;;  %v8498_v30 = vld [vmem:[#allocation10 + $0x168] sm:$0xff] }
 0x79f   :  { %v4115_v48 = vpop.f32.mrf.mxu2  ;;  %v11120_v39 = vpop.f32.mrf.mxu3 }
 0x7a0   :  { %v11114_v25 = vadd.f32 %v4204_v51, %v4115_v48  ;;  %v8492_v51 = vld [vmem:[#allocation10 + $0x138] sm:$0xff] }
 0x7a1   :  { %v8500_v48 = vld [vmem:[#allocation10 + $0x178] sm:$0xff]  ;;  %4717 = vmatpush.bf16.msra.mxu2 %v8492_v51  ;;  %4345 = vmatpush.bf16.msrb.mxu0 %v8456_v4  ;;  %v8494_v4 = vld [vmem:[#allocation10 + $0x148] sm:$0xff] }
 0x7a2   :  { %4811 = vmatpush.bf16.msrb.mxu3 %v8500_v48  ;;  %v8480_v51 = vld [vmem:[#allocation10 + $0xd8] sm:$0xff] }
 0x7a3   :  { %v8496_v48 = vld [vmem:[#allocation10 + $0x158] sm:$0xff] }
 0x7a5   :  { %4718 = vmatpush.bf16.msra.mxu2 %v8491_v10 }
 0x7a7   :  { %v11118_v53 = vpop.f32.mrf.mxu2  ;;  %v4219_v59 = vpop.f32.mrf.mxu3 }
 0x7af   :  { %v4120_v0 = vpop.f32.mrf.mxu2 }
 0x7b0   :  { %v4210_v54 = vadd.f32 %v4209_v37, %v4120_v0  ;;  %v8499_v37 = vld [vmem:[#allocation10 + $0x170] sm:$0xff]  ;;  %v8482_v0 = vld [vmem:[#allocation10 + $0xe8] sm:$0xff] }
 0x7b1   :  { %4812 = vmatpush.bf16.msrb.mxu3 %v8499_v37  ;;  %4625 = vmatpush.bf16.msrb.mxu1 %v8482_v0 }
 0x7b2   :  { %v11122_v26 = vmax.f32 %v4249_v15, %v4210_v54  ;;  %v11128_v15 = vpop.f32.mrf.mxu3  ;;  %v8490_v54 = vld [vmem:[#allocation10 + $0x128] sm:$0xff] }
 0x7b3   :  { %4719 = vmatpush.bf16.msra.mxu2 %v8490_v54  ;;  %v8455_v54 = vld [vmem:[#allocation10 + $0x10] sm:$0xff] }
 0x7b4   :  { %4346 = vmatpush.bf16.msrb.mxu0 %v8455_v54 }
 0x7b5   :  { %4813 = vmatpush.bf16.msrb.mxu3 %v8498_v30  ;;  %v8479_v30 = vld [vmem:[#allocation10 + $0xd0] sm:$0xff] }
 0x7b7   :  { %v11124_v61 = vpop.f32.mrf.mxu2 }
 0x7bf   :  { %v4125_v31 = vpop.f32.mrf.mxu2 }
 0x7c0   :  { %v4215_v6 = vadd.f32 %v4214_v45, %v4125_v31  ;;  %v8481_v31 = vld [vmem:[#allocation10 + $0xe0] sm:$0xff] }
 0x7c1   :  { %v8489_v45 = vld [vmem:[#allocation10 + $0x120] sm:$0xff]  ;;  %4626 = vmatpush.bf16.msrb.mxu1 %v8481_v31  ;;  %v8454_v31 = vld [vmem:[#allocation10 + $0x8] sm:$0xff] }
 0x7c2   :  { %v11126_v22 = vmax.f32 %v4251_v36, %v4215_v6  ;;  %v8497_v6 = vld [vmem:[#allocation10 + $0x160] sm:$0xff]  ;;  %4720 = vmatpush.bf16.msra.mxu2 %v8489_v45  ;;  %v4224_v36 = vpop.f32.mrf.mxu3  ;;  %v8478_v45 = vld [vmem:[#allocation10 + $0xc8] sm:$0xff]  ;;  %4347 = vmatpush.bf16.msrb.mxu0 %v8454_v31 }
 0x7c3   :  { %4814 = vmatpush.bf16.msrb.mxu3 %v8497_v6  ;;  %v8486_v6 = vld [vmem:[#allocation10 + $0x108] sm:$0xff] }
 0x7c5   :  { %4627 = vmatpush.bf16.msrb.mxu1 %v8480_v51  ;;  %v8477_v51 = vld [vmem:[#allocation10 + $0xc0] sm:$0xff] }
 0x7c6   :  { %4721 = vmatpush.bf16.msra.mxu2 %v8488_v5  ;;  %v8485_v5 = vld [vmem:[#allocation10 + $0x100] sm:$0xff] }
 0x7c7   :  { %v11130_v19 = vpop.f32.mrf.mxu2  ;;  %4815 = vmatpush.bf16.msrb.mxu3 %v8496_v48 }
 0x7c9   :  { %4628 = vmatpush.bf16.msrb.mxu1 %v8479_v30 }
 0x7ca   :  { %4722 = vmatpush.bf16.msra.mxu2 %v8487_v35 }
 0x7cb   :  { %4816 = vmatpush.bf16.msrb.mxu3 %v8495_v13 }
 0x7cd   :  { %4629 = vmatpush.bf16.msrb.mxu1 %v8478_v45 }
 0x7ce   :  { %4723 = vmatpush.bf16.msra.mxu2 %v8486_v6  ;;  %v4192_v6 = vadd.f32 %v11086_v56, %v11099_v21  ;;  %v8468_v56 = vld [vmem:[#allocation10 + $0x78] sm:$0xff] }
 0x7cf   :  { %v4130_v10 = vpop.f32.mrf.mxu2  ;;  %4817 = vmatpush.bf16.msrb.mxu3 %v8494_v4  ;;  %v4212_v4 = vadd.f32 %v11112_v62, %v11124_v61  ;;  %v8516_v21 = vld [vmem:[#allocation10 + $0x1f8] sm:$0xff]  ;;  %v8467_v61 = vld [vmem:[#allocation10 + $0x70] sm:$0xff] }
 0x7d0   :  { %v4220_v37 = vadd.f32 %v4219_v59, %v4130_v10  ;;  %v11136_v59 = vpop.f32.mrf.mxu3  ;;  %v8493_v10 = vld [vmem:[#allocation10 + $0x140] sm:$0xff] }
 0x7d1   :  { %4630 = vmatpush.bf16.msrb.mxu1 %v8477_v51  ;;  %v4250_v51 = vmax.f32 %v11078_v60, %v4192_v6 }
 0x7d2   :  { %v11132_v0 = vmax.f32 %v4253_v2, %v4220_v37  ;;  %v8453_v2 = vld [vmem:[#allocation10] sm:$0xff]  ;;  %4724 = vmatpush.bf16.msra.mxu2 %v8485_v5  ;;  %v12229_v37 = vmax.f32 %v11090_v8, %v11114_v25 }
 0x7d3   :  { %4348 = vmatpush.bf16.msrb.mxu0 %v8453_v2  ;;  %4818 = vmatpush.bf16.msrb.mxu3 %v8493_v10  ;;  %v4258_v10 = vmax.f32 %v4250_v51, %v4212_v4  ;;  %v8466_v51 = vld [vmem:[#allocation10 + $0x68] sm:$0xff] }
 0x7d5   :  { %4999 = vmatpush.bf16.msra.mxu1 %v8516_v21 }
 0x7d7   :  { %v11134_v24 = vpop.f32.mrf.mxu2  ;;  %4435 = vmatpush.bf16.msra.mxu0 %v8468_v56  ;;  %v8521_v56 = vld [vmem:[#allocation10 + $0x220] sm:$0xff] }
 0x7d8   :  { %v4229_v48 = vpop.f32.mrf.mxu3 }
 0x7db   :  { %4436 = vmatpush.bf16.msra.mxu0 %v8467_v61  ;;  %v4202_v61 = vadd.f32 %v11097_v7, %v11110_v12  ;;  %v8509_v7 = vld [vmem:[#allocation10 + $0x1c0] sm:$0xff] }
 0x7dc   :  { %v8517_v12 = vld [vmem:[#allocation10 + $0x200] sm:$0xff] }
 0x7df   :  { %v4135_v35 = vpop.f32.mrf.mxu2  ;;  %4437 = vmatpush.bf16.msra.mxu0 %v8466_v51  ;;  %v4254_v51 = vmax.f32 %v11088_v3, %v4202_v61  ;;  %v8469_v61 = vld [vmem:[#allocation10 + $0x80] sm:$0xff] }
 0x7e0   :  { %v4225_v13 = vadd.f32 %v4224_v36, %v4135_v35  ;;  %v4231_v31 = vpop.f32.mrf.mxu3 }
 0x7e2   :  { %v11141_v54 = vmax.f32 %v12229_v37, %v4225_v13  ;;  %v8524_v37 = vld [vmem:[#allocation10 + $0x238] sm:$0xff] }
 0x7e3   :  { %5093 = vmatpush.bf16.msrb.mxu2 %v8524_v37  ;;  %v8520_v37 = vld [vmem:[#allocation10 + $0x218] sm:$0xff] }
 0x7e7   :  { %v11143_v30 = vpop.f32.mrf.mxu2 }
 0x7e8   :  { %v4234_v2 = vpop.f32.mrf.mxu3 }
 0x7ef   :  { %v4140_v45 = vpop.f32.mrf.mxu2 }
 0x7f0   :  { %v4230_v36 = vadd.f32 %v4229_v48, %v4140_v45  ;;  %v4236_v62 = vpop.f32.mrf.mxu3  ;;  %v8515_v48 = vld [vmem:[#allocation10 + $0x1f0] sm:$0xff]  ;;  %v4217_v45 = vadd.f32 %v11120_v39, %v11130_v19  ;;  %v8465_v19 = vld [vmem:[#allocation10 + $0x60] sm:$0xff] }
 0x7f1   :  { %5000 = vmatpush.bf16.msra.mxu1 %v8515_v48  ;;  %v8513_v39 = vld [vmem:[#allocation10 + $0x1e0] sm:$0xff]  ;;  %4438 = vmatpush.bf16.msra.mxu0 %v8465_v19 }
 0x7f2   :  { %v4265_v8 = vmax.f32 %v11122_v26, %v4230_v36  ;;  %v4197_v26 = vadd.f32 %v11092_v20, %v11102_v28  ;;  %v8514_v36 = vld [vmem:[#allocation10 + $0x1e8] sm:$0xff] }
 0x7f4   :  { %v4252_v6 = vmax.f32 %v11082_v50, %v4197_v26  ;;  %v8464_v50 = vld [vmem:[#allocation10 + $0x58] sm:$0xff]  ;;  %v8519_v26 = vld [vmem:[#allocation10 + $0x210] sm:$0xff] }
 0x7f5   :  { %5001 = vmatpush.bf16.msra.mxu1 %v8514_v36  ;;  %4439 = vmatpush.bf16.msra.mxu0 %v8464_v50 }
 0x7f7   :  { %v4142_v5 = vpop.f32.mrf.mxu2 }
 0x7f8   :  { %v4232_v35 = vadd.f32 %v4231_v31, %v4142_v5  ;;  %v8523_v31 = vld [vmem:[#allocation10 + $0x230] sm:$0xff]  ;;  %v8522_v5 = vld [vmem:[#allocation10 + $0x228] sm:$0xff]  ;;  %v4239_v20 = vpop.f32.mrf.mxu3 }
 0x7f9   :  { %5094 = vmatpush.bf16.msrb.mxu2 %v8523_v31  ;;  %5002 = vmatpush.bf16.msra.mxu1 %v8513_v39  ;;  %v4222_v31 = vadd.f32 %v11128_v15, %v11134_v24 }
 0x7fa   :  { %v4266_v25 = vmax.f32 %v4258_v10, %v4232_v35  ;;  %v4260_v35 = vmax.f32 %v4252_v6, %v4217_v45  ;;  %v8462_v45 = vld [vmem:[#allocation10 + $0x48] sm:$0xff] }
 0x7fb   :  { %v8510_v6 = vld [vmem:[#allocation10 + $0x1c8] sm:$0xff] }
 0x7fc   :  { %v11151_v13 = vpack.c.bf16 %v4266_v25, %v4265_v8 }
 0x7fd   :  { %5095 = vmatpush.bf16.msrb.mxu2 %v8522_v5 }
 0x7fe   :  { %4349 = vmatmul.bf16.vlgmr.msrb.gmra.mxu0 %v11151_v13  ;;  %4631 = vmatmul.bf16.vlgmr.msrb.gmra.mxu1 %v11151_v13 }
 0x7ff   :  { %4725 = vmatmul.bf16.vlgmr.msra.gmra.mxu2 %v11151_v13  ;;  %4819 = vmatmul.bf16.vlgmr.msrb.gmra.mxu3 %v11151_v13  ;;  %v4145_v60 = vpop.f32.mrf.mxu2 }
 0x800   :  { %v4235_v4 = vadd.f32 %v4234_v2, %v4145_v60  ;;  %v8512_v2 = vld [vmem:[#allocation10 + $0x1d8] sm:$0xff]  ;;  %v8463_v60 = vld [vmem:[#allocation10 + $0x50] sm:$0xff]  ;;  %v4241_v48 = vpop.f32.mrf.mxu3 }
 0x801   :  { %5096 = vmatpush.bf16.msrb.mxu2 %v8521_v56  ;;  %5003 = vmatpush.bf16.msra.mxu1 %v8512_v2 }
 0x802   :  { %v4267_v28 = vmax.f32 %v11126_v22, %v4235_v4  ;;  %4440 = vmatpush.bf16.msra.mxu0 %v8463_v60  ;;  %v8518_v4 = vld [vmem:[#allocation10 + $0x208] sm:$0xff] }
 0x805   :  { %5097 = vmatpush.bf16.msrb.mxu2 %v8520_v37 }
 0x806   :  { %4441 = vmatpush.bf16.msra.mxu0 %v8462_v45  ;;  %v8508_v45 = vld [vmem:[#allocation10 + $0x1b8] sm:$0xff] }
 0x807   :  { %v4147_v10 = vpop.f32.mrf.mxu2 }
 0x808   :  { %v4237_v8 = vadd.f32 %v4236_v62, %v4147_v10  ;;  %v8511_v62 = vld [vmem:[#allocation10 + $0x1d0] sm:$0xff]  ;;  %v4262_v10 = vmax.f32 %v4254_v51, %v4222_v31  ;;  %v11207_v31 = vpop.f32.mrf.mxu1 }
 0x809   :  { %5004 = vmatpush.bf16.msra.mxu1 %v8511_v62  ;;  %5098 = vmatpush.bf16.msrb.mxu2 %v8519_v26  ;;  %v8470_v26 = vld [vmem:[#allocation10 + $0x88] sm:$0xff]  ;;  %12231 = vst [vmem:[#allocation53_spill] sm:$0xff] %v11207_v31  ;;  %v8507_v51 = vld [vmem:[#allocation10 + $0x1b0] sm:$0xff] }
 0x80a   :  { %v4268_v25 = vmax.f32 %v4260_v35, %v4237_v8  ;;  %v8461_v8 = vld [vmem:[#allocation10 + $0x40] sm:$0xff] }
 0x80b   :  { %4442 = vmatpush.bf16.msra.mxu0 %v8461_v8 }
 0x80c   :  { %v11163_v21 = vpack.c.bf16 %v4268_v25, %v4267_v28  ;;  %v4244_v25 = vpop.f32.mrf.mxu3 }
 0x80d   :  { %5005 = vmatpush.bf16.msra.mxu1 %v8510_v6  ;;  %5099 = vmatpush.bf16.msrb.mxu2 %v8518_v4 }
 0x80e   :  { %4354 = vmatmul.bf16.gmra.mxu0 %v11163_v21  ;;  %4636 = vmatmul.bf16.gmra.mxu1 %v11163_v21 }
 0x80f   :  { %4730 = vmatmul.bf16.gmra.mxu2 %v11163_v21  ;;  %4824 = vmatmul.bf16.gmra.mxu3 %v11163_v21  ;;  %v4150_v22 = vpop.f32.mrf.mxu2 }
 0x810   :  { %v4240_v36 = vadd.f32 %v4239_v20, %v4150_v22  ;;  %v4207_v20 = vadd.f32 %v11104_v44, %v11118_v53  ;;  %v8475_v44 = vld [vmem:[#allocation10 + $0xb0] sm:$0xff]  ;;  %v8474_v53 = vld [vmem:[#allocation10 + $0xa8] sm:$0xff] }
 0x811   :  { %5006 = vmatpush.bf16.msra.mxu1 %v8509_v7  ;;  %5100 = vmatpush.bf16.msrb.mxu2 %v8517_v12  ;;  %v8505_v12 = vld [vmem:[#allocation10 + $0x1a0] sm:$0xff] }
 0x812   :  { %v4269_v24 = vmax.f32 %v11132_v0, %v4240_v36  ;;  %v4227_v0 = vadd.f32 %v11136_v59, %v11143_v30  ;;  %v4256_v19 = vmax.f32 %v11094_v49, %v4207_v20  ;;  %v8476_v49 = vld [vmem:[#allocation10 + $0xb8] sm:$0xff]  ;;  %v8473_v59 = vld [vmem:[#allocation10 + $0xa0] sm:$0xff]  ;;  %v8471_v30 = vld [vmem:[#allocation10 + $0x90] sm:$0xff] }
 0x813   :  { %4529 = vmatpush.bf16.msrb.mxu0 %v8476_v49  ;;  %v8506_v36 = vld [vmem:[#allocation10 + $0x1a8] sm:$0xff] }
 0x814   :  { %v4246_v50 = vpop.f32.mrf.mxu3  ;;  %v4264_v2 = vmax.f32 %v4256_v19, %v4227_v0  ;;  %v8503_v0 = vld [vmem:[#allocation10 + $0x190] sm:$0xff]  ;;  %v8502_v19 = vld [vmem:[#allocation10 + $0x188] sm:$0xff] }
 0x817   :  { %v4152_v5 = vpop.f32.mrf.mxu2  ;;  %4530 = vmatpush.bf16.msrb.mxu0 %v8475_v44 }
 0x818   :  { %v4242_v35 = vadd.f32 %v4241_v48, %v4152_v5  ;;  %v11205_v48 = vpop.f32.mrf.mxu0 }
 0x819   :  { %12230 = vst [vmem:[#allocation52_spill] sm:$0xff] %v11205_v48 }
 0x81a   :  { %v4270_v15 = vmax.f32 %v4262_v10, %v4242_v35 }
 0x81b   :  { %4531 = vmatpush.bf16.msrb.mxu0 %v8474_v53 }
 0x81c   :  { %v11175_v28 = vpack.c.bf16 %v4270_v15, %v4269_v24  ;;  %v8504_v24 = vld [vmem:[#allocation10 + $0x198] sm:$0xff] }
 0x81e   :  { %4359 = vmatmul.bf16.gmra.mxu0 %v11175_v28  ;;  %4641 = vmatmul.bf16.gmra.mxu1 %v11175_v28 }
 0x81f   :  { %4735 = vmatmul.bf16.gmra.mxu2 %v11175_v28  ;;  %4829 = vmatmul.bf16.gmra.mxu3 %v11175_v28  ;;  %v4155_v3 = vpop.f32.mrf.mxu2 }
 0x820   :  { %v4245_v39 = vadd.f32 %v4244_v25, %v4155_v3  ;;  %4532 = vmatpush.bf16.msrb.mxu0 %v8473_v59 }
 0x822   :  { %v4271_v22 = vmax.f32 %v11141_v54, %v4245_v39  ;;  %v8472_v54 = vld [vmem:[#allocation10 + $0x98] sm:$0xff] }
 0x824   :  { %4533 = vmatpush.bf16.msrb.mxu0 %v8472_v54 }
 0x827   :  { %v4157_v56 = vpop.f32.mrf.mxu2 }
 0x828   :  { %v4247_v37 = vadd.f32 %v4246_v50, %v4157_v56  ;;  %4534 = vmatpush.bf16.msrb.mxu0 %v8471_v30 }
 0x82a   :  { %v4272_v60 = vmax.f32 %v4264_v2, %v4247_v37 }
 0x82c   :  { %v11187_v62 = vpack.c.bf16 %v4272_v60, %v4271_v22  ;;  %4535 = vmatpush.bf16.msrb.mxu0 %v8470_v26  ;;  %v8501_v22 = vld [vmem:[#allocation10 + $0x180] sm:$0xff] }
 0x82e   :  { %4364 = vmatmul.bf16.gmra.mxu0 %v11187_v62  ;;  %4646 = vmatmul.bf16.gmra.mxu1 %v11187_v62 }
 0x82f   :  { %4740 = vmatmul.bf16.gmra.mxu2 %v11187_v62  ;;  %4834 = vmatmul.bf16.gmra.mxu3 %v11187_v62 }
 0x830   :  { %4536 = vmatpush.bf16.msrb.mxu0 %v8469_v61 }
 0x83e   :  { %4443 = vmatmul.bf16.vlgmr.msra.gmra.mxu0 %v11151_v13  ;;  %5007 = vmatmul.bf16.vlgmr.msra.gmra.mxu1 %v11151_v13 }
 0x83f   :  { %5101 = vmatmul.bf16.vlgmr.msrb.gmra.mxu2 %v11151_v13  ;;  %4905 = vmatpush.bf16.msra.mxu0 %v8508_v45 }
 0x843   :  { %4906 = vmatpush.bf16.msra.mxu0 %v8507_v51 }
 0x847   :  { %4907 = vmatpush.bf16.msra.mxu0 %v8506_v36 }
 0x84b   :  { %4908 = vmatpush.bf16.msra.mxu0 %v8505_v12 }
 0x84e   :  { %4448 = vmatmul.bf16.gmra.mxu0 %v11163_v21  ;;  %5012 = vmatmul.bf16.gmra.mxu1 %v11163_v21 }
 0x84f   :  { %5106 = vmatmul.bf16.gmra.mxu2 %v11163_v21  ;;  %4909 = vmatpush.bf16.msra.mxu0 %v8504_v24 }
 0x853   :  { %4910 = vmatpush.bf16.msra.mxu0 %v8503_v0 }
 0x857   :  { %4911 = vmatpush.bf16.msra.mxu0 %v8502_v19 }
 0x85b   :  { %4912 = vmatpush.bf16.msra.mxu0 %v8501_v22 }
 0x85e   :  { %4453 = vmatmul.bf16.gmra.mxu0 %v11175_v28  ;;  %5017 = vmatmul.bf16.gmra.mxu1 %v11175_v28 }
 0x85f   :  { %5111 = vmatmul.bf16.gmra.mxu2 %v11175_v28 }
 0x86e   :  { %4458 = vmatmul.bf16.gmra.mxu0 %v11187_v62  ;;  %5022 = vmatmul.bf16.gmra.mxu1 %v11187_v62 }
 0x86f   :  { %5116 = vmatmul.bf16.gmra.mxu2 %v11187_v62 }
 0x87b   :  { %v11209_v6 = vpop.f32.mrf.mxu0  ;;  %v11211_v4 = vpop.f32.mrf.mxu1 }
 0x87e   :  { %4537 = vmatmul.bf16.vlgmr.msrb.gmra.mxu0 %v11151_v13 }
 0x882   :  { %v11214_v5 = vpop.f32.mrf.mxu2  ;;  %v11216_v10 = vpop.f32.mrf.mxu3 }
 0x883   :  { %v11218_v35 = vpop.f32.mrf.mxu0  ;;  %v4634_v8 = vpop.f32.mrf.mxu1 }
 0x884   :  { %v5134_v33 = vpack.c.bf16 %v4634_v8, %v11211_v4 }
 0x88a   :  { %v11222_v15 = vpop.f32.mrf.mxu2  ;;  %v4822_v25 = vpop.f32.mrf.mxu3 }
 0x88b   :  { %v11224_v3 = vpop.f32.mrf.mxu0  ;;  %v4637_v20 = vpop.f32.mrf.mxu1 }
 0x88e   :  { %4542 = vmatmul.bf16.gmra.mxu0 %v11163_v21 }
 0x892   :  { %v11227_v39 = vpop.f32.mrf.mxu2  ;;  %v4825_v56 = vpop.f32.mrf.mxu3 }
 0x893   :  { %v11229_v50 = vpop.f32.mrf.mxu0  ;;  %v4639_v2 = vpop.f32.mrf.mxu1 }
 0x894   :  { %v5135_v29 = vpack.c.bf16 %v4639_v2, %v4637_v20 }
 0x89a   :  { %v4733_v60 = vpop.f32.mrf.mxu2  ;;  %v4827_v49 = vpop.f32.mrf.mxu3 }
 0x89b   :  { %v11233_v44 = vpop.f32.mrf.mxu0  ;;  %v4642_v53 = vpop.f32.mrf.mxu1  ;;  %v5143_v43 = vpack.c.bf16 %v4827_v49, %v4825_v56 }
 0x89e   :  { %4547 = vmatmul.bf16.gmra.mxu0 %v11175_v28 }
 0x8a2   :  { %v4736_v59 = vpop.f32.mrf.mxu2  ;;  %v4830_v54 = vpop.f32.mrf.mxu3 }
 0x8a3   :  { %v11236_v30 = vpop.f32.mrf.mxu0  ;;  %v4644_v26 = vpop.f32.mrf.mxu1 }
 0x8a4   :  { %v5136_v31 = vpack.c.bf16 %v4644_v26, %v4642_v53 }
 0x8aa   :  { %v4738_v45 = vpop.f32.mrf.mxu2  ;;  %v4832_v51 = vpop.f32.mrf.mxu3 }
 0x8ab   :  { %v11240_v36 = vpop.f32.mrf.mxu0  ;;  %v4647_v12 = vpop.f32.mrf.mxu1  ;;  %v5144_v1 = vpack.c.bf16 %v4832_v51, %v4830_v54 }
 0x8ae   :  { %4552 = vmatmul.bf16.gmra.mxu0 %v11187_v62 }
 0x8b2   :  { %v4835_v24 = vpop.f32.mrf.mxu3  ;;  %v4741_v22 = vpop.f32.mrf.mxu2 }
 0x8b3   :  { %v11243_v0 = vpop.f32.mrf.mxu0  ;;  %v4649_v19 = vpop.f32.mrf.mxu1 }
 0x8b4   :  { %v5125_v7 = vpack.c.bf16 %v11243_v0, %v11240_v36  ;;  %v5137_v37 = vpack.c.bf16 %v4649_v19, %v4647_v12 }
 0x8b6   :  { %5828 = vmatpush.bf16.msrb.mxu0 %v5137_v37 }
 0x8ba   :  { %v4837_v48 = vpop.f32.mrf.mxu3  ;;  %5829 = vmatpush.bf16.msrb.mxu0 %v5136_v31  ;;  %v4743_v32 = vpop.f32.mrf.mxu2  ;;  %v5142_v31 = vpack.c.bf16 %v4822_v25, %v11216_v10 }
 0x8bb   :  { %v5145_v61 = vpack.c.bf16 %v4837_v48, %v4835_v24  ;;  %v4444_v47 = vpop.f32.mrf.mxu0  ;;  %v5008_v14 = vpop.f32.mrf.mxu1  ;;  %v5141_v20 = vpack.c.bf16 %v4743_v32, %v4741_v22 }
 0x8bd   :  { %5917 = vmatpush.bf16.msrb.mxu1 %v5145_v61 }
 0x8be   :  { %4913 = vmatmul.bf16.vlgmr.msra.gmra.mxu0 %v11151_v13 }
 0x8bf   :  { %5830 = vmatpush.bf16.msrb.mxu0 %v5135_v29  ;;  %v5140_v29 = vpack.c.bf16 %v4738_v45, %v4736_v59 }
 0x8c1   :  { %5918 = vmatpush.bf16.msrb.mxu1 %v5144_v1  ;;  %v5139_v1 = vpack.c.bf16 %v4733_v60, %v11227_v39 }
 0x8c2   :  { %v11250_v48 = vpop.f32.mrf.mxu2 }
 0x8c3   :  { %5831 = vmatpush.bf16.msrb.mxu0 %v5134_v33  ;;  %v4446_v12 = vpop.f32.mrf.mxu0  ;;  %v5010_v37 = vpop.f32.mrf.mxu1 }
 0x8c4   :  { %v5126_v19 = vpack.c.bf16 %v4446_v12, %v4444_v47  ;;  %v8527_v47 = vld [vmem:[%s12118_s8 + $0x10] sm:$0xf0] }
 0x8c5   :  { %5919 = vmatpush.bf16.msrb.mxu1 %v5143_v43  ;;  %v5138_v43 = vpack.c.bf16 %v11222_v15, %v11214_v5 }
 0x8c9   :  { %5920 = vmatpush.bf16.msrb.mxu1 %v5142_v31 }
 0x8ca   :  { %v5104_v13 = vpop.f32.mrf.mxu2 }
 0x8cb   :  { %v4449_v2 = vpop.f32.mrf.mxu0  ;;  %v5013_v53 = vpop.f32.mrf.mxu1  ;;  %v5154_v12 = vpack.c.bf16 %v5104_v13, %v11250_v48  ;;  %v8528_v48 = vld [vmem:[%s12118_s8 + $0x18] sm:$0xf0] }
 0x8cd   :  { %5921 = vmatpush.bf16.msrb.mxu1 %v5141_v20  ;;  %v12232_v20 = vpack.c.bf16 %v11236_v30, %v11233_v44  ;;  %v12234_v44 = vpack.c.bf16 %v11218_v35, %v11209_v6 }
 0x8ce   :  { %4918 = vmatmul.bf16.gmra.mxu0 %v11163_v21 }
 0x8d1   :  { %5922 = vmatpush.bf16.msrb.mxu1 %v5140_v29 }
 0x8d2   :  { %v5107_v32 = vpop.f32.mrf.mxu2 }
 0x8d3   :  { %v4451_v33 = vpop.f32.mrf.mxu0  ;;  %v5015_v4 = vpop.f32.mrf.mxu1 }
 0x8d4   :  { %v5127_v51 = vpack.c.bf16 %v4451_v33, %v4449_v2  ;;  %v5151_v24 = vpack.c.bf16 %v5015_v4, %v5013_v53  ;;  %v12233_v2 = vpack.c.bf16 %v11229_v50, %v11224_v3  ;;  %v8532_v53 = vld [vmem:[%s12118_s8 + $0x38] sm:$0xf0]  ;;  %v7815_v33 = vld [vmem:[%s12118_s8 + $0x8] sm:$0xf] }
 0x8d5   :  { %5923 = vmatpush.bf16.msrb.mxu1 %v5139_v1  ;;  %v7816_v13 = vor.u32 %v8528_v48, %v7815_v33  ;;  %v8548_v33 = vld [vmem:[%s12118_s8 + $0xb8] sm:$0xf0] }
 0x8d9   :  { %5924 = vmatpush.bf16.msrb.mxu1 %v5138_v43  ;;  %v7847_v43 = vld [vmem:[%s12118_s8 + $0x50] sm:$0xf] }
 0x8da   :  { %v5109_v21 = vpop.f32.mrf.mxu2 }
 0x8db   :  { %v4454_v10 = vpop.f32.mrf.mxu0  ;;  %v5018_v8 = vpop.f32.mrf.mxu1  ;;  %v5155_v3 = vpack.c.bf16 %v5109_v21, %v5107_v32  ;;  %v8533_v21 = vld [vmem:[%s12118_s8 + $0x40] sm:$0xf0] }
 0x8dc   :  { %5925 = vmatmul.bf16.vlgmr.msrb.gmra.mxu1 %v7816_v13 }
 0x8de   :  { %4923 = vmatmul.bf16.gmra.mxu0 %v11175_v28 }
 0x8e2   :  { %v5112_v39 = vpop.f32.mrf.mxu2 }
 0x8e3   :  { %v4456_v25 = vpop.f32.mrf.mxu0  ;;  %v5020_v56 = vpop.f32.mrf.mxu1 }
 0x8e4   :  { %v5128_v5 = vpack.c.bf16 %v4456_v25, %v4454_v10  ;;  %v5152_v15 = vpack.c.bf16 %v5020_v56, %v5018_v8  ;;  %v8537_v10 = vld [vmem:[%s12118_s8 + $0x60] sm:$0xf0]  ;;  %v7835_v56 = vld [vmem:[%s12118_s8 + $0x30] sm:$0xf] }
 0x8e5   :  { %v7848_v8 = vor.u32 %v8537_v10, %v7847_v43  ;;  %v8557_v43 = vld [vmem:[%s12118_s8 + $0x100] sm:$0xf0]  ;;  %v8540_v10 = vld [vmem:[%s12118_s8 + $0x7c] sm:$0xf] }
 0x8ea   :  { %v5114_v45 = vpop.f32.mrf.mxu2 }
 0x8eb   :  { %v4459_v49 = vpop.f32.mrf.mxu0  ;;  %v5023_v59 = vpop.f32.mrf.mxu1  ;;  %v5156_v0 = vpack.c.bf16 %v5114_v45, %v5112_v39 }
 0x8ee   :  { %4928 = vmatmul.bf16.gmra.mxu0 %v11187_v62  ;;  %v5150_v62 = vpack.c.bf16 %v5010_v37, %v5008_v14  ;;  %v7807_v14 = vld [vmem:[%s12118_s8] sm:$0xf]  ;;  %v7827_v37 = vld [vmem:[%s12118_s8 + $0x28] sm:$0xf] }
 0x8ef   :  { %v7828_v6 = vor.u32 %v8532_v53, %v7827_v37 }
 0x8f2   :  { %v5117_v31 = vpop.f32.mrf.mxu2 }
 0x8f3   :  { %v4461_v60 = vpop.f32.mrf.mxu0  ;;  %v5025_v54 = vpop.f32.mrf.mxu1 }
 0x8f4   :  { %v5129_v26 = vpack.c.bf16 %v4461_v60, %v4459_v49  ;;  %v5153_v61 = vpack.c.bf16 %v5025_v54, %v5023_v59  ;;  %v7836_v49 = vor.u32 %v8533_v21, %v7835_v56  ;;  %v7867_v54 = vld [vmem:[%s12118_s8 + $0x78] sm:$0xf] }
 0x8f6   :  { %5739 = vmatpush.bf16.msra.mxu3 %v5129_v26  ;;  %6006 = vmatpush.bf16.msra.mxu2 %v5153_v61  ;;  %v8542_v26 = vld [vmem:[%s12118_s8 + $0x88] sm:$0xf0]  ;;  %v8525_v61 = vld [vmem:[%s12118_s8 + $0x4] sm:$0xf] }
 0x8f7   :  { %5930 = vmatmul.bf16.gmra.mxu1 %v7836_v49  ;;  %v7868_v45 = vor.u32 %v8542_v26, %v7867_v54  ;;  %v7915_v49 = vld [vmem:[%s12118_s8 + $0xd0] sm:$0xf] }
 0x8fa   :  { %5740 = vmatpush.bf16.msra.mxu3 %v5128_v5  ;;  %6007 = vmatpush.bf16.msra.mxu2 %v5152_v15  ;;  %v5119_v1 = vpop.f32.mrf.mxu2  ;;  %v7809_v5 = vld [vmem:[%s12118_s8 + $0x14] sm:$0xf0] }
 0x8fb   :  { %v11258_v28 = vpop.f32.mrf.mxu0  ;;  %v5157_v36 = vpack.c.bf16 %v5119_v1, %v5117_v31  ;;  %v7829_v1 = vld [vmem:[%s12118_s8 + $0x3c] sm:$0xf0] }
 0x8fe   :  { %5741 = vmatpush.bf16.msra.mxu3 %v5127_v51  ;;  %6008 = vmatpush.bf16.msra.mxu2 %v5151_v24  ;;  %v7812_v51 = vor.u32 %v8525_v61, %v7809_v5  ;;  %v7947_v61 = vld [vmem:[%s12118_s8 + $0x118] sm:$0xf]  ;;  %v8562_v5 = vld [vmem:[%s12118_s8 + $0x128] sm:$0xf0] }
 0x902   :  { %5742 = vmatpush.bf16.msra.mxu3 %v5126_v19  ;;  %6009 = vmatpush.bf16.msra.mxu2 %v5150_v62  ;;  %v7855_v19 = vld [vmem:[%s12118_s8 + $0x58] sm:$0xf]  ;;  %v8538_v62 = vld [vmem:[%s12118_s8 + $0x68] sm:$0xf0] }
 0x903   :  { %v4540_v22 = vpop.f32.mrf.mxu0  ;;  %v7856_v31 = vor.u32 %v8538_v62, %v7855_v19  ;;  %v7889_v19 = vld [vmem:[%s12118_s8 + $0xb4] sm:$0xf0] }
 0x904   :  { %v5130_v15 = vpack.c.bf16 %v4540_v22, %v11258_v28  ;;  %v7887_v28 = vld [vmem:[%s12118_s8 + $0xa0] sm:$0xf]  ;;  %v8547_v22 = vld [vmem:[%s12118_s8 + $0xb0] sm:$0xf0] }
 0x906   :  { %5743 = vmatpush.bf16.msra.mxu3 %v5125_v7  ;;  %v7808_v7 = vor.u32 %v8527_v47, %v7807_v14 }
 0x907   :  { %5935 = vmatmul.bf16.gmra.mxu1 %v7856_v31  ;;  %v7948_v31 = vor.u32 %v8562_v5, %v7947_v61 }
 0x90a   :  { %5744 = vmatpush.bf16.msra.mxu3 %v12232_v20 }
 0x90b   :  { %v4543_v29 = vpop.f32.mrf.mxu0 }
 0x90e   :  { %5745 = vmatpush.bf16.msra.mxu3 %v12233_v2  ;;  %v7888_v2 = vor.u32 %v8547_v22, %v7887_v28  ;;  %v7935_v22 = vld [vmem:[%s12118_s8 + $0xf8] sm:$0xf] }
 0x912   :  { %5746 = vmatpush.bf16.msra.mxu3 %v12234_v44 }
 0x913   :  { %v4545_v30 = vpop.f32.mrf.mxu0 }
 0x914   :  { %v5131_v60 = vpack.c.bf16 %v4545_v30, %v4543_v29  ;;  %v8530_v29 = vld [vmem:[%s12118_s8 + $0x2c] sm:$0xf] }
 0x915   :  { %5747 = vmatmul.bf16.vlgmr.msra.gmra.mxu3 %v7808_v7  ;;  %v7832_v14 = vor.u32 %v8530_v29, %v7829_v1  ;;  %v8543_v7 = vld [vmem:[%s12118_s8 + $0x90] sm:$0xf0]  ;;  %v8558_v29 = vld [vmem:[%s12118_s8 + $0x108] sm:$0xf0] }
 0x916   :  { %6099 = vmatpush.bf16.msrb.mxu3 %v5157_v36  ;;  %v7875_v36 = vld [vmem:[%s12118_s8 + $0x80] sm:$0xf]  ;;  %v7936_v1 = vor.u32 %v8558_v29, %v7935_v22  ;;  %v8582_v22 = vld [vmem:[%s12118_s8 + $0x1c8] sm:$0xf0] }
 0x917   :  { %v7876_v44 = vor.u32 %v8543_v7, %v7875_v36  ;;  %v7909_v36 = vld [vmem:[%s12118_s8 + $0xdc] sm:$0xf0]  ;;  %v8546_v29 = vld [vmem:[%s12118_s8 + $0xac] sm:$0xf] }
 0x919   :  { %5940 = vmatmul.bf16.gmra.mxu1 %v7876_v44 }
 0x91a   :  { %6100 = vmatpush.bf16.msrb.mxu3 %v5156_v0  ;;  %v7907_v0 = vld [vmem:[%s12118_s8 + $0xc8] sm:$0xf] }
 0x91b   :  { %v4548_v50 = vpop.f32.mrf.mxu0 }
 0x91e   :  { %6101 = vmatpush.bf16.msrb.mxu3 %v5155_v3  ;;  %v8552_v3 = vld [vmem:[%s12118_s8 + $0xd8] sm:$0xf0] }
 0x91f   :  { %v7908_v37 = vor.u32 %v8552_v3, %v7907_v0  ;;  %v7955_v0 = vld [vmem:[%s12118_s8 + $0x120] sm:$0xf]  ;;  %v8563_v3 = vld [vmem:[%s12118_s8 + $0x130] sm:$0xf0] }
 0x922   :  { %6102 = vmatpush.bf16.msrb.mxu3 %v5154_v12  ;;  %v7849_v12 = vld [vmem:[%s12118_s8 + $0x64] sm:$0xf0] }
 0x923   :  { %v4550_v35 = vpop.f32.mrf.mxu0 }
 0x924   :  { %v5132_v59 = vpack.c.bf16 %v4550_v35, %v4548_v50  ;;  %v8535_v50 = vld [vmem:[%s12118_s8 + $0x54] sm:$0xf]  ;;  %v7895_v35 = vld [vmem:[%s12118_s8 + $0xa8] sm:$0xf] }
 0x925   :  { %5752 = vmatmul.bf16.gmra.mxu3 %v7828_v6  ;;  %v7852_v53 = vor.u32 %v8535_v50, %v7849_v12  ;;  %v7896_v48 = vor.u32 %v8548_v33, %v7895_v35  ;;  %v7956_v50 = vor.u32 %v8563_v3, %v7955_v0  ;;  %v7857_v35 = vld [vmem:[%s12118_s8 + $0x6c] sm:$0xf0]  ;;  %v8555_v33 = vld [vmem:[%s12118_s8 + $0xf4] sm:$0xf]  ;;  %v8015_v3 = vld [vmem:[%s12118_s8 + $0x198] sm:$0xf] }
 0x929   :  { %5945 = vmatmul.bf16.gmra.mxu1 %v7896_v48  ;;  %v7929_v48 = vld [vmem:[%s12118_s8 + $0x104] sm:$0xf0] }
 0x92b   :  { %v4553_v4 = vpop.f32.mrf.mxu0 }
 0x933   :  { %v4555_v32 = vpop.f32.mrf.mxu0 }
 0x934   :  { %v5133_v25 = vpack.c.bf16 %v4555_v32, %v4553_v4  ;;  %v7927_v4 = vld [vmem:[%s12118_s8 + $0xf0] sm:$0xf] }
 0x935   :  { %5757 = vmatmul.bf16.gmra.mxu3 %v7848_v8  ;;  %v7869_v8 = vld [vmem:[%s12118_s8 + $0x8c] sm:$0xf0]  ;;  %v7928_v32 = vor.u32 %v8557_v43, %v7927_v4 }
 0x936   :  { %5832 = vmatpush.bf16.msrb.mxu0 %v5133_v25  ;;  %v7872_v25 = vor.u32 %v8540_v10, %v7869_v8  ;;  %v7932_v10 = vor.u32 %v8555_v33, %v7929_v48  ;;  %v7975_v8 = vld [vmem:[%s12118_s8 + $0x148] sm:$0xf]  ;;  %v8047_v33 = vld [vmem:[%s12118_s8 + $0x1e0] sm:$0xf] }
 0x93a   :  { %5833 = vmatpush.bf16.msrb.mxu0 %v5132_v59  ;;  %v8553_v59 = vld [vmem:[%s12118_s8 + $0xe0] sm:$0xf0] }
 0x93b   :  { %v11303_v39 = vpop.f32.mrf.mxu0 }
 0x93e   :  { %5834 = vmatpush.bf16.msrb.mxu0 %v5131_v60  ;;  %v7916_v60 = vor.u32 %v8553_v59, %v7915_v49  ;;  %v8577_v49 = vld [vmem:[%s12118_s8 + $0x1a0] sm:$0xf0] }
 0x93f   :  { %v8541_v59 = vld [vmem:[%s12118_s8 + $0x84] sm:$0xf] }
 0x940   :  { %5950 = vmatmul.bf16.gmra.mxu1 %v7916_v60  ;;  %v7877_v60 = vld [vmem:[%s12118_s8 + $0x94] sm:$0xf0] }
 0x942   :  { %5835 = vmatpush.bf16.msrb.mxu0 %v5130_v15  ;;  %v8526_v15 = vld [vmem:[%s12118_s8 + $0xc] sm:$0xf] }
 0x943   :  { %v11318_v24 = vpop.f32.mrf.mxu0 }
 0x944   :  { %v5146_v62 = vpack.c.bf16 %v11318_v24, %v11303_v39  ;;  %v7967_v39 = vld [vmem:[%s12118_s8 + $0x140] sm:$0xf]  ;;  %v8567_v24 = vld [vmem:[%s12118_s8 + $0x150] sm:$0xf0] }
 0x945   :  { %5762 = vmatmul.bf16.gmra.mxu3 %v7868_v45  ;;  %5836 = vmatmul.bf16.vlgmr.msrb.gmra.mxu0 %v7812_v51  ;;  %v7817_v45 = vld [vmem:[%s12118_s8 + $0x1c] sm:$0xf0]  ;;  %v8545_v51 = vld [vmem:[%s12118_s8 + $0xa4] sm:$0xf]  ;;  %v7968_v7 = vor.u32 %v8567_v24, %v7967_v39 }
 0x946   :  { %v7892_v28 = vor.u32 %v8545_v51, %v7889_v19  ;;  %v7995_v19 = vld [vmem:[%s12118_s8 + $0x170] sm:$0xf]  ;;  %v8565_v24 = vld [vmem:[%s12118_s8 + $0x144] sm:$0xf] }
 0x94b   :  { %v4919_v20 = vpop.f32.mrf.mxu0 }
 0x950   :  { %5955 = vmatmul.bf16.gmra.mxu1 %v7936_v1  ;;  %v7897_v1 = vld [vmem:[%s12118_s8 + $0xbc] sm:$0xf0] }
 0x953   :  { %v4921_v47 = vpop.f32.mrf.mxu0 }
 0x954   :  { %v5147_v26 = vpack.c.bf16 %v4921_v47, %v4919_v20  ;;  %v7820_v20 = vor.u32 %v8526_v15, %v7817_v45  ;;  %v8550_v47 = vld [vmem:[%s12118_s8 + $0xcc] sm:$0xf]  ;;  %v7880_v15 = vor.u32 %v8541_v59, %v7877_v60 }
 0x955   :  { %5767 = vmatmul.bf16.gmra.mxu3 %v7888_v2  ;;  %5841 = vmatmul.bf16.gmra.mxu0 %v7832_v14  ;;  %v8531_v2 = vld [vmem:[%s12118_s8 + $0x34] sm:$0xf]  ;;  %v7837_v14 = vld [vmem:[%s12118_s8 + $0x44] sm:$0xf0] }
 0x956   :  { %v7840_v44 = vor.u32 %v8531_v2, %v7837_v14  ;;  %v7969_v2 = vld [vmem:[%s12118_s8 + $0x154] sm:$0xf0] }
 0x959   :  { %v5926_v51 = vpop.f32.mrf.mxu1 }
 0x95b   :  { %v4924_v30 = vpop.f32.mrf.mxu0 }
 0x960   :  { %5960 = vmatmul.bf16.gmra.mxu1 %v7956_v50  ;;  %v8578_v50 = vld [vmem:[%s12118_s8 + $0x1a8] sm:$0xf0] }
 0x961   :  { %v5928_v39 = vpop.f32.mrf.mxu1 }
 0x963   :  { %v4926_v6 = vpop.f32.mrf.mxu0 }
 0x964   :  { %v5148_v54 = vpack.c.bf16 %v4926_v6, %v4924_v30  ;;  %v7912_v30 = vor.u32 %v8550_v47, %v7909_v36  ;;  %v8536_v6 = vld [vmem:[%s12118_s8 + $0x5c] sm:$0xf]  ;;  %v7900_v36 = vor.u32 %v8546_v29, %v7897_v1  ;;  %v7937_v1 = vld [vmem:[%s12118_s8 + $0x10c] sm:$0xf0] }
 0x965   :  { %5772 = vmatmul.bf16.gmra.mxu3 %v7908_v37  ;;  %5846 = vmatmul.bf16.gmra.mxu0 %v7852_v53  ;;  %v7987_v37 = vld [vmem:[%s12118_s8 + $0x168] sm:$0xf]  ;;  %v8572_v53 = vld [vmem:[%s12118_s8 + $0x178] sm:$0xf0]  ;;  %v7860_v43 = vor.u32 %v8536_v6, %v7857_v35 }
 0x966   :  { %v7988_v4 = vor.u32 %v8572_v53, %v7987_v37  ;;  %v8016_v37 = vor.u32 %v8578_v50, %v8015_v3  ;;  %v8556_v29 = vld [vmem:[%s12118_s8 + $0xfc] sm:$0xf]  ;;  %v8055_v3 = vld [vmem:[%s12118_s8 + $0x1e8] sm:$0xf] }
 0x967   :  { %v8588_v50 = vld [vmem:[%s12118_s8 + $0x1f8] sm:$0xf0] }
 0x96b   :  { %v4929_v13 = vpop.f32.mrf.mxu0 }
 0x973   :  { %v4931_v56 = vpop.f32.mrf.mxu0 }
 0x974   :  { %v5149_v21 = vpack.c.bf16 %v4931_v56, %v4929_v13  ;;  %v5931_v6 = vpop.f32.mrf.mxu1 }
 0x975   :  { %5777 = vmatmul.bf16.gmra.mxu3 %v7928_v32  ;;  %5851 = vmatmul.bf16.gmra.mxu0 %v7872_v25  ;;  %v8568_v32 = vld [vmem:[%s12118_s8 + $0x158] sm:$0xf0] }
 0x976   :  { %6010 = vmatpush.bf16.msra.mxu2 %v5149_v21  ;;  %v7976_v25 = vor.u32 %v8568_v32, %v7975_v8  ;;  %v8007_v21 = vld [vmem:[%s12118_s8 + $0x190] sm:$0xf]  ;;  %v7989_v8 = vld [vmem:[%s12118_s8 + $0x17c] sm:$0xf0] }
 0x977   :  { %v8008_v5 = vor.u32 %v8577_v49, %v8007_v21 }
 0x978   :  { %5965 = vmatmul.bf16.gmra.mxu1 %v7976_v25 }
 0x97a   :  { %6011 = vmatpush.bf16.msra.mxu2 %v5148_v54  ;;  %v8560_v54 = vld [vmem:[%s12118_s8 + $0x11c] sm:$0xf] }
 0x97c   :  { %v5933_v60 = vpop.f32.mrf.mxu1 }
 0x97e   :  { %6012 = vmatpush.bf16.msra.mxu2 %v5147_v26  ;;  %v7949_v26 = vld [vmem:[%s12118_s8 + $0x12c] sm:$0xf0] }
 0x97f   :  { %v7952_v45 = vor.u32 %v8560_v54, %v7949_v26 }
 0x982   :  { %6013 = vmatpush.bf16.msra.mxu2 %v5146_v62  ;;  %v8573_v62 = vld [vmem:[%s12118_s8 + $0x180] sm:$0xf0] }
 0x985   :  { %5782 = vmatmul.bf16.gmra.mxu3 %v7948_v31  ;;  %6014 = vmatmul.bf16.vlgmr.msra.gmra.mxu2 %v7820_v20  ;;  %v7996_v31 = vor.u32 %v8573_v62, %v7995_v19 }
 0x986   :  { %5856 = vmatmul.bf16.gmra.mxu0 %v7892_v28  ;;  %v8027_v28 = vld [vmem:[%s12118_s8 + $0x1b8] sm:$0xf] }
 0x987   :  { %v8028_v47 = vor.u32 %v8582_v22, %v8027_v28  ;;  %v8592_v22 = vld [vmem:[%s12118_s8 + $0x218] sm:$0xf0] }
 0x988   :  { %5970 = vmatmul.bf16.gmra.mxu1 %v7996_v31  ;;  %v8067_v31 = vld [vmem:[%s12118_s8 + $0x208] sm:$0xf] }
 0x995   :  { %5787 = vmatmul.bf16.gmra.mxu3 %v7968_v7  ;;  %6019 = vmatmul.bf16.gmra.mxu2 %v7840_v44  ;;  %v7972_v44 = vor.u32 %v8565_v24, %v7969_v2  ;;  %v8068_v2 = vor.u32 %v8592_v22, %v8067_v31 }
 0x996   :  { %5861 = vmatmul.bf16.gmra.mxu0 %v7912_v30 }
 0x998   :  { %v5748_v12 = vpop.f32.mrf.mxu3  ;;  %5975 = vmatmul.bf16.gmra.mxu1 %v8016_v37 }
 0x9a0   :  { %v5750_v13 = vpop.f32.mrf.mxu3 }
 0x9a5   :  { %5792 = vmatmul.bf16.gmra.mxu3 %v7988_v4  ;;  %6024 = vmatmul.bf16.gmra.mxu2 %v7860_v43  ;;  %v8587_v4 = vld [vmem:[%s12118_s8 + $0x1f0] sm:$0xf0] }
 0x9a6   :  { %5866 = vmatmul.bf16.gmra.mxu0 %v7932_v10  ;;  %v8551_v43 = vld [vmem:[%s12118_s8 + $0xd4] sm:$0xf]  ;;  %v7917_v10 = vld [vmem:[%s12118_s8 + $0xe4] sm:$0xf0]  ;;  %v8048_v25 = vor.u32 %v8587_v4, %v8047_v33  ;;  %v8087_v33 = vld [vmem:[%s12118_s8 + $0x230] sm:$0xf] }
 0x9a7   :  { %v7920_v21 = vor.u32 %v8551_v43, %v7917_v10  ;;  %v8597_v43 = vld [vmem:[%s12118_s8 + $0x240] sm:$0xf0] }
 0x9a8   :  { %v5753_v56 = vpop.f32.mrf.mxu3  ;;  %v8561_v10 = vld [vmem:[%s12118_s8 + $0x124] sm:$0xf] }
 0x9b0   :  { %v5755_v61 = vpop.f32.mrf.mxu3 }
 0x9b5   :  { %5797 = vmatmul.bf16.gmra.mxu3 %v8008_v5  ;;  %6029 = vmatmul.bf16.gmra.mxu2 %v7880_v15  ;;  %v8035_v5 = vld [vmem:[%s12118_s8 + $0x1c0] sm:$0xf]  ;;  %v8583_v15 = vld [vmem:[%s12118_s8 + $0x1d0] sm:$0xf0] }
 0x9b6   :  { %5871 = vmatmul.bf16.gmra.mxu0 %v7952_v45  ;;  %v8036_v45 = vor.u32 %v8583_v15, %v8035_v5 }
 0x9b8   :  { %v11478_v20 = vpop.f32.mrf.mxu3  ;;  %5980 = vmatmul.bf16.gmra.mxu1 %v8036_v45  ;;  %v8075_v45 = vld [vmem:[%s12118_s8 + $0x210] sm:$0xf] }
 0x9c0   :  { %v11498_v14 = vpop.f32.mrf.mxu3 }
 0x9c2   :  { %v5837_v7 = vpop.f32.mrf.mxu0 }
 0x9c3   :  { %v5838_v30 = vadd.f32 %v5837_v7, %v5748_v12 }
 0x9c5   :  { %5802 = vmatmul.bf16.gmra.mxu3 %v8028_v47  ;;  %6034 = vmatmul.bf16.gmra.mxu2 %v7900_v36  ;;  %v11500_v0 = vadd.f32 %v5926_v51, %v5838_v30  ;;  %v7940_v47 = vor.u32 %v8556_v29, %v7937_v1  ;;  %v8107_v29 = vld [vmem:[%s12118_s8 + $0x258] sm:$0xf] }
 0x9c6   :  { %5876 = vmatmul.bf16.gmra.mxu0 %v7972_v44 }
 0x9c8   :  { %v11508_v53 = vpop.f32.mrf.mxu3 }
 0x9ca   :  { %v5839_v35 = vpop.f32.mrf.mxu0 }
 0x9cb   :  { %v5840_v12 = vadd.f32 %v5839_v35, %v5750_v13  ;;  %v8570_v13 = vld [vmem:[%s12118_s8 + $0x16c] sm:$0xf] }
 0x9cc   :  { %v7992_v59 = vor.u32 %v8570_v13, %v7989_v8  ;;  %v7957_v13 = vld [vmem:[%s12118_s8 + $0x134] sm:$0xf0]  ;;  %v8029_v8 = vld [vmem:[%s12118_s8 + $0x1cc] sm:$0xf0] }
 0x9cd   :  { %v11513_v48 = vadd.f32 %v5928_v39, %v5840_v12  ;;  %v8009_v39 = vld [vmem:[%s12118_s8 + $0x1a4] sm:$0xf0] }
 0x9d0   :  { %v11530_v32 = vpop.f32.mrf.mxu3 }
 0x9d2   :  { %v5842_v49 = vpop.f32.mrf.mxu0 }
 0x9d3   :  { %v5843_v54 = vadd.f32 %v5842_v49, %v5753_v56  ;;  %v5936_v56 = vpop.f32.mrf.mxu1  ;;  %v8088_v49 = vor.u32 %v8597_v43, %v8087_v33  ;;  %v7823_v43 = vld [vmem:[%s12118_s8 + $0x10] sm:$0xf] }
 0x9d5   :  { %5807 = vmatmul.bf16.gmra.mxu3 %v8048_v25  ;;  %6039 = vmatmul.bf16.gmra.mxu2 %v7920_v21  ;;  %v11532_v26 = vadd.f32 %v5931_v6, %v5843_v54  ;;  %v8056_v6 = vor.u32 %v8588_v50, %v8055_v3  ;;  %v8095_v50 = vld [vmem:[%s12118_s8 + $0x238] sm:$0xf] }
 0x9d6   :  { %5881 = vmatmul.bf16.gmra.mxu0 %v7992_v59  ;;  %v7960_v59 = vor.u32 %v8561_v10, %v7957_v13  ;;  %v8529_v10 = vld [vmem:[%s12118_s8 + $0x20] sm:$0xf0]  ;;  %v8571_v13 = vld [vmem:[%s12118_s8 + $0x174] sm:$0xf] }
 0x9d7   :  { %5985 = vmatmul.bf16.gmra.mxu1 %v8056_v6 }
 0x9d8   :  { %v11540_v51 = vpop.f32.mrf.mxu3 }
 0x9da   :  { %v5844_v19 = vpop.f32.mrf.mxu0 }
 0x9db   :  { %v5845_v62 = vadd.f32 %v5844_v19, %v5755_v61  ;;  %v8575_v61 = vld [vmem:[%s12118_s8 + $0x194] sm:$0xf]  ;;  %v5938_v37 = vpop.f32.mrf.mxu1  ;;  %v8593_v19 = vld [vmem:[%s12118_s8 + $0x220] sm:$0xf0] }
 0x9dc   :  { %v8012_v7 = vor.u32 %v8575_v61, %v8009_v39  ;;  %v8602_v61 = vld [vmem:[%s12118_s8 + $0x268] sm:$0xf0] }
 0x9dd   :  { %v11545_v28 = vadd.f32 %v5933_v60, %v5845_v62  ;;  %v8076_v62 = vor.u32 %v8593_v19, %v8075_v45  ;;  %v8566_v39 = vld [vmem:[%s12118_s8 + $0x14c] sm:$0xf]  ;;  %v8115_v45 = vld [vmem:[%s12118_s8 + $0x260] sm:$0xf]  ;;  %v8603_v19 = vld [vmem:[%s12118_s8 + $0x270] sm:$0xf0] }
 0x9e0   :  { %v11562_v24 = vpop.f32.mrf.mxu3 }
 0x9e2   :  { %v5847_v36 = vpop.f32.mrf.mxu0 }
 0x9e3   :  { %v5848_v44 = vadd.f32 %v5847_v36, %v11478_v20  ;;  %v5941_v21 = vpop.f32.mrf.mxu1 }
 0x9e5   :  { %5812 = vmatmul.bf16.gmra.mxu3 %v8068_v2  ;;  %6044 = vmatmul.bf16.gmra.mxu2 %v7940_v47  ;;  %v11565_v30 = vadd.f32 %v5936_v56, %v5848_v44  ;;  %v7977_v2 = vld [vmem:[%s12118_s8 + $0x15c] sm:$0xf0]  ;;  %v8049_v47 = vld [vmem:[%s12118_s8 + $0x1f4] sm:$0xf0] }
 0x9e6   :  { %5886 = vmatmul.bf16.gmra.mxu0 %v8012_v7  ;;  %v8108_v7 = vor.u32 %v8602_v61, %v8107_v29  ;;  %v7980_v44 = vor.u32 %v8566_v39, %v7977_v2  ;;  %v8534_v29 = vld [vmem:[%s12118_s8 + $0x48] sm:$0xf0]  ;;  %v8576_v61 = vld [vmem:[%s12118_s8 + $0x19c] sm:$0xf]  ;;  %v8017_v39 = vld [vmem:[%s12118_s8 + $0x1ac] sm:$0xf0] }
 0x9e7   :  { %5990 = vmatmul.bf16.gmra.mxu1 %v8076_v62  ;;  %v8116_v62 = vor.u32 %v8603_v19, %v8115_v45  ;;  %v8089_v2 = vld [vmem:[%s12118_s8 + $0x244] sm:$0xf0] }
 0x9e8   :  { %v11573_v35 = vpop.f32.mrf.mxu3 }
 0x9ea   :  { %v5849_v12 = vpop.f32.mrf.mxu0 }
 0x9eb   :  { %v5850_v20 = vadd.f32 %v5849_v12, %v11498_v14  ;;  %v8580_v14 = vld [vmem:[%s12118_s8 + $0x1bc] sm:$0xf]  ;;  %v5943_v22 = vpop.f32.mrf.mxu1 }
 0x9ec   :  { %v8032_v54 = vor.u32 %v8580_v14, %v8029_v8  ;;  %v7997_v14 = vld [vmem:[%s12118_s8 + $0x184] sm:$0xf0]  ;;  %v8069_v8 = vld [vmem:[%s12118_s8 + $0x21c] sm:$0xf0] }
 0x9ed   :  { %v11579_v4 = vadd.f32 %v5938_v37, %v5850_v20  ;;  %v8598_v37 = vld [vmem:[%s12118_s8 + $0x248] sm:$0xf0] }
 0x9ee   :  { %v8096_v6 = vor.u32 %v8598_v37, %v8095_v50 }
 0x9f0   :  { %v11596_v25 = vpop.f32.mrf.mxu3 }
 0x9f2   :  { %v5852_v60 = vpop.f32.mrf.mxu0 }
 0x9f3   :  { %v5853_v5 = vadd.f32 %v5852_v60, %v11508_v53 }
 0x9f5   :  { %5817 = vmatmul.bf16.gmra.mxu3 %v8088_v49  ;;  %6049 = vmatmul.bf16.gmra.mxu2 %v7960_v59  ;;  %v11599_v15 = vadd.f32 %v5941_v21, %v5853_v5  ;;  %v7824_v59 = vor.u32 %v8529_v10, %v7823_v43  ;;  %v7863_v43 = vld [vmem:[%s12118_s8 + $0x60] sm:$0xf]  ;;  %v8581_v10 = vld [vmem:[%s12118_s8 + $0x1c4] sm:$0xf] }
 0x9f6   :  { %5891 = vmatmul.bf16.gmra.mxu0 %v8032_v54  ;;  %v8000_v54 = vor.u32 %v8571_v13, %v7997_v14  ;;  %v8037_v13 = vld [vmem:[%s12118_s8 + $0x1d4] sm:$0xf0]  ;;  %v8109_v14 = vld [vmem:[%s12118_s8 + $0x26c] sm:$0xf0] }
 0x9f7   :  { %5995 = vmatmul.bf16.gmra.mxu1 %v8096_v6 }
 0x9f8   :  { %v11607_v56 = vpop.f32.mrf.mxu3 }
 0x9fa   :  { %v5854_v31 = vpop.f32.mrf.mxu0 }
 0x9fb   :  { %v5855_v53 = vadd.f32 %v5854_v31, %v11530_v32  ;;  %v8585_v32 = vld [vmem:[%s12118_s8 + $0x1e4] sm:$0xf] }
 0x9fc   :  { %v8052_v3 = vor.u32 %v8585_v32, %v8049_v47 }
 0x9fd   :  { %v11613_v1 = vadd.f32 %v5943_v22, %v5855_v53  ;;  %v7843_v53 = vld [vmem:[%s12118_s8 + $0x38] sm:$0xf] }
 0xa00   :  { %v11630_v36 = vpop.f32.mrf.mxu3 }
 0xa05   :  { %5822 = vmatmul.bf16.gmra.mxu3 %v8108_v7  ;;  %6054 = vmatmul.bf16.gmra.mxu2 %v7980_v44  ;;  %v7844_v7 = vor.u32 %v8534_v29, %v7843_v53  ;;  %v8586_v53 = vld [vmem:[%s12118_s8 + $0x1ec] sm:$0xf]  ;;  %v8057_v29 = vld [vmem:[%s12118_s8 + $0x1fc] sm:$0xf0] }
 0xa06   :  { %5896 = vmatmul.bf16.gmra.mxu0 %v8052_v3  ;;  %v8020_v3 = vor.u32 %v8576_v61, %v8017_v39 }
 0xa07   :  { %6000 = vmatmul.bf16.gmra.mxu1 %v8116_v62 }
 0xa08   :  { %v11638_v12 = vpop.f32.mrf.mxu3  ;;  %v6015_v20 = vpop.f32.mrf.mxu2 }
 0xa09   :  { %v11641_v33 = vadd.f32 %v6015_v20, %v11500_v0  ;;  %v8590_v0 = vld [vmem:[%s12118_s8 + $0x20c] sm:$0xf] }
 0xa0a   :  { %v8072_v5 = vor.u32 %v8590_v0, %v8069_v8 }
 0xa10   :  { %v11661_v21 = vpop.f32.mrf.mxu3  ;;  %v6017_v49 = vpop.f32.mrf.mxu2 }
 0xa11   :  { %v11664_v60 = vadd.f32 %v6017_v49, %v11513_v48 }
 0xa15   :  { %8125 = vmatmul.msk.bf16.vlgmr.msrb.gmra.mxu3 %vm5690_vm0, %v7824_v59  ;;  %6059 = vmatmul.bf16.gmra.mxu2 %v8000_v54  ;;  %v8040_v54 = vor.u32 %v8581_v10, %v8037_v13  ;;  %v7923_v13 = vld [vmem:[%s12118_s8 + $0xd8] sm:$0xf] }
 0xa16   :  { %5901 = vmatmul.bf16.gmra.mxu0 %v8072_v5 }
 0xa18   :  { %v11673_v31 = vpop.f32.mrf.mxu3  ;;  %v6020_v48 = vpop.f32.mrf.mxu2 }
 0xa19   :  { %v11676_v22 = vadd.f32 %v6020_v48, %v11532_v26  ;;  %v8595_v26 = vld [vmem:[%s12118_s8 + $0x234] sm:$0xf]  ;;  %v7883_v48 = vld [vmem:[%s12118_s8 + $0x88] sm:$0xf] }
 0xa1a   :  { %v8092_v50 = vor.u32 %v8595_v26, %v8089_v2  ;;  %v8060_v2 = vor.u32 %v8586_v53, %v8057_v29  ;;  %v8601_v53 = vld [vmem:[%s12118_s8 + $0x264] sm:$0xf]  ;;  %v8117_v29 = vld [vmem:[%s12118_s8 + $0x274] sm:$0xf0] }
 0xa20   :  { %v11696_v32 = vpop.f32.mrf.mxu3  ;;  %v6022_v47 = vpop.f32.mrf.mxu2 }
 0xa21   :  { %v11699_v44 = vadd.f32 %v6022_v47, %v11545_v28  ;;  %v8539_v28 = vld [vmem:[%s12118_s8 + $0x70] sm:$0xf0] }
 0xa22   :  { %v7864_v49 = vor.u32 %v8539_v28, %v7863_v43 }
 0xa25   :  { %8126 = vmatmul.msk.bf16.gmra.mxu3 %vm5690_vm0, %v7844_v7  ;;  %6064 = vmatmul.bf16.gmra.mxu2 %v8020_v3  ;;  %v7903_v7 = vld [vmem:[%s12118_s8 + $0xb0] sm:$0xf]  ;;  %v8549_v3 = vld [vmem:[%s12118_s8 + $0xc0] sm:$0xf0] }
 0xa26   :  { %5906 = vmatmul.bf16.gmra.mxu0 %v8092_v50  ;;  %v8591_v50 = vld [vmem:[%s12118_s8 + $0x214] sm:$0xf]  ;;  %v7904_v43 = vor.u32 %v8549_v3, %v7903_v7  ;;  %v7963_v3 = vld [vmem:[%s12118_s8 + $0x128] sm:$0xf] }
 0xa28   :  { %v11702_v37 = vpop.f32.mrf.mxu3  ;;  %v6025_v6 = vpop.f32.mrf.mxu2 }
 0xa29   :  { %v11705_v20 = vadd.f32 %v6025_v6, %v11565_v30  ;;  %v8600_v30 = vld [vmem:[%s12118_s8 + $0x25c] sm:$0xf] }
 0xa2a   :  { %v8112_v5 = vor.u32 %v8600_v30, %v8109_v14  ;;  %v8554_v30 = vld [vmem:[%s12118_s8 + $0xe8] sm:$0xf0]  ;;  %v8596_v14 = vld [vmem:[%s12118_s8 + $0x23c] sm:$0xf] }
 0xa30   :  { %v11725_v0 = vpop.f32.mrf.mxu3  ;;  %v6027_v8 = vpop.f32.mrf.mxu2 }
 0xa31   :  { %v11728_v59 = vadd.f32 %v6027_v8, %v11579_v4  ;;  %v8544_v4 = vld [vmem:[%s12118_s8 + $0x98] sm:$0xf0]  ;;  %v8097_v8 = vld [vmem:[%s12118_s8 + $0x24c] sm:$0xf0] }
 0xa32   :  { %v7884_v39 = vor.u32 %v8544_v4, %v7883_v48  ;;  %v7943_v48 = vld [vmem:[%s12118_s8 + $0x100] sm:$0xf]  ;;  %v8559_v4 = vld [vmem:[%s12118_s8 + $0x110] sm:$0xf0] }
 0xa35   :  { %8127 = vmatmul.msk.bf16.gmra.mxu3 %vm5690_vm0, %v7864_v49  ;;  %6069 = vmatmul.bf16.gmra.mxu2 %v8040_v54  ;;  %v7924_v54 = vor.u32 %v8554_v30, %v7923_v13  ;;  %v7983_v13 = vld [vmem:[%s12118_s8 + $0x150] sm:$0xf]  ;;  %v8569_v30 = vld [vmem:[%s12118_s8 + $0x160] sm:$0xf0] }
 0xa36   :  { %5911 = vmatmul.bf16.gmra.mxu0 %v8112_v5  ;;  %v8100_v5 = vor.u32 %v8596_v14, %v8097_v8  ;;  %v11829_v8 = vld [vmem:[%s12116_s6] ss:$0 sm:$0xff] }
 0xa38   :  { %v11731_v45 = vpop.f32.mrf.mxu3  ;;  %v6030_v19 = vpop.f32.mrf.mxu2 }
 0xa39   :  { %v11734_v62 = vadd.f32 %v6030_v19, %v11599_v15 }
 0xa40   :  { %v11748_v61 = vpop.f32.mrf.mxu3  ;;  %v6032_v15 = vpop.f32.mrf.mxu2 }
 0xa41   :  { %v11751_v26 = vadd.f32 %v6032_v15, %v11613_v1  ;;  %v8077_v1 = vld [vmem:[%s12118_s8 + $0x224] sm:$0xf0] }
 0xa42   :  { %v8080_v28 = vor.u32 %v8591_v50, %v8077_v1  ;;  %v8564_v50 = vld [vmem:[%s12118_s8 + $0x138] sm:$0xf0] }
 0xa45   :  { %8128 = vmatmul.msk.bf16.gmra.mxu3 %vm5690_vm0, %v7884_v39  ;;  %6074 = vmatmul.bf16.gmra.mxu2 %v8060_v2  ;;  %v7944_v39 = vor.u32 %v8559_v4, %v7943_v48  ;;  %v8120_v2 = vor.u32 %v8601_v53, %v8117_v29  ;;  %v11837_v48 = vld [vmem:[%s12120_s10] ss:$0 sm:$0xff]  ;;  %s6254_s10 = sshll.u32 %s12121_s11, 4  ;;  %s6255_s10 = int_to_ptr.hbm [resolvable:$true] %s6254_s10 }
 0xa48   :  { %v11754_v47 = vpop.f32.mrf.mxu3 }
 0xa50   :  { %v11768_v6 = vpop.f32.mrf.mxu3 }
 0xa55   :  { %8129 = vmatmul.msk.bf16.gmra.mxu3 %vm5690_vm0, %v7904_v43  ;;  %6079 = vmatmul.bf16.gmra.mxu2 %v8080_v28  ;;  %v7964_v43 = vor.u32 %v8564_v50, %v7963_v3  ;;  %v8574_v3 = vld [vmem:[%s12118_s8 + $0x188] sm:$0xf0]  ;;  %v11849_v50 = vpop.f32.mrf.mxu0 }
 0xa58   :  { %v11771_v10 = vpop.f32.mrf.mxu3 }
 0xa60   :  { %v11785_v49 = vpop.f32.mrf.mxu3 }
 0xa65   :  { %8130 = vmatmul.msk.bf16.gmra.mxu3 %vm5690_vm0, %v7924_v54  ;;  %6084 = vmatmul.bf16.gmra.mxu2 %v8100_v5  ;;  %v7984_v54 = vor.u32 %v8569_v30, %v7983_v13  ;;  %v3847_v5 = vadd.f32 %v11829_v8, %v10788_v63  ;;  %v8003_v63 = vld [vmem:[%s12118_s8 + $0x178] sm:$0xf] }
 0xa66   :  { %v8004_v30 = vor.u32 %v8574_v3, %v8003_v63  ;;  %v3850_v63 = vadd.f32 %v11829_v8, %v10835_v34 }
 0xa67   :  { %v5162_v53 = vadd.f32 %v11837_v48, %v3847_v5  ;;  %v11853_v5 = vpop.f32.mrf.mxu1 }
 0xa68   :  { %v11788_v19 = vpop.f32.mrf.mxu3 }
 0xa6f   :  { %v11866_v3 = vpop.f32.mrf.mxu1 }
 0xa70   :  { %v11802_v15 = vpop.f32.mrf.mxu3 }
 0xa75   :  { %8131 = vmatmul.msk.bf16.gmra.mxu3 %vm5690_vm0, %v7944_v39  ;;  %6089 = vmatmul.bf16.gmra.mxu2 %v8120_v2  ;;  %v3848_v2 = vadd.f32 %v11829_v8, %v10794_v9  ;;  %v3849_v9 = vadd.f32 %v11829_v8, %v10827_v17  ;;  %v8023_v17 = vld [vmem:[%s12118_s8 + $0x1a0] sm:$0xf] }
 0xa77   :  { %v5163_v13 = vadd.f32 %v11837_v48, %v3848_v2  ;;  %v11862_v2 = vpop.f32.mrf.mxu0 }
 0xa78   :  { %v11805_v7 = vpop.f32.mrf.mxu3 }
 0xa80   :  { %v11813_v1 = vpop.f32.mrf.mxu3 }
 0xa85   :  { %8132 = vmatmul.msk.bf16.gmra.mxu3 %vm5690_vm0, %v7964_v43 }
 0xa88   :  { %v11816_v28 = vpop.f32.mrf.mxu3 }
 0xa90   :  { %v11824_v14 = vpop.f32.mrf.mxu3 }
 0xa91   :  { %12235 = vst [vmem:[#allocation54_spill] sm:$0xff] %v11824_v14 }
 0xa95   :  { %8133 = vmatmul.msk.bf16.gmra.mxu3 %vm5690_vm0, %v7984_v54 }
 0xa98   :  { %v6104_v4 = vpop.f32.mrf.mxu3 }
 0xa99   :  { %v6105_v29 = vadd.f32 %v6104_v4, %v11641_v33  ;;  %v11858_v4 = vpop.f32.mrf.mxu2 }
 0xa9b   :  { %v6184_v39 = vadd.f32 %v6105_v29, %v5162_v53  ;;  %v5164_v29 = vadd.f32 %v11837_v48, %v3849_v9  ;;  %v11878_v9 = vpop.f32.mrf.mxu0 }
 0xa9d   :  { %6216 = vst [vmem:[#allocation11] sm:$0xff] %v6184_v39 }
 0xaa0   :  { %v6106_v43 = vpop.f32.mrf.mxu3 }
 0xaa1   :  { %v6107_v33 = vadd.f32 %v6106_v43, %v11664_v60  ;;  %v8579_v43 = vld [vmem:[%s12118_s8 + $0x1b0] sm:$0xf0] }
 0xaa3   :  { %v6185_v54 = vadd.f32 %v6107_v33, %v5163_v13  ;;  %v11874_v13 = vpop.f32.mrf.mxu2  ;;  %v5165_v33 = vadd.f32 %v11837_v48, %v3850_v63 }
 0xaa5   :  { %6217 = vst [vmem:[#allocation11 + $0x8] sm:$0xff] %v6185_v54  ;;  %8134 = vmatmul.msk.bf16.gmra.mxu3 %vm5690_vm0, %v8004_v30  ;;  %v8024_v54 = vor.u32 %v8579_v43, %v8023_v17  ;;  %v3852_v17 = vadd.f32 %v11829_v8, %v10874_v55  ;;  %v11891_v43 = vpop.f32.mrf.mxu0 }
 0xaa8   :  { %v6109_v53 = vpop.f32.mrf.mxu3 }
 0xaa9   :  { %v6110_v39 = vadd.f32 %v6109_v53, %v11676_v22  ;;  %v3851_v53 = vadd.f32 %v11829_v8, %v10866_v46  ;;  %v8043_v46 = vld [vmem:[%s12118_s8 + $0x1c8] sm:$0xf] }
 0xaab   :  { %v6186_v60 = vadd.f32 %v6110_v39, %v5164_v29  ;;  %v11883_v29 = vpop.f32.mrf.mxu1  ;;  %v11887_v63 = vpop.f32.mrf.mxu2 }
 0xaad   :  { %6218 = vst [vmem:[#allocation11 + $0x10] sm:$0xff] %v6186_v60  ;;  %v5166_v60 = vadd.f32 %v11837_v48, %v3851_v53  ;;  %v3853_v53 = vadd.f32 %v11829_v8, %v10905_v11  ;;  %v8063_v11 = vld [vmem:[%s12118_s8 + $0x1f0] sm:$0xf] }
 0xab0   :  { %v6111_v22 = vpop.f32.mrf.mxu3 }
 0xab1   :  { %v6112_v30 = vadd.f32 %v6111_v22, %v11699_v44  ;;  %v8584_v22 = vld [vmem:[%s12118_s8 + $0x1d8] sm:$0xf0] }
 0xab3   :  { %v6187_v34 = vadd.f32 %v6112_v30, %v5165_v33 }
 0xab5   :  { %6219 = vst [vmem:[#allocation11 + $0x18] sm:$0xff] %v6187_v34  ;;  %8135 = vmatmul.msk.bf16.gmra.mxu3 %vm5690_vm0, %v8024_v54  ;;  %v11901_v54 = vpop.f32.mrf.mxu1  ;;  %v11903_v34 = vpop.f32.mrf.mxu2 }
 0xab8   :  { %v6114_v39 = vpop.f32.mrf.mxu3 }
 0xab9   :  { %v6115_v14 = vadd.f32 %v6114_v39, %v11705_v20  ;;  %v5167_v20 = vadd.f32 %v11837_v48, %v3852_v17  ;;  %v11908_v39 = vpop.f32.mrf.mxu0 }
 0xabb   :  { %v6188_v44 = vadd.f32 %v6115_v14, %v5166_v60  ;;  %v8044_v14 = vor.u32 %v8584_v22, %v8043_v46  ;;  %v3854_v22 = vadd.f32 %v11829_v8, %v10915_v18 }
 0xabd   :  { %6220 = vst [vmem:[#allocation11 + $0x20] sm:$0xff] %v6188_v44  ;;  %v5168_v44 = vadd.f32 %v11837_v48, %v3853_v53  ;;  %v11912_v46 = vpop.f32.mrf.mxu1 }
 0xac0   :  { %v6116_v33 = vpop.f32.mrf.mxu3 }
 0xac1   :  { %v6117_v30 = vadd.f32 %v6116_v33, %v11728_v59  ;;  %v11916_v33 = vpop.f32.mrf.mxu2  ;;  %v11928_v53 = vpop.f32.mrf.mxu0 }
 0xac3   :  { %v6189_v55 = vadd.f32 %v6117_v30, %v5167_v20  ;;  %v8589_v20 = vld [vmem:[%s12118_s8 + $0x200] sm:$0xf0] }
 0xac4   :  { %v8064_v18 = vor.u32 %v8589_v20, %v8063_v11 }
 0xac5   :  { %6221 = vst [vmem:[#allocation11 + $0x28] sm:$0xff] %v6189_v55  ;;  %8136 = vmatmul.msk.bf16.gmra.mxu3 %vm5690_vm0, %v8044_v14  ;;  %v5169_v14 = vadd.f32 %v11837_v48, %v3854_v22 }
 0xac8   :  { %v6119_v60 = vpop.f32.mrf.mxu3 }
 0xac9   :  { %v6120_v17 = vadd.f32 %v6119_v60, %v11734_v62  ;;  %v5858_v62 = vadd.f32 %v11849_v50, %v11540_v51  ;;  %v3701_v51 = vadd.f32 %v10833_v38, %v10909_v23  ;;  %v8083_v23 = vld [vmem:[%s12118_s8 + $0x218] sm:$0xf] }
 0xacb   :  { %v6190_v59 = vadd.f32 %v6120_v17, %v5168_v44  ;;  %v3855_v44 = vadd.f32 %v11829_v8, %v10939_v42  ;;  %v5947_v17 = vadd.f32 %v11853_v5, %v5858_v62  ;;  %v3790_v11 = vadd.f32 %v10947_v58, %v3701_v51  ;;  %v11945_v62 = vpop.f32.mrf.mxu0  ;;  %v8594_v58 = vld [vmem:[%s12118_s8 + $0x228] sm:$0xf0] }
 0xacc   :  { %v5860_v42 = vadd.f32 %v11862_v2, %v11562_v24  ;;  %v3857_v51 = vadd.f32 %v11829_v8, %v10965_v41 }
 0xacd   :  { %6222 = vst [vmem:[#allocation11 + $0x30] sm:$0xff] %v6190_v59  ;;  %v11934_v59 = vpop.f32.mrf.mxu1  ;;  %v6036_v50 = vadd.f32 %v11858_v4, %v5947_v17  ;;  %v5170_v5 = vadd.f32 %v11837_v48, %v3855_v44 }
 0xace   :  { %v5949_v38 = vadd.f32 %v11866_v3, %v5860_v42  ;;  %v5865_v42 = vadd.f32 %v11891_v43, %v11596_v25  ;;  %v5172_v41 = vadd.f32 %v11837_v48, %v3857_v51  ;;  %v5868_v43 = vadd.f32 %v11908_v39, %v11607_v56 }
 0xad0   :  { %v6121_v30 = vpop.f32.mrf.mxu3  ;;  %v6038_v24 = vadd.f32 %v11874_v13, %v5949_v38  ;;  %v5954_v38 = vadd.f32 %v11901_v54, %v5865_v42 }
 0xad1   :  { %v6122_v55 = vadd.f32 %v6121_v30, %v11751_v26  ;;  %v11939_v26 = vpop.f32.mrf.mxu2 }
 0xad3   :  { %v6191_v60 = vadd.f32 %v6122_v55, %v5169_v14  ;;  %v3856_v14 = vadd.f32 %v11829_v8, %v3790_v11  ;;  %v5863_v55 = vadd.f32 %v11878_v9, %v11573_v35  ;;  %v11967_v13 = vpop.f32.mrf.mxu0  ;;  %v3706_v35 = vadd.f32 %v10872_v57, %v10943_v40  ;;  %v8103_v57 = vld [vmem:[%s12118_s8 + $0x240] sm:$0xf]  ;;  %v8599_v40 = vld [vmem:[%s12118_s8 + $0x250] sm:$0xf0] }
 0xad4   :  { %v8104_v54 = vor.u32 %v8599_v40, %v8103_v57  ;;  %v12238_v40 = vld [vmem:[#allocation22_spill] sm:$0xff] }
 0xad5   :  { %6223 = vst [vmem:[#allocation11 + $0x38] sm:$0xff] %v6191_v60  ;;  %8137 = vmatmul.msk.bf16.gmra.mxu3 %vm5690_vm0, %v8064_v18  ;;  %v11956_v4 = vpop.f32.mrf.mxu1  ;;  %v5171_v18 = vadd.f32 %v11837_v48, %v3856_v14  ;;  %v8084_v60 = vor.u32 %v8594_v58, %v8083_v23  ;;  %v3795_v11 = vadd.f32 %v10971_v52, %v3706_v35 }
 0xad6   :  { %v6043_v52 = vadd.f32 %v11903_v34, %v5954_v38 }
 0xad7   :  { %v3858_v14 = vadd.f32 %v11829_v8, %v3795_v11 }
 0xad8   :  { %v6124_v22 = vpop.f32.mrf.mxu3 }
 0xad9   :  { %v6125_v20 = vadd.f32 %v6124_v22, %v6036_v50  ;;  %v11961_v44 = vpop.f32.mrf.mxu2  ;;  %v5952_v50 = vadd.f32 %v11883_v29, %v5863_v55  ;;  %v5173_v23 = vadd.f32 %v11837_v48, %v3858_v14  ;;  %v3859_v55 = vadd.f32 %v11829_v8, %v10983_v16 }
 0xadb   :  { %v6192_v30 = vadd.f32 %v6125_v20, %v5170_v5  ;;  %v6041_v9 = vadd.f32 %v11887_v63, %v5952_v50  ;;  %v5877_v25 = vpop.f32.mrf.mxu0  ;;  %v5870_v50 = vadd.f32 %v11928_v53, %v11630_v36  ;;  %v5174_v35 = vadd.f32 %v11837_v48, %v3859_v55 }
 0xadc   :  { %v5875_v55 = vadd.f32 %v11967_v13, %v11661_v21  ;;  %v12242_v13 = vld [vmem:[#allocation25_spill] sm:$0xff] }
 0xadd   :  { %6224 = vst [vmem:[#allocation11 + $0x40] sm:$0xff] %v6192_v30  ;;  %v5963_v29 = vpop.f32.mrf.mxu1  ;;  %v5959_v11 = vadd.f32 %v11934_v59, %v5870_v50 }
 0xadf   :  { %v6048_v36 = vadd.f32 %v11939_v26, %v5959_v11  ;;  %v12239_v26 = vld [vmem:[#allocation19_spill] sm:$0xff]  ;;  %v3863_v11 = vadd.f32 %v11829_v8, %v12242_v13 }
 0xae0   :  { %v6126_v2 = vpop.f32.mrf.mxu3 }
 0xae1   :  { %v6127_v3 = vadd.f32 %v6126_v2, %v6038_v24  ;;  %v6052_v30 = vpop.f32.mrf.mxu2 }
 0xae3   :  { %v6193_v17 = vadd.f32 %v6127_v3, %v5171_v18  ;;  %v5957_v18 = vadd.f32 %v11912_v46, %v5868_v43  ;;  %v12236_v3 = vld [vmem:[#allocation16_spill] sm:$0xff]  ;;  %v12240_v43 = vld [vmem:[#allocation17_spill] sm:$0xff] }
 0xae5   :  { %6225 = vst [vmem:[#allocation11 + $0x48] sm:$0xff] %v6193_v17  ;;  %8138 = vmatmul.msk.bf16.gmra.mxu3 %vm5690_vm0, %v8084_v60  ;;  %v5966_v2 = vpop.f32.mrf.mxu1  ;;  %v3711_v60 = vadd.f32 %v12236_v3, %v10969_v27  ;;  %v6046_v56 = vadd.f32 %v11916_v33, %v5957_v18  ;;  %v12237_v17 = vld [vmem:[#allocation20_spill] sm:$0xff]  ;;  %v8123_v27 = vld [vmem:[%s12118_s8 + $0x268] sm:$0xf]  ;;  %v8604_v33 = vld [vmem:[%s12118_s8 + $0x278] sm:$0xf0] }
 0xae6   :  { %v8124_v14 = vor.u32 %v8604_v33, %v8123_v27  ;;  %v12243_v33 = vld [vmem:[#allocation23_spill] sm:$0xff]  ;;  %s8804_s8 = smov [#allocation11]  }
 0xae7   :  { %v3800_v51 = vadd.f32 %v12237_v17, %v3711_v60  ;;  %s6252_s23 = sshll.u32 %s8804_s8, 4  ;;  %s6253_s23 = int_to_ptr.vmem [resolvable:$true] %s6252_s23 }
 0xae8   :  { %v6129_v22 = vpop.f32.mrf.mxu3 }
 0xae9   :  { %v6130_v5 = vadd.f32 %v6129_v22, %v6041_v9  ;;  %v6055_v34 = vpop.f32.mrf.mxu2  ;;  %v5879_v9 = vpop.f32.mrf.mxu0  ;;  %v3860_v22 = vadd.f32 %v11829_v8, %v3800_v51 }
 0xaeb   :  { %v6194_v20 = vadd.f32 %v6130_v5, %v5172_v41  ;;  %v5873_v5 = vadd.f32 %v11945_v62, %v11638_v12 }
 0xaed   :  { %6226 = vst [vmem:[#allocation11 + $0x50] sm:$0xff] %v6194_v20  ;;  %v5968_v42 = vpop.f32.mrf.mxu1  ;;  %v5175_v20 = vadd.f32 %v11837_v48, %v3860_v22 }
 0xaf0   :  { %v6131_v63 = vpop.f32.mrf.mxu3 }
 0xaf1   :  { %v6132_v58 = vadd.f32 %v6131_v63, %v6043_v52  ;;  %v6057_v53 = vpop.f32.mrf.mxu2  ;;  %v5882_v57 = vpop.f32.mrf.mxu0  ;;  %v3861_v52 = vadd.f32 %v11829_v8, %v12238_v40  ;;  %v5962_v63 = vadd.f32 %v11956_v4, %v5873_v5 }
 0xaf3   :  { %v6195_v24 = vadd.f32 %v6132_v58, %v5173_v23  ;;  %v3716_v23 = vadd.f32 %v12240_v43, %v12239_v26  ;;  %v6051_v58 = vadd.f32 %v11961_v44, %v5962_v63  ;;  %v5176_v18 = vadd.f32 %v11837_v48, %v3861_v52 }
 0xaf4   :  { %v5878_v44 = vadd.f32 %v5877_v25, %v11673_v31  ;;  %v5880_v31 = vadd.f32 %v5879_v9, %v11696_v32  ;;  %v5178_v25 = vadd.f32 %v11837_v48, %v3863_v11  ;;  %v12246_v32 = vld [vmem:[#allocation29_spill] sm:$0xff] }
 0xaf5   :  { %6227 = vst [vmem:[#allocation11 + $0x58] sm:$0xff] %v6195_v24  ;;  %8139 = vmatmul.msk.bf16.gmra.mxu3 %vm5690_vm0, %v8104_v54  ;;  %v5971_v12 = vpop.f32.mrf.mxu1  ;;  %v12241_v54 = vld [vmem:[#allocation24_spill] sm:$0xff]  ;;  %v3865_v9 = vadd.f32 %v11829_v8, %v12246_v32 }
 0xaf6   :  { %v3805_v24 = vadd.f32 %v12241_v54, %v3716_v23  ;;  %v5967_v27 = vadd.f32 %v5966_v2, %v5878_v44  ;;  %v5969_v63 = vadd.f32 %v5968_v42, %v5880_v31 }
 0xaf8   :  { %v6134_v39 = vpop.f32.mrf.mxu3  ;;  %v6058_v26 = vadd.f32 %v6057_v53, %v5969_v63 }
 0xaf9   :  { %v6135_v16 = vadd.f32 %v6134_v39, %v6046_v56  ;;  %v6060_v60 = vpop.f32.mrf.mxu2  ;;  %v3862_v56 = vadd.f32 %v11829_v8, %v3805_v24  ;;  %v5964_v39 = vadd.f32 %v5963_v29, %v5875_v55  ;;  %v5884_v17 = vpop.f32.mrf.mxu0 }
 0xafb   :  { %v6196_v46 = vadd.f32 %v6135_v16, %v5174_v35  ;;  %v6053_v51 = vadd.f32 %v6052_v30, %v5964_v39  ;;  %v5177_v35 = vadd.f32 %v11837_v48, %v3862_v56  ;;  %v12249_v39 = vld [vmem:[#allocation32_spill] sm:$0xff] }
 0xafd   :  { %6228 = vst [vmem:[#allocation11 + $0x60] sm:$0xff] %v6196_v46  ;;  %v5973_v46 = vpop.f32.mrf.mxu1 }
 0xb00   :  { %v6136_v41 = vpop.f32.mrf.mxu3 }
 0xb01   :  { %v6137_v59 = vadd.f32 %v6136_v41, %v6048_v36  ;;  %v6062_v21 = vpop.f32.mrf.mxu2  ;;  %v12244_v36 = vld [vmem:[#allocation18_spill] sm:$0xff]  ;;  %v6056_v41 = vadd.f32 %v6055_v34, %v5967_v27  ;;  %v5887_v5 = vpop.f32.mrf.mxu0  ;;  %v5883_v34 = vadd.f32 %v5882_v57, %v11702_v37  ;;  %v5885_v37 = vadd.f32 %v5884_v17, %v11725_v0  ;;  %v12250_v0 = vld [vmem:[#allocation33_spill] sm:$0xff] }
 0xb02   :  { %v3721_v29 = vadd.f32 %v12244_v36, %v12243_v33  ;;  %v5180_v57 = vadd.f32 %v11837_v48, %v3865_v9  ;;  %v3867_v17 = vadd.f32 %v11829_v8, %v12250_v0 }
 0xb03   :  { %v6197_v38 = vadd.f32 %v6137_v59, %v5175_v20  ;;  %v12245_v20 = vld [vmem:[#allocation28_spill] sm:$0xff]  ;;  %v5972_v24 = vadd.f32 %v5971_v12, %v5883_v34  ;;  %v5974_v12 = vadd.f32 %v5973_v46, %v5885_v37 }
 0xb04   :  { %v3810_v59 = vadd.f32 %v12245_v20, %v3721_v29  ;;  %v12251_v20 = vld [vmem:[#allocation30_spill] sm:$0xff] }
 0xb05   :  { %6229 = vst [vmem:[#allocation11 + $0x68] sm:$0xff] %v6197_v38  ;;  %8140 = vmatmul.msk.bf16.gmra.mxu3 %vm5690_vm0, %v8124_v14  ;;  %v5976_v40 = vpop.f32.mrf.mxu1 }
 0xb06   :  { %v3864_v52 = vadd.f32 %v11829_v8, %v3810_v59  ;;  %v12252_v59 = vld [vmem:[#allocation26_spill] sm:$0xff] }
 0xb07   :  { %v3731_v46 = vadd.f32 %v12252_v59, %v12251_v20 }
 0xb08   :  { %v6139_v62 = vpop.f32.mrf.mxu3  ;;  %v5179_v23 = vadd.f32 %v11837_v48, %v3864_v52 }
 0xb09   :  { %v6140_v3 = vadd.f32 %v6139_v62, %v6051_v58  ;;  %v6065_v2 = vpop.f32.mrf.mxu2  ;;  %v5889_v62 = vpop.f32.mrf.mxu0 }
 0xb0b   :  { %v6198_v4 = vadd.f32 %v6140_v3, %v5176_v18  ;;  %v12247_v18 = vld [vmem:[#allocation27_spill] sm:$0xff]  ;;  %v12248_v3 = vld [vmem:[#allocation21_spill] sm:$0xff] }
 0xb0c   :  { %v3726_v42 = vadd.f32 %v12248_v3, %v12247_v18 }
 0xb0d   :  { %6230 = vst [vmem:[#allocation11 + $0x70] sm:$0xff] %v6198_v4  ;;  %v5978_v55 = vpop.f32.mrf.mxu1  ;;  %v6061_v4 = vadd.f32 %v6060_v60, %v5972_v24  ;;  %v5888_v60 = vadd.f32 %v5887_v5, %v11731_v45  ;;  %v5890_v45 = vadd.f32 %v5889_v62, %v11748_v61  ;;  %v5182_v5 = vadd.f32 %v11837_v48, %v3867_v17  ;;  %v12254_v62 = vld [vmem:[#allocation37_spill] sm:$0xff] }
 0xb0e   :  { %v3869_v24 = vadd.f32 %v11829_v8, %v12254_v62  ;;  %v12263_v62 = vld [vmem:[#allocation42_spill] sm:$0xff] }
 0xb10   :  { %v6141_v50 = vpop.f32.mrf.mxu3  ;;  %v5184_v37 = vadd.f32 %v11837_v48, %v3869_v24  ;;  %v12264_v24 = vld [vmem:[#allocation40_spill] sm:$0xff] }
 0xb11   :  { %v6142_v16 = vadd.f32 %v6141_v50, %v6053_v51  ;;  %v6067_v56 = vpop.f32.mrf.mxu2  ;;  %v3815_v51 = vadd.f32 %v12249_v39, %v3726_v42  ;;  %v12255_v42 = vld [vmem:[#allocation34_spill] sm:$0xff]  ;;  %v12257_v39 = vld [vmem:[#allocation39_spill] sm:$0xff] }
 0xb13   :  { %v6199_v22 = vadd.f32 %v6142_v16, %v5177_v35  ;;  %v5892_v35 = vpop.f32.mrf.mxu0  ;;  %v3866_v16 = vadd.f32 %v11829_v8, %v3815_v51 }
 0xb15   :  { %6231 = vst [vmem:[#allocation11 + $0x78] sm:$0xff] %v6199_v22  ;;  %v6063_v22 = vadd.f32 %v6062_v21, %v5974_v12  ;;  %v5981_v13 = vpop.f32.mrf.mxu1  ;;  %v5181_v27 = vadd.f32 %v11837_v48, %v3866_v16 }
 0xb18   :  { %v6144_v30 = vpop.f32.mrf.mxu3 }
 0xb19   :  { %v6145_v14 = vadd.f32 %v6144_v30, %v6056_v41  ;;  %v6070_v36 = vpop.f32.mrf.mxu2  ;;  %v5977_v41 = vadd.f32 %v5976_v40, %v5888_v60  ;;  %v5979_v40 = vadd.f32 %v5978_v55, %v5890_v45 }
 0xb1b   :  { %v6200_v38 = vadd.f32 %v6145_v14, %v5178_v25  ;;  %v5894_v30 = vpop.f32.mrf.mxu0  ;;  %v6066_v31 = vadd.f32 %v6065_v2, %v5977_v41  ;;  %v12253_v25 = vld [vmem:[#allocation35_spill] sm:$0xff]  ;;  %v6068_v34 = vadd.f32 %v6067_v56, %v5979_v40  ;;  %v5893_v2 = vadd.f32 %v5892_v35, %v11754_v47  ;;  %v12259_v41 = vld [vmem:[#allocation38_spill] sm:$0xff] }
 0xb1c   :  { %v3820_v14 = vadd.f32 %v12253_v25, %v3731_v46  ;;  %v5895_v47 = vadd.f32 %v5894_v30, %v11768_v6  ;;  %v12260_v30 = vld [vmem:[#allocation36_spill] sm:$0xff] }
 0xb1d   :  { %6232 = vst [vmem:[#allocation11 + $0x80] sm:$0xff] %v6200_v38  ;;  %v5983_v52 = vpop.f32.mrf.mxu1  ;;  %v5982_v18 = vadd.f32 %v5981_v13, %v5893_v2  ;;  %v3741_v20 = vadd.f32 %v12260_v30, %v12259_v41  ;;  %v12269_v30 = vld [vmem:[#allocation50_spill] sm:$0xff] }
 0xb1e   :  { %v5984_v16 = vadd.f32 %v5983_v52, %v5895_v47 }
 0xb20   :  { %v6146_v43 = vpop.f32.mrf.mxu3 }
 0xb21   :  { %v6147_v58 = vadd.f32 %v6146_v43, %v6058_v26  ;;  %v6072_v26 = vpop.f32.mrf.mxu2  ;;  %v3868_v43 = vadd.f32 %v11829_v8, %v3820_v14 }
 0xb23   :  { %v6201_v54 = vadd.f32 %v6147_v58, %v5179_v23  ;;  %v5897_v23 = vpop.f32.mrf.mxu0 }
 0xb24   :  { %v5898_v60 = vadd.f32 %v5897_v23, %v11771_v10 }
 0xb25   :  { %6233 = vst [vmem:[#allocation11 + $0x88] sm:$0xff] %v6201_v54  ;;  %v5183_v54 = vadd.f32 %v11837_v48, %v3868_v43  ;;  %v5986_v61 = vpop.f32.mrf.mxu1 }
 0xb26   :  { %v5987_v17 = vadd.f32 %v5986_v61, %v5898_v60 }
 0xb28   :  { %v6149_v53 = vpop.f32.mrf.mxu3 }
 0xb29   :  { %v6150_v50 = vadd.f32 %v6149_v53, %v6061_v4  ;;  %v6075_v3 = vpop.f32.mrf.mxu2  ;;  %v12256_v4 = vld [vmem:[#allocation31_spill] sm:$0xff]  ;;  %v6071_v53 = vadd.f32 %v6070_v36, %v5982_v18  ;;  %v3746_v18 = vadd.f32 %v12264_v24, %v12263_v62  ;;  %v12274_v62 = vld [vmem:[#allocation54_spill] sm:$0xff] }
 0xb2a   :  { %v3736_v55 = vadd.f32 %v12256_v4, %v12255_v42  ;;  %v6076_v59 = vadd.f32 %v6075_v3, %v5987_v17 }
 0xb2b   :  { %v6202_v44 = vadd.f32 %v6150_v50, %v5180_v57  ;;  %v5899_v50 = vpop.f32.mrf.mxu0 }
 0xb2c   :  { %v3825_v51 = vadd.f32 %v12257_v39, %v3736_v55  ;;  %v5900_v10 = vadd.f32 %v5899_v50, %v11785_v49  ;;  %v12265_v55 = vld [vmem:[#allocation47_spill] sm:$0xff] }
 0xb2d   :  { %6234 = vst [vmem:[#allocation11 + $0x90] sm:$0xff] %v6202_v44  ;;  %v5988_v12 = vpop.f32.mrf.mxu1 }
 0xb2e   :  { %v3870_v35 = vadd.f32 %v11829_v8, %v3825_v51 }
 0xb30   :  { %v6151_v11 = vpop.f32.mrf.mxu3 }
 0xb31   :  { %v6152_v33 = vadd.f32 %v6151_v11, %v6063_v22  ;;  %v6073_v22 = vadd.f32 %v6072_v26, %v5984_v16  ;;  %v6077_v13 = vpop.f32.mrf.mxu2 }
 0xb33   :  { %v6203_v29 = vadd.f32 %v6152_v33, %v5181_v27  ;;  %v5185_v27 = vadd.f32 %v11837_v48, %v3870_v35  ;;  %v5902_v6 = vpop.f32.mrf.mxu0 }
 0xb35   :  { %6235 = vst [vmem:[#allocation11 + $0x98] sm:$0xff] %v6203_v29  ;;  %v12258_v29 = vld [vmem:[#allocation41_spill] sm:$0xff]  ;;  %v5991_v46 = vpop.f32.mrf.mxu1 }
 0xb36   :  { %v3871_v0 = vadd.f32 %v11829_v8, %v12258_v29 }
 0xb38   :  { %v6154_v21 = vpop.f32.mrf.mxu3  ;;  %v5186_v14 = vadd.f32 %v11837_v48, %v3871_v0 }
 0xb39   :  { %v6155_v38 = vadd.f32 %v6154_v21, %v6066_v31  ;;  %v12261_v21 = vld [vmem:[#allocation43_spill] sm:$0xff] }
 0xb3a   :  { %v3830_v25 = vadd.f32 %v12261_v21, %v3741_v20 }
 0xb3b   :  { %v6204_v63 = vadd.f32 %v6155_v38, %v5182_v5  ;;  %v6080_v5 = vpop.f32.mrf.mxu2  ;;  %v5904_v26 = vpop.f32.mrf.mxu0 }
 0xb3c   :  { %v3872_v52 = vadd.f32 %v11829_v8, %v3830_v25 }
 0xb3d   :  { %6236 = vst [vmem:[#allocation11 + $0xa0] sm:$0xff] %v6204_v63  ;;  %v5989_v63 = vadd.f32 %v5988_v12, %v5900_v10  ;;  %v5993_v2 = vpop.f32.mrf.mxu1 }
 0xb3e   :  { %v5187_v23 = vadd.f32 %v11837_v48, %v3872_v52 }
 0xb3f   :  { %v6078_v43 = vadd.f32 %v6077_v13, %v5989_v63 }
 0xb40   :  { %v6156_v58 = vpop.f32.mrf.mxu3 }
 0xb41   :  { %v6157_v32 = vadd.f32 %v6156_v58, %v6068_v34  ;;  %v5903_v34 = vadd.f32 %v5902_v6, %v11788_v19  ;;  %v5905_v19 = vadd.f32 %v5904_v26, %v11802_v15  ;;  %v12266_v15 = vld [vmem:[#allocation48_spill] sm:$0xff]  ;;  %v12268_v6 = vld [vmem:[#allocation45_spill] sm:$0xff] }
 0xb42   :  { %v3875_v60 = vadd.f32 %v11829_v8, %v12266_v15 }
 0xb43   :  { %v6205_v9 = vadd.f32 %v6157_v32, %v5183_v54  ;;  %v6082_v49 = vpop.f32.mrf.mxu2  ;;  %v12262_v32 = vld [vmem:[#allocation44_spill] sm:$0xff]  ;;  %v5992_v61 = vadd.f32 %v5991_v46, %v5903_v34  ;;  %v5907_v42 = vpop.f32.mrf.mxu0 }
 0xb44   :  { %v5908_v16 = vadd.f32 %v5907_v42, %v11805_v7 }
 0xb45   :  { %6237 = vst [vmem:[#allocation11 + $0xa8] sm:$0xff] %v6205_v9  ;;  %v3873_v9 = vadd.f32 %v11829_v8, %v12262_v32  ;;  %v6081_v3 = vadd.f32 %v6080_v5, %v5992_v61  ;;  %v5996_v47 = vpop.f32.mrf.mxu1 }
 0xb48   :  { %v6159_v56 = vpop.f32.mrf.mxu3 }
 0xb49   :  { %v6160_v57 = vadd.f32 %v6159_v56, %v6071_v53  ;;  %v3835_v53 = vadd.f32 %v12265_v55, %v3746_v18  ;;  %v5188_v56 = vadd.f32 %v11837_v48, %v3873_v9  ;;  %v12273_v9 = vld [vmem:[#allocation53_spill] sm:$0xff] }
 0xb4b   :  { %v6206_v44 = vadd.f32 %v6160_v57, %v5184_v37  ;;  %v3874_v37 = vadd.f32 %v11829_v8, %v3835_v53  ;;  %v5994_v57 = vadd.f32 %v5993_v2, %v5905_v19  ;;  %v6085_v50 = vpop.f32.mrf.mxu2  ;;  %v5909_v13 = vpop.f32.mrf.mxu0  ;;  %v12272_v2 = vld [vmem:[#allocation52_spill] sm:$0xff] }
 0xb4c   :  { %v5910_v7 = vadd.f32 %v5909_v13, %v11813_v1  ;;  %v12270_v1 = vld [vmem:[#allocation51_spill] sm:$0xff] }
 0xb4d   :  { %6238 = vst [vmem:[#allocation11 + $0xb0] sm:$0xff] %v6206_v44  ;;  %v6083_v44 = vadd.f32 %v6082_v49, %v5994_v57  ;;  %v5189_v12 = vadd.f32 %v11837_v48, %v3874_v37 }
 0xb50   :  { %v6161_v11 = vpop.f32.mrf.mxu3 }
 0xb51   :  { %v6162_v33 = vadd.f32 %v6161_v11, %v6073_v22 }
 0xb53   :  { %v6207_v36 = vadd.f32 %v6162_v33, %v5185_v27  ;;  %v5997_v27 = vadd.f32 %v5996_v47, %v5908_v16  ;;  %v5998_v33 = vpop.f32.mrf.mxu1  ;;  %v6087_v17 = vpop.f32.mrf.mxu2 }
 0xb54   :  { %v5912_v21 = vpop.f32.mrf.mxu0  ;;  %v5999_v10 = vadd.f32 %v5998_v33, %v5910_v7 }
 0xb55   :  { %6239 = vst [vmem:[#allocation11 + $0xb8] sm:$0xff] %v6207_v36  ;;  %v12267_v36 = vld [vmem:[#allocation46_spill] sm:$0xff]  ;;  %v6086_v0 = vadd.f32 %v6085_v50, %v5997_v27 }
 0xb56   :  { %v3751_v29 = vadd.f32 %v12268_v6, %v12267_v36 }
 0xb58   :  { %v6164_v31 = vpop.f32.mrf.mxu3  ;;  %v3840_v20 = vadd.f32 %v12269_v30, %v3751_v29 }
 0xb59   :  { %v6165_v45 = vadd.f32 %v6164_v31, %v6076_v59  ;;  %v5190_v59 = vadd.f32 %v11837_v48, %v3875_v60 }
 0xb5a   :  { %v3876_v25 = vadd.f32 %v11829_v8, %v3840_v20 }
 0xb5b   :  { %v6208_v38 = vadd.f32 %v6165_v45, %v5186_v14  ;;  %v6088_v14 = vadd.f32 %v6087_v17, %v5999_v10  ;;  %v6001_v45 = vpop.f32.mrf.mxu1  ;;  %v6090_v26 = vpop.f32.mrf.mxu2 }
 0xb5c   :  { %v5191_v52 = vadd.f32 %v11837_v48, %v3876_v25 }
 0xb5d   :  { %6240 = vst [vmem:[#allocation11 + $0xc0] sm:$0xff] %v6208_v38  ;;  %v5913_v38 = vadd.f32 %v5912_v21, %v11816_v28 }
 0xb5f   :  { %v6002_v34 = vadd.f32 %v6001_v45, %v5913_v38 }
 0xb60   :  { %v6166_v40 = vpop.f32.mrf.mxu3 }
 0xb61   :  { %v6167_v58 = vadd.f32 %v6166_v40, %v6078_v43  ;;  %v3877_v40 = vadd.f32 %v11829_v8, %v12270_v1  ;;  %v6091_v49 = vadd.f32 %v6090_v26, %v6002_v34 }
 0xb63   :  { %v6209_v54 = vadd.f32 %v6167_v58, %v5187_v23  ;;  %v5914_v23 = vpop.f32.mrf.mxu0  ;;  %v12271_v58 = vld [vmem:[#allocation49_spill] sm:$0xff]  ;;  %v5192_v24 = vadd.f32 %v11837_v48, %v3877_v40 }
 0xb64   :  { %v5915_v28 = vadd.f32 %v5914_v23, %v12274_v62 }
 0xb65   :  { %6241 = vst [vmem:[#allocation11 + $0xc8] sm:$0xff] %v6209_v54  ;;  %v3756_v54 = vadd.f32 %v12272_v2, %v12271_v58 }
 0xb67   :  { %v3845_v61 = vadd.f32 %v12273_v9, %v3756_v54 }
 0xb68   :  { %v6169_v4 = vpop.f32.mrf.mxu3 }
 0xb69   :  { %v6170_v39 = vadd.f32 %v6169_v4, %v6081_v3  ;;  %v6003_v3 = vpop.f32.mrf.mxu1  ;;  %v6092_v4 = vpop.f32.mrf.mxu2  ;;  %v3878_v55 = vadd.f32 %v11829_v8, %v3845_v61 }
 0xb6a   :  { %v6004_v53 = vadd.f32 %v6003_v3, %v5915_v28 }
 0xb6b   :  { %v6210_v51 = vadd.f32 %v6170_v39, %v5188_v56  ;;  %v5193_v39 = vadd.f32 %v11837_v48, %v3878_v55 }
 0xb6c   :  { %v6093_v19 = vadd.f32 %v6092_v4, %v6004_v53 }
 0xb6d   :  { %6242 = vst [vmem:[#allocation11 + $0xd0] sm:$0xff] %v6210_v51 }
 0xb70   :  { %v6171_v35 = vpop.f32.mrf.mxu3 }
 0xb71   :  { %v6172_v22 = vadd.f32 %v6171_v35, %v6083_v44 }
 0xb73   :  { %v6211_v11 = vadd.f32 %v6172_v22, %v5189_v12 }
 0xb75   :  { %6243 = vst [vmem:[#allocation11 + $0xd8] sm:$0xff] %v6211_v11 }
 0xb78   :  { %v6174_v41 = vpop.f32.mrf.mxu3 }
 0xb79   :  { %v6175_v46 = vadd.f32 %v6174_v41, %v6086_v0 }
 0xb7b   :  { %v6212_v31 = vadd.f32 %v6175_v46, %v5190_v59 }
 0xb7d   :  { %6244 = vst [vmem:[#allocation11 + $0xe0] sm:$0xff] %v6212_v31 }
 0xb80   :  { %v6176_v5 = vpop.f32.mrf.mxu3 }
 0xb81   :  { %v6177_v63 = vadd.f32 %v6176_v5, %v6088_v14 }
 0xb83   :  { %v6213_v43 = vadd.f32 %v6177_v63, %v5191_v52 }
 0xb85   :  { %6245 = vst [vmem:[#allocation11 + $0xe8] sm:$0xff] %v6213_v43 }
 0xb88   :  { %v6179_v32 = vpop.f32.mrf.mxu3 }
 0xb89   :  { %v6180_v18 = vadd.f32 %v6179_v32, %v6091_v49 }
 0xb8b   :  { %v6214_v42 = vadd.f32 %v6180_v18, %v5192_v24 }
 0xb8d   :  { %6246 = vst [vmem:[#allocation11 + $0xf0] sm:$0xff] %v6214_v42 }
 0xb90   :  { %v6181_v56 = vpop.f32.mrf.mxu3 }
 0xb91   :  { %v6182_v51 = vadd.f32 %v6181_v56, %v6093_v19 }
 0xb93   :  { %v6215_v47 = vadd.f32 %v6182_v51, %v5193_v39 }
 0xb95   :  { %6247 = vst [vmem:[#allocation11 + $0xf8] sm:$0xff] %v6215_v47 }
 0xb96   :  { %6260 = dma.vmem_to_hbm [thread:$0]  %s6253_s23, 4096, %s6255_s10, [#allocation4], %s8796_s25, %s8796_s25, %s8797_s26  }
 0xb97   :  { %8793 = dma.done.wait [#allocation4], 4096  }
 0xb98   :  { %8794 = vsyncadd [#allocation4], 4294963200 }
 0xb99   :  { %6265 = vsyncpa [#allocation3], 1 }
 0xb9a   :  { %6266 = vsyncpa [#allocation6], 1 }
 0xb9b   :  { %6267 = vsyncpa [#allocation9], 1 }
 0xb9c   :  { %6268 = vsyncpa [#allocation4], 1 }

</bundles_post_ra>
